<compile_context>
chip_gen: v6e
topology: v6e:2x2x1
jax: 0.10.0
libtpu: 0.0.40
codegen_flags: <defaults>
</compile_context>

<pallas_src>
import jax
import jax.numpy as jnp
from jax.experimental import pallas as pl
from jax.experimental.pallas import tpu as pltpu


def _net_kernel(num_users, num_servers):
    U, S = num_users, num_servers

    def kernel(x_ref,
               w1_ref, b1_ref, w2_ref, b2_ref,
               w3_ref, b3_ref, w4_ref, b4_ref,
               o_ref):
        x_bf = x_ref[...].astype(jnp.bfloat16)                       # (TB, U)

        # ---- fused l1 -> l2, streamed in S-wide (128) lane-aligned chunks ----
        # Never materializes the (TB, U*S) f32 hidden layer (avoids vreg spill).
        acc2 = jnp.zeros((x_ref.shape[0], U), jnp.float32)
        for c in range(U):
            lo = c * S
            h1c = jnp.dot(x_bf, w1_ref[:, lo:lo + S],
                          preferred_element_type=jnp.float32) + b1_ref[:, lo:lo + S]
            h1c = jnp.maximum(h1c, 0.0)                              # (TB, S)
            acc2 = acc2 + jnp.dot(h1c.astype(jnp.bfloat16),
                                  w2_ref[lo:lo + S, :],
                                  preferred_element_type=jnp.float32)
        h2 = jnp.maximum(acc2 + b2_ref[...], 0.0)                    # (TB, U)

        # ---- l3 ----
        h3 = jnp.maximum(
            jnp.dot(h2.astype(jnp.bfloat16), w3_ref[...],
                    preferred_element_type=jnp.float32) + b3_ref[...],
            0.0)                                                     # (TB, U)
        h3_bf = h3.astype(jnp.bfloat16)

        # ---- l4 fused with per-user softmax over lane-aligned 128-wide slices ----
        # Each (TB, S) logits slice is produced, softmaxed (exact divide) and
        # stored without materializing the full (TB, U*S) logits.
        for u in range(U):
            lo = u * S
            logit = jnp.dot(h3_bf, w4_ref[:, lo:lo + S],
                            preferred_element_type=jnp.float32) + b4_ref[:, lo:lo + S]
            m = jnp.max(logit, axis=-1, keepdims=True)
            e = jnp.exp(logit - m)
            denom = jnp.sum(e, axis=-1, keepdims=True)
            o_ref[:, lo:lo + S] = (e / denom).astype(o_ref.dtype)    # exact softmax

    return kernel


def _choose_block_b(B, cap=512):
    """VMEM-safe batch tile: multiple of 8 dividing B, capped, and >=2 grid
    steps when B >= 256 so the parallel batch axis can use both v7x TCs."""
    cap = min(cap, B)
    if B >= 256:
        cap = min(cap, B // 2)
    for bb in range(cap, 0, -1):
        if B % bb == 0 and (bb % 8 == 0 or bb == B):
            return bb
    # TODO(synk): pad B / masked tail for pathological (odd, large) batch sizes.
    return B


def net_softmax_forward(x, params, num_users, num_servers):
    """x: (B, num_users) float32.
    params: w1..w4 stored as (in, out) bfloat16, b1..b4 as (1, out) float32."""
    B, U = x.shape
    assert U == num_users
    D = num_users * num_servers

    block_b = _choose_block_b(B)
    grid = (B // block_b,)

    const2 = lambda i: (0, 0)           # weights/biases: VMEM-resident across steps
    batch_map = lambda i: (i, 0)        # x / out tiled along B

    ordered_inputs = (
        x,
        params["w1"], params["b1"],
        params["w2"], params["b2"],
        params["w3"], params["b3"],
        params["w4"], params["b4"],
    )

    in_specs = [pl.BlockSpec((block_b, U), batch_map)]
    for a in ordered_inputs[1:]:
        in_specs.append(pl.BlockSpec(a.shape, const2))

    # Advisory cost estimate for the XLA scheduler.
    flops = 2 * B * (U * D + D * U + U * U + U * D)
    transcendentals = B * D                            # exp
    param_bytes = sum(int(a.size) * a.dtype.itemsize for a in ordered_inputs[1:])
    bytes_accessed = int(x.size) * x.dtype.itemsize + B * D * 4 + param_bytes

    kernel = _net_kernel(num_users, num_servers)

    out = pl.pallas_call(
        kernel,
        out_shape=jax.ShapeDtypeStruct((B, D), jnp.float32),
        grid=grid,
        in_specs=in_specs,
        out_specs=pl.BlockSpec((block_b, D), batch_map),
        compiler_params=pltpu.CompilerParams(
            # batch tiles are independent -> shard across TCs on v7x megacore
            dimension_semantics=("parallel",),
        ),
        cost_estimate=pl.CostEstimate(
            flops=flops,
            transcendentals=transcendentals,
            bytes_accessed=bytes_accessed,
        ),
    )(*ordered_inputs)
    return out


def init_params(key, num_users, num_servers):
    """PyTorch-Linear-style init: U(-1/sqrt(fan_in), 1/sqrt(fan_in)).
    Weights stored as (in, out) bfloat16 (== PyTorch W.T); biases (1, out) f32."""
    U, S = num_users, num_servers
    D = U * S
    layer_dims = [(U, D), (D, U), (U, U), (U, D)]   # l1..l4 of the module
    params = {}
    keys = jax.random.split(key, 8)
    for i, (din, dout) in enumerate(layer_dims):
        bound = 1.0 / (din ** 0.5)
        w = jax.random.uniform(keys[2 * i], (din, dout), jnp.float32, -bound, bound)
        b = jax.random.uniform(keys[2 * i + 1], (1, dout), jnp.float32, -bound, bound)
        params[f"w{i + 1}"] = w.astype(jnp.bfloat16)
        params[f"b{i + 1}"] = b
    return params


def reference_forward(x, params, num_users, num_servers):
    """Plain-JAX reference with the same bf16 matmul / f32 accumulate numerics."""
    def lin(h, w, b):
        return jnp.dot(h.astype(jnp.bfloat16), w,
                       preferred_element_type=jnp.float32) + b

    h = jnp.maximum(lin(x, params["w1"], params["b1"]), 0.0)
    h = jnp.maximum(lin(h, params["w2"], params["b2"]), 0.0)
    h = jnp.maximum(lin(h, params["w3"], params["b3"]), 0.0)
    logits = lin(h, params["w4"], params["b4"])
    B = x.shape[0]
    sm = jax.nn.softmax(logits.reshape(B, num_users, num_servers), axis=2)
    return sm.reshape(B, -1)


if __name__ == "__main__":
    num_users = 8
    num_servers = 128          # lane-aligned per-user softmax reduction
    D = num_users * num_servers
    B = 256                    # 2 batch tiles of 128 -> exercises the B grid

    key = jax.random.PRNGKey(0)
    kx, kp = jax.random.split(key)
    x = jax.random.normal(kx, (B, num_users), dtype=jnp.float32)
    params = init_params(kp, num_users, num_servers)

    out = net_softmax_forward(x, params, num_users, num_servers)
    out = jax.block_until_ready(out)

    assert out.shape == (B, D)
    # each user's softmax row must sum to ~1 (exact divide now)
    sums = out.reshape(B, num_users, num_servers).sum(axis=2)
    assert jnp.allclose(sums, 1.0, atol=1e-3), "softmax rows do not sum to 1"

    ref = reference_forward(x, params, num_users, num_servers)
    err = float(jnp.max(jnp.abs(out - ref)))
    assert jnp.allclose(out, ref, atol=2e-3), f"max abs err {err}"

    print("KERNEL_OK")
</pallas_src>

<mosaic_0001>
module attributes {stable_mosaic.version = 11 : i64} {
  func.func @kernel(%arg0: i32, %arg1: memref<128x8xf32, #tpu.memory_space<vmem>>, %arg2: memref<8x1024xbf16, #tpu.memory_space<vmem>>, %arg3: memref<1x1024xf32, #tpu.memory_space<vmem>>, %arg4: memref<1024x8xbf16, #tpu.memory_space<vmem>>, %arg5: memref<1x8xf32, #tpu.memory_space<vmem>>, %arg6: memref<8x8xbf16, #tpu.memory_space<vmem>>, %arg7: memref<1x8xf32, #tpu.memory_space<vmem>>, %arg8: memref<8x1024xbf16, #tpu.memory_space<vmem>>, %arg9: memref<1x1024xf32, #tpu.memory_space<vmem>>, %arg10: memref<128x1024xf32, #tpu.memory_space<vmem>>) attributes {dimension_semantics = [#tpu.dimension_semantics<parallel>], iteration_bounds = array<i64: 2>, scalar_prefetch = 0 : i64, scratch_operands = 0 : i64, tpu.core_type = #tpu.core_type<tc>, window_params = [{transform_indices = @transform_0, window_bounds = array<i64: 128, 8>}, {pipeline_mode = #tpu.pipeline_mode<synchronous>, transform_indices = @transform_1, window_bounds = array<i64: 8, 1024>}, {pipeline_mode = #tpu.pipeline_mode<synchronous>, transform_indices = @transform_2, window_bounds = array<i64: 1, 1024>}, {pipeline_mode = #tpu.pipeline_mode<synchronous>, transform_indices = @transform_3, window_bounds = array<i64: 1024, 8>}, {pipeline_mode = #tpu.pipeline_mode<synchronous>, transform_indices = @transform_4, window_bounds = array<i64: 1, 8>}, {pipeline_mode = #tpu.pipeline_mode<synchronous>, transform_indices = @transform_5, window_bounds = array<i64: 8, 8>}, {pipeline_mode = #tpu.pipeline_mode<synchronous>, transform_indices = @transform_6, window_bounds = array<i64: 1, 8>}, {pipeline_mode = #tpu.pipeline_mode<synchronous>, transform_indices = @transform_7, window_bounds = array<i64: 8, 1024>}, {pipeline_mode = #tpu.pipeline_mode<synchronous>, transform_indices = @transform_8, window_bounds = array<i64: 1, 1024>}, {transform_indices = @transform_9, window_bounds = array<i64: 128, 1024>}]} {
    %c0 = arith.constant 0 : index
    %c0_0 = arith.constant 0 : index
    %0 = vector.load %arg1[%c0, %c0_0] : memref<128x8xf32, #tpu.memory_space<vmem>>, vector<128x8xf32>
    %1 = arith.truncf %0 : vector<128x8xf32> to vector<128x8xbf16>
    %cst = arith.constant 0.000000e+00 : f32
    %2 = vector.broadcast %cst : f32 to vector<128x8xf32>
    %c0_1 = arith.constant 0 : index
    %c0_2 = arith.constant 0 : index
    %3 = vector.load %arg2[%c0_1, %c0_2] : memref<8x1024xbf16, #tpu.memory_space<vmem>>, vector<8x128xbf16>
    %cst_3 = arith.constant dense<0.000000e+00> : vector<128x128xf32>
    %4 = tpu.matmul %1, %3, %cst_3 {dimension_numbers = #tpu.dot_dimension_numbers<[1], [0], [0], [1], [0, 0, 1, 1], [], []>} : vector<128x8xbf16>, vector<8x128xbf16>, vector<128x128xf32> -> vector<128x128xf32>
    %c0_4 = arith.constant 0 : index
    %c0_5 = arith.constant 0 : index
    %5 = vector.load %arg3[%c0_4, %c0_5] : memref<1x1024xf32, #tpu.memory_space<vmem>>, vector<1x128xf32>
    %6 = vector.broadcast %5 : vector<1x128xf32> to vector<128x128xf32>
    %7 = arith.addf %4, %6 : vector<128x128xf32>
    %cst_6 = arith.constant 0.000000e+00 : f32
    %8 = vector.broadcast %cst_6 : f32 to vector<128x128xf32>
    %9 = arith.maximumf %7, %8 : vector<128x128xf32>
    %10 = arith.truncf %9 : vector<128x128xf32> to vector<128x128xbf16>
    %c0_7 = arith.constant 0 : index
    %c0_8 = arith.constant 0 : index
    %11 = vector.load %arg4[%c0_7, %c0_8] : memref<1024x8xbf16, #tpu.memory_space<vmem>>, vector<128x8xbf16>
    %cst_9 = arith.constant dense<0.000000e+00> : vector<128x8xf32>
    %12 = tpu.matmul %10, %11, %cst_9 {dimension_numbers = #tpu.dot_dimension_numbers<[1], [0], [0], [1], [0, 0, 1, 1], [], []>} : vector<128x128xbf16>, vector<128x8xbf16>, vector<128x8xf32> -> vector<128x8xf32>
    %13 = arith.addf %2, %12 : vector<128x8xf32>
    %c0_10 = arith.constant 0 : index
    %c128 = arith.constant 128 : index
    %14 = vector.load %arg2[%c0_10, %c128] : memref<8x1024xbf16, #tpu.memory_space<vmem>>, vector<8x128xbf16>
    %cst_11 = arith.constant dense<0.000000e+00> : vector<128x128xf32>
    %15 = tpu.matmul %1, %14, %cst_11 {dimension_numbers = #tpu.dot_dimension_numbers<[1], [0], [0], [1], [0, 0, 1, 1], [], []>} : vector<128x8xbf16>, vector<8x128xbf16>, vector<128x128xf32> -> vector<128x128xf32>
    %c0_12 = arith.constant 0 : index
    %c128_13 = arith.constant 128 : index
    %16 = vector.load %arg3[%c0_12, %c128_13] : memref<1x1024xf32, #tpu.memory_space<vmem>>, vector<1x128xf32>
    %17 = vector.broadcast %16 : vector<1x128xf32> to vector<128x128xf32>
    %18 = arith.addf %15, %17 : vector<128x128xf32>
    %cst_14 = arith.constant 0.000000e+00 : f32
    %19 = vector.broadcast %cst_14 : f32 to vector<128x128xf32>
    %20 = arith.maximumf %18, %19 : vector<128x128xf32>
    %21 = arith.truncf %20 : vector<128x128xf32> to vector<128x128xbf16>
    %c128_15 = arith.constant 128 : index
    %c0_16 = arith.constant 0 : index
    %22 = vector.load %arg4[%c128_15, %c0_16] : memref<1024x8xbf16, #tpu.memory_space<vmem>>, vector<128x8xbf16>
    %cst_17 = arith.constant dense<0.000000e+00> : vector<128x8xf32>
    %23 = tpu.matmul %21, %22, %cst_17 {dimension_numbers = #tpu.dot_dimension_numbers<[1], [0], [0], [1], [0, 0, 1, 1], [], []>} : vector<128x128xbf16>, vector<128x8xbf16>, vector<128x8xf32> -> vector<128x8xf32>
    %24 = arith.addf %13, %23 : vector<128x8xf32>
    %c0_18 = arith.constant 0 : index
    %c256 = arith.constant 256 : index
    %25 = vector.load %arg2[%c0_18, %c256] : memref<8x1024xbf16, #tpu.memory_space<vmem>>, vector<8x128xbf16>
    %cst_19 = arith.constant dense<0.000000e+00> : vector<128x128xf32>
    %26 = tpu.matmul %1, %25, %cst_19 {dimension_numbers = #tpu.dot_dimension_numbers<[1], [0], [0], [1], [0, 0, 1, 1], [], []>} : vector<128x8xbf16>, vector<8x128xbf16>, vector<128x128xf32> -> vector<128x128xf32>
    %c0_20 = arith.constant 0 : index
    %c256_21 = arith.constant 256 : index
    %27 = vector.load %arg3[%c0_20, %c256_21] : memref<1x1024xf32, #tpu.memory_space<vmem>>, vector<1x128xf32>
    %28 = vector.broadcast %27 : vector<1x128xf32> to vector<128x128xf32>
    %29 = arith.addf %26, %28 : vector<128x128xf32>
    %cst_22 = arith.constant 0.000000e+00 : f32
    %30 = vector.broadcast %cst_22 : f32 to vector<128x128xf32>
    %31 = arith.maximumf %29, %30 : vector<128x128xf32>
    %32 = arith.truncf %31 : vector<128x128xf32> to vector<128x128xbf16>
    %c256_23 = arith.constant 256 : index
    %c0_24 = arith.constant 0 : index
    %33 = vector.load %arg4[%c256_23, %c0_24] : memref<1024x8xbf16, #tpu.memory_space<vmem>>, vector<128x8xbf16>
    %cst_25 = arith.constant dense<0.000000e+00> : vector<128x8xf32>
    %34 = tpu.matmul %32, %33, %cst_25 {dimension_numbers = #tpu.dot_dimension_numbers<[1], [0], [0], [1], [0, 0, 1, 1], [], []>} : vector<128x128xbf16>, vector<128x8xbf16>, vector<128x8xf32> -> vector<128x8xf32>
    %35 = arith.addf %24, %34 : vector<128x8xf32>
    %c0_26 = arith.constant 0 : index
    %c384 = arith.constant 384 : index
    %36 = vector.load %arg2[%c0_26, %c384] : memref<8x1024xbf16, #tpu.memory_space<vmem>>, vector<8x128xbf16>
    %cst_27 = arith.constant dense<0.000000e+00> : vector<128x128xf32>
    %37 = tpu.matmul %1, %36, %cst_27 {dimension_numbers = #tpu.dot_dimension_numbers<[1], [0], [0], [1], [0, 0, 1, 1], [], []>} : vector<128x8xbf16>, vector<8x128xbf16>, vector<128x128xf32> -> vector<128x128xf32>
    %c0_28 = arith.constant 0 : index
    %c384_29 = arith.constant 384 : index
    %38 = vector.load %arg3[%c0_28, %c384_29] : memref<1x1024xf32, #tpu.memory_space<vmem>>, vector<1x128xf32>
    %39 = vector.broadcast %38 : vector<1x128xf32> to vector<128x128xf32>
    %40 = arith.addf %37, %39 : vector<128x128xf32>
    %cst_30 = arith.constant 0.000000e+00 : f32
    %41 = vector.broadcast %cst_30 : f32 to vector<128x128xf32>
    %42 = arith.maximumf %40, %41 : vector<128x128xf32>
    %43 = arith.truncf %42 : vector<128x128xf32> to vector<128x128xbf16>
    %c384_31 = arith.constant 384 : index
    %c0_32 = arith.constant 0 : index
    %44 = vector.load %arg4[%c384_31, %c0_32] : memref<1024x8xbf16, #tpu.memory_space<vmem>>, vector<128x8xbf16>
    %cst_33 = arith.constant dense<0.000000e+00> : vector<128x8xf32>
    %45 = tpu.matmul %43, %44, %cst_33 {dimension_numbers = #tpu.dot_dimension_numbers<[1], [0], [0], [1], [0, 0, 1, 1], [], []>} : vector<128x128xbf16>, vector<128x8xbf16>, vector<128x8xf32> -> vector<128x8xf32>
    %46 = arith.addf %35, %45 : vector<128x8xf32>
    %c0_34 = arith.constant 0 : index
    %c512 = arith.constant 512 : index
    %47 = vector.load %arg2[%c0_34, %c512] : memref<8x1024xbf16, #tpu.memory_space<vmem>>, vector<8x128xbf16>
    %cst_35 = arith.constant dense<0.000000e+00> : vector<128x128xf32>
    %48 = tpu.matmul %1, %47, %cst_35 {dimension_numbers = #tpu.dot_dimension_numbers<[1], [0], [0], [1], [0, 0, 1, 1], [], []>} : vector<128x8xbf16>, vector<8x128xbf16>, vector<128x128xf32> -> vector<128x128xf32>
    %c0_36 = arith.constant 0 : index
    %c512_37 = arith.constant 512 : index
    %49 = vector.load %arg3[%c0_36, %c512_37] : memref<1x1024xf32, #tpu.memory_space<vmem>>, vector<1x128xf32>
    %50 = vector.broadcast %49 : vector<1x128xf32> to vector<128x128xf32>
    %51 = arith.addf %48, %50 : vector<128x128xf32>
    %cst_38 = arith.constant 0.000000e+00 : f32
    %52 = vector.broadcast %cst_38 : f32 to vector<128x128xf32>
    %53 = arith.maximumf %51, %52 : vector<128x128xf32>
    %54 = arith.truncf %53 : vector<128x128xf32> to vector<128x128xbf16>
    %c512_39 = arith.constant 512 : index
    %c0_40 = arith.constant 0 : index
    %55 = vector.load %arg4[%c512_39, %c0_40] : memref<1024x8xbf16, #tpu.memory_space<vmem>>, vector<128x8xbf16>
    %cst_41 = arith.constant dense<0.000000e+00> : vector<128x8xf32>
    %56 = tpu.matmul %54, %55, %cst_41 {dimension_numbers = #tpu.dot_dimension_numbers<[1], [0], [0], [1], [0, 0, 1, 1], [], []>} : vector<128x128xbf16>, vector<128x8xbf16>, vector<128x8xf32> -> vector<128x8xf32>
    %57 = arith.addf %46, %56 : vector<128x8xf32>
    %c0_42 = arith.constant 0 : index
    %c640 = arith.constant 640 : index
    %58 = vector.load %arg2[%c0_42, %c640] : memref<8x1024xbf16, #tpu.memory_space<vmem>>, vector<8x128xbf16>
    %cst_43 = arith.constant dense<0.000000e+00> : vector<128x128xf32>
    %59 = tpu.matmul %1, %58, %cst_43 {dimension_numbers = #tpu.dot_dimension_numbers<[1], [0], [0], [1], [0, 0, 1, 1], [], []>} : vector<128x8xbf16>, vector<8x128xbf16>, vector<128x128xf32> -> vector<128x128xf32>
    %c0_44 = arith.constant 0 : index
    %c640_45 = arith.constant 640 : index
    %60 = vector.load %arg3[%c0_44, %c640_45] : memref<1x1024xf32, #tpu.memory_space<vmem>>, vector<1x128xf32>
    %61 = vector.broadcast %60 : vector<1x128xf32> to vector<128x128xf32>
    %62 = arith.addf %59, %61 : vector<128x128xf32>
    %cst_46 = arith.constant 0.000000e+00 : f32
    %63 = vector.broadcast %cst_46 : f32 to vector<128x128xf32>
    %64 = arith.maximumf %62, %63 : vector<128x128xf32>
    %65 = arith.truncf %64 : vector<128x128xf32> to vector<128x128xbf16>
    %c640_47 = arith.constant 640 : index
    %c0_48 = arith.constant 0 : index
    %66 = vector.load %arg4[%c640_47, %c0_48] : memref<1024x8xbf16, #tpu.memory_space<vmem>>, vector<128x8xbf16>
    %cst_49 = arith.constant dense<0.000000e+00> : vector<128x8xf32>
    %67 = tpu.matmul %65, %66, %cst_49 {dimension_numbers = #tpu.dot_dimension_numbers<[1], [0], [0], [1], [0, 0, 1, 1], [], []>} : vector<128x128xbf16>, vector<128x8xbf16>, vector<128x8xf32> -> vector<128x8xf32>
    %68 = arith.addf %57, %67 : vector<128x8xf32>
    %c0_50 = arith.constant 0 : index
    %c768 = arith.constant 768 : index
    %69 = vector.load %arg2[%c0_50, %c768] : memref<8x1024xbf16, #tpu.memory_space<vmem>>, vector<8x128xbf16>
    %cst_51 = arith.constant dense<0.000000e+00> : vector<128x128xf32>
    %70 = tpu.matmul %1, %69, %cst_51 {dimension_numbers = #tpu.dot_dimension_numbers<[1], [0], [0], [1], [0, 0, 1, 1], [], []>} : vector<128x8xbf16>, vector<8x128xbf16>, vector<128x128xf32> -> vector<128x128xf32>
    %c0_52 = arith.constant 0 : index
    %c768_53 = arith.constant 768 : index
    %71 = vector.load %arg3[%c0_52, %c768_53] : memref<1x1024xf32, #tpu.memory_space<vmem>>, vector<1x128xf32>
    %72 = vector.broadcast %71 : vector<1x128xf32> to vector<128x128xf32>
    %73 = arith.addf %70, %72 : vector<128x128xf32>
    %cst_54 = arith.constant 0.000000e+00 : f32
    %74 = vector.broadcast %cst_54 : f32 to vector<128x128xf32>
    %75 = arith.maximumf %73, %74 : vector<128x128xf32>
    %76 = arith.truncf %75 : vector<128x128xf32> to vector<128x128xbf16>
    %c768_55 = arith.constant 768 : index
    %c0_56 = arith.constant 0 : index
    %77 = vector.load %arg4[%c768_55, %c0_56] : memref<1024x8xbf16, #tpu.memory_space<vmem>>, vector<128x8xbf16>
    %cst_57 = arith.constant dense<0.000000e+00> : vector<128x8xf32>
    %78 = tpu.matmul %76, %77, %cst_57 {dimension_numbers = #tpu.dot_dimension_numbers<[1], [0], [0], [1], [0, 0, 1, 1], [], []>} : vector<128x128xbf16>, vector<128x8xbf16>, vector<128x8xf32> -> vector<128x8xf32>
    %79 = arith.addf %68, %78 : vector<128x8xf32>
    %c0_58 = arith.constant 0 : index
    %c896 = arith.constant 896 : index
    %80 = vector.load %arg2[%c0_58, %c896] : memref<8x1024xbf16, #tpu.memory_space<vmem>>, vector<8x128xbf16>
    %cst_59 = arith.constant dense<0.000000e+00> : vector<128x128xf32>
    %81 = tpu.matmul %1, %80, %cst_59 {dimension_numbers = #tpu.dot_dimension_numbers<[1], [0], [0], [1], [0, 0, 1, 1], [], []>} : vector<128x8xbf16>, vector<8x128xbf16>, vector<128x128xf32> -> vector<128x128xf32>
    %c0_60 = arith.constant 0 : index
    %c896_61 = arith.constant 896 : index
    %82 = vector.load %arg3[%c0_60, %c896_61] : memref<1x1024xf32, #tpu.memory_space<vmem>>, vector<1x128xf32>
    %83 = vector.broadcast %82 : vector<1x128xf32> to vector<128x128xf32>
    %84 = arith.addf %81, %83 : vector<128x128xf32>
    %cst_62 = arith.constant 0.000000e+00 : f32
    %85 = vector.broadcast %cst_62 : f32 to vector<128x128xf32>
    %86 = arith.maximumf %84, %85 : vector<128x128xf32>
    %87 = arith.truncf %86 : vector<128x128xf32> to vector<128x128xbf16>
    %c896_63 = arith.constant 896 : index
    %c0_64 = arith.constant 0 : index
    %88 = vector.load %arg4[%c896_63, %c0_64] : memref<1024x8xbf16, #tpu.memory_space<vmem>>, vector<128x8xbf16>
    %cst_65 = arith.constant dense<0.000000e+00> : vector<128x8xf32>
    %89 = tpu.matmul %87, %88, %cst_65 {dimension_numbers = #tpu.dot_dimension_numbers<[1], [0], [0], [1], [0, 0, 1, 1], [], []>} : vector<128x128xbf16>, vector<128x8xbf16>, vector<128x8xf32> -> vector<128x8xf32>
    %90 = arith.addf %79, %89 : vector<128x8xf32>
    %c0_66 = arith.constant 0 : index
    %c0_67 = arith.constant 0 : index
    %91 = vector.load %arg5[%c0_66, %c0_67] : memref<1x8xf32, #tpu.memory_space<vmem>>, vector<1x8xf32>
    %92 = vector.broadcast %91 : vector<1x8xf32> to vector<128x8xf32>
    %93 = arith.addf %90, %92 : vector<128x8xf32>
    %cst_68 = arith.constant 0.000000e+00 : f32
    %94 = vector.broadcast %cst_68 : f32 to vector<128x8xf32>
    %95 = arith.maximumf %93, %94 : vector<128x8xf32>
    %96 = arith.truncf %95 : vector<128x8xf32> to vector<128x8xbf16>
    %c0_69 = arith.constant 0 : index
    %c0_70 = arith.constant 0 : index
    %97 = vector.load %arg6[%c0_69, %c0_70] : memref<8x8xbf16, #tpu.memory_space<vmem>>, vector<8x8xbf16>
    %cst_71 = arith.constant dense<0.000000e+00> : vector<128x8xf32>
    %98 = tpu.matmul %96, %97, %cst_71 {dimension_numbers = #tpu.dot_dimension_numbers<[1], [0], [0], [1], [0, 0, 1, 1], [], []>} : vector<128x8xbf16>, vector<8x8xbf16>, vector<128x8xf32> -> vector<128x8xf32>
    %c0_72 = arith.constant 0 : index
    %c0_73 = arith.constant 0 : index
    %99 = vector.load %arg7[%c0_72, %c0_73] : memref<1x8xf32, #tpu.memory_space<vmem>>, vector<1x8xf32>
    %100 = vector.broadcast %99 : vector<1x8xf32> to vector<128x8xf32>
    %101 = arith.addf %98, %100 : vector<128x8xf32>
    %cst_74 = arith.constant 0.000000e+00 : f32
    %102 = vector.broadcast %cst_74 : f32 to vector<128x8xf32>
    %103 = arith.maximumf %101, %102 : vector<128x8xf32>
    %104 = arith.truncf %103 : vector<128x8xf32> to vector<128x8xbf16>
    %c0_75 = arith.constant 0 : index
    %c0_76 = arith.constant 0 : index
    %105 = vector.load %arg8[%c0_75, %c0_76] : memref<8x1024xbf16, #tpu.memory_space<vmem>>, vector<8x128xbf16>
    %cst_77 = arith.constant dense<0.000000e+00> : vector<128x128xf32>
    %106 = tpu.matmul %104, %105, %cst_77 {dimension_numbers = #tpu.dot_dimension_numbers<[1], [0], [0], [1], [0, 0, 1, 1], [], []>} : vector<128x8xbf16>, vector<8x128xbf16>, vector<128x128xf32> -> vector<128x128xf32>
    %c0_78 = arith.constant 0 : index
    %c0_79 = arith.constant 0 : index
    %107 = vector.load %arg9[%c0_78, %c0_79] : memref<1x1024xf32, #tpu.memory_space<vmem>>, vector<1x128xf32>
    %108 = vector.broadcast %107 : vector<1x128xf32> to vector<128x128xf32>
    %109 = arith.addf %106, %108 : vector<128x128xf32>
    %cst_80 = arith.constant dense<0xFF800000> : vector<128xf32>
    %110 = vector.multi_reduction <maximumf>, %109, %cst_80 [1] : vector<128x128xf32> to vector<128xf32>
    %111 = vector.shape_cast %110 : vector<128xf32> to vector<128x1xf32>
    %112 = vector.broadcast %111 : vector<128x1xf32> to vector<128x128xf32>
    %113 = arith.subf %109, %112 : vector<128x128xf32>
    %114 = math.exp %113 : vector<128x128xf32>
    %cst_81 = arith.constant dense<0.000000e+00> : vector<128xf32>
    %115 = vector.multi_reduction <add>, %114, %cst_81 [1] : vector<128x128xf32> to vector<128xf32>
    %116 = vector.shape_cast %115 : vector<128xf32> to vector<128x1xf32>
    %117 = vector.broadcast %116 : vector<128x1xf32> to vector<128x128xf32>
    %118 = arith.divf %114, %117 : vector<128x128xf32>
    %c0_82 = arith.constant 0 : index
    %c0_83 = arith.constant 0 : index
    %119 = vector.load %arg10[%c0_82, %c0_83] : memref<128x1024xf32, #tpu.memory_space<vmem>>, vector<128x128xf32>
    tpu.vector_store %arg10[%c0_82, %c0_83], %118 {strides = array<i32>} : memref<128x1024xf32, #tpu.memory_space<vmem>>, vector<128x128xf32>,
    %c0_84 = arith.constant 0 : index
    %c128_85 = arith.constant 128 : index
    %120 = vector.load %arg8[%c0_84, %c128_85] : memref<8x1024xbf16, #tpu.memory_space<vmem>>, vector<8x128xbf16>
    %cst_86 = arith.constant dense<0.000000e+00> : vector<128x128xf32>
    %121 = tpu.matmul %104, %120, %cst_86 {dimension_numbers = #tpu.dot_dimension_numbers<[1], [0], [0], [1], [0, 0, 1, 1], [], []>} : vector<128x8xbf16>, vector<8x128xbf16>, vector<128x128xf32> -> vector<128x128xf32>
    %c0_87 = arith.constant 0 : index
    %c128_88 = arith.constant 128 : index
    %122 = vector.load %arg9[%c0_87, %c128_88] : memref<1x1024xf32, #tpu.memory_space<vmem>>, vector<1x128xf32>
    %123 = vector.broadcast %122 : vector<1x128xf32> to vector<128x128xf32>
    %124 = arith.addf %121, %123 : vector<128x128xf32>
    %cst_89 = arith.constant dense<0xFF800000> : vector<128xf32>
    %125 = vector.multi_reduction <maximumf>, %124, %cst_89 [1] : vector<128x128xf32> to vector<128xf32>
    %126 = vector.shape_cast %125 : vector<128xf32> to vector<128x1xf32>
    %127 = vector.broadcast %126 : vector<128x1xf32> to vector<128x128xf32>
    %128 = arith.subf %124, %127 : vector<128x128xf32>
    %129 = math.exp %128 : vector<128x128xf32>
    %cst_90 = arith.constant dense<0.000000e+00> : vector<128xf32>
    %130 = vector.multi_reduction <add>, %129, %cst_90 [1] : vector<128x128xf32> to vector<128xf32>
    %131 = vector.shape_cast %130 : vector<128xf32> to vector<128x1xf32>
    %132 = vector.broadcast %131 : vector<128x1xf32> to vector<128x128xf32>
    %133 = arith.divf %129, %132 : vector<128x128xf32>
    %c0_91 = arith.constant 0 : index
    %c128_92 = arith.constant 128 : index
    %134 = vector.load %arg10[%c0_91, %c128_92] : memref<128x1024xf32, #tpu.memory_space<vmem>>, vector<128x128xf32>
    tpu.vector_store %arg10[%c0_91, %c128_92], %133 {strides = array<i32>} : memref<128x1024xf32, #tpu.memory_space<vmem>>, vector<128x128xf32>,
    %c0_93 = arith.constant 0 : index
    %c256_94 = arith.constant 256 : index
    %135 = vector.load %arg8[%c0_93, %c256_94] : memref<8x1024xbf16, #tpu.memory_space<vmem>>, vector<8x128xbf16>
    %cst_95 = arith.constant dense<0.000000e+00> : vector<128x128xf32>
    %136 = tpu.matmul %104, %135, %cst_95 {dimension_numbers = #tpu.dot_dimension_numbers<[1], [0], [0], [1], [0, 0, 1, 1], [], []>} : vector<128x8xbf16>, vector<8x128xbf16>, vector<128x128xf32> -> vector<128x128xf32>
    %c0_96 = arith.constant 0 : index
    %c256_97 = arith.constant 256 : index
    %137 = vector.load %arg9[%c0_96, %c256_97] : memref<1x1024xf32, #tpu.memory_space<vmem>>, vector<1x128xf32>
    %138 = vector.broadcast %137 : vector<1x128xf32> to vector<128x128xf32>
    %139 = arith.addf %136, %138 : vector<128x128xf32>
    %cst_98 = arith.constant dense<0xFF800000> : vector<128xf32>
    %140 = vector.multi_reduction <maximumf>, %139, %cst_98 [1] : vector<128x128xf32> to vector<128xf32>
    %141 = vector.shape_cast %140 : vector<128xf32> to vector<128x1xf32>
    %142 = vector.broadcast %141 : vector<128x1xf32> to vector<128x128xf32>
    %143 = arith.subf %139, %142 : vector<128x128xf32>
    %144 = math.exp %143 : vector<128x128xf32>
    %cst_99 = arith.constant dense<0.000000e+00> : vector<128xf32>
    %145 = vector.multi_reduction <add>, %144, %cst_99 [1] : vector<128x128xf32> to vector<128xf32>
    %146 = vector.shape_cast %145 : vector<128xf32> to vector<128x1xf32>
    %147 = vector.broadcast %146 : vector<128x1xf32> to vector<128x128xf32>
    %148 = arith.divf %144, %147 : vector<128x128xf32>
    %c0_100 = arith.constant 0 : index
    %c256_101 = arith.constant 256 : index
    %149 = vector.load %arg10[%c0_100, %c256_101] : memref<128x1024xf32, #tpu.memory_space<vmem>>, vector<128x128xf32>
    tpu.vector_store %arg10[%c0_100, %c256_101], %148 {strides = array<i32>} : memref<128x1024xf32, #tpu.memory_space<vmem>>, vector<128x128xf32>,
    %c0_102 = arith.constant 0 : index
    %c384_103 = arith.constant 384 : index
    %150 = vector.load %arg8[%c0_102, %c384_103] : memref<8x1024xbf16, #tpu.memory_space<vmem>>, vector<8x128xbf16>
    %cst_104 = arith.constant dense<0.000000e+00> : vector<128x128xf32>
    %151 = tpu.matmul %104, %150, %cst_104 {dimension_numbers = #tpu.dot_dimension_numbers<[1], [0], [0], [1], [0, 0, 1, 1], [], []>} : vector<128x8xbf16>, vector<8x128xbf16>, vector<128x128xf32> -> vector<128x128xf32>
    %c0_105 = arith.constant 0 : index
    %c384_106 = arith.constant 384 : index
    %152 = vector.load %arg9[%c0_105, %c384_106] : memref<1x1024xf32, #tpu.memory_space<vmem>>, vector<1x128xf32>
    %153 = vector.broadcast %152 : vector<1x128xf32> to vector<128x128xf32>
    %154 = arith.addf %151, %153 : vector<128x128xf32>
    %cst_107 = arith.constant dense<0xFF800000> : vector<128xf32>
    %155 = vector.multi_reduction <maximumf>, %154, %cst_107 [1] : vector<128x128xf32> to vector<128xf32>
    %156 = vector.shape_cast %155 : vector<128xf32> to vector<128x1xf32>
    %157 = vector.broadcast %156 : vector<128x1xf32> to vector<128x128xf32>
    %158 = arith.subf %154, %157 : vector<128x128xf32>
    %159 = math.exp %158 : vector<128x128xf32>
    %cst_108 = arith.constant dense<0.000000e+00> : vector<128xf32>
    %160 = vector.multi_reduction <add>, %159, %cst_108 [1] : vector<128x128xf32> to vector<128xf32>
    %161 = vector.shape_cast %160 : vector<128xf32> to vector<128x1xf32>
    %162 = vector.broadcast %161 : vector<128x1xf32> to vector<128x128xf32>
    %163 = arith.divf %159, %162 : vector<128x128xf32>
    %c0_109 = arith.constant 0 : index
    %c384_110 = arith.constant 384 : index
    %164 = vector.load %arg10[%c0_109, %c384_110] : memref<128x1024xf32, #tpu.memory_space<vmem>>, vector<128x128xf32>
    tpu.vector_store %arg10[%c0_109, %c384_110], %163 {strides = array<i32>} : memref<128x1024xf32, #tpu.memory_space<vmem>>, vector<128x128xf32>,
    %c0_111 = arith.constant 0 : index
    %c512_112 = arith.constant 512 : index
    %165 = vector.load %arg8[%c0_111, %c512_112] : memref<8x1024xbf16, #tpu.memory_space<vmem>>, vector<8x128xbf16>
    %cst_113 = arith.constant dense<0.000000e+00> : vector<128x128xf32>
    %166 = tpu.matmul %104, %165, %cst_113 {dimension_numbers = #tpu.dot_dimension_numbers<[1], [0], [0], [1], [0, 0, 1, 1], [], []>} : vector<128x8xbf16>, vector<8x128xbf16>, vector<128x128xf32> -> vector<128x128xf32>
    %c0_114 = arith.constant 0 : index
    %c512_115 = arith.constant 512 : index
    %167 = vector.load %arg9[%c0_114, %c512_115] : memref<1x1024xf32, #tpu.memory_space<vmem>>, vector<1x128xf32>
    %168 = vector.broadcast %167 : vector<1x128xf32> to vector<128x128xf32>
    %169 = arith.addf %166, %168 : vector<128x128xf32>
    %cst_116 = arith.constant dense<0xFF800000> : vector<128xf32>
    %170 = vector.multi_reduction <maximumf>, %169, %cst_116 [1] : vector<128x128xf32> to vector<128xf32>
    %171 = vector.shape_cast %170 : vector<128xf32> to vector<128x1xf32>
    %172 = vector.broadcast %171 : vector<128x1xf32> to vector<128x128xf32>
    %173 = arith.subf %169, %172 : vector<128x128xf32>
    %174 = math.exp %173 : vector<128x128xf32>
    %cst_117 = arith.constant dense<0.000000e+00> : vector<128xf32>
    %175 = vector.multi_reduction <add>, %174, %cst_117 [1] : vector<128x128xf32> to vector<128xf32>
    %176 = vector.shape_cast %175 : vector<128xf32> to vector<128x1xf32>
    %177 = vector.broadcast %176 : vector<128x1xf32> to vector<128x128xf32>
    %178 = arith.divf %174, %177 : vector<128x128xf32>
    %c0_118 = arith.constant 0 : index
    %c512_119 = arith.constant 512 : index
    %179 = vector.load %arg10[%c0_118, %c512_119] : memref<128x1024xf32, #tpu.memory_space<vmem>>, vector<128x128xf32>
    tpu.vector_store %arg10[%c0_118, %c512_119], %178 {strides = array<i32>} : memref<128x1024xf32, #tpu.memory_space<vmem>>, vector<128x128xf32>,
    %c0_120 = arith.constant 0 : index
    %c640_121 = arith.constant 640 : index
    %180 = vector.load %arg8[%c0_120, %c640_121] : memref<8x1024xbf16, #tpu.memory_space<vmem>>, vector<8x128xbf16>
    %cst_122 = arith.constant dense<0.000000e+00> : vector<128x128xf32>
    %181 = tpu.matmul %104, %180, %cst_122 {dimension_numbers = #tpu.dot_dimension_numbers<[1], [0], [0], [1], [0, 0, 1, 1], [], []>} : vector<128x8xbf16>, vector<8x128xbf16>, vector<128x128xf32> -> vector<128x128xf32>
    %c0_123 = arith.constant 0 : index
    %c640_124 = arith.constant 640 : index
    %182 = vector.load %arg9[%c0_123, %c640_124] : memref<1x1024xf32, #tpu.memory_space<vmem>>, vector<1x128xf32>
    %183 = vector.broadcast %182 : vector<1x128xf32> to vector<128x128xf32>
    %184 = arith.addf %181, %183 : vector<128x128xf32>
    %cst_125 = arith.constant dense<0xFF800000> : vector<128xf32>
    %185 = vector.multi_reduction <maximumf>, %184, %cst_125 [1] : vector<128x128xf32> to vector<128xf32>
    %186 = vector.shape_cast %185 : vector<128xf32> to vector<128x1xf32>
    %187 = vector.broadcast %186 : vector<128x1xf32> to vector<128x128xf32>
    %188 = arith.subf %184, %187 : vector<128x128xf32>
    %189 = math.exp %188 : vector<128x128xf32>
    %cst_126 = arith.constant dense<0.000000e+00> : vector<128xf32>
    %190 = vector.multi_reduction <add>, %189, %cst_126 [1] : vector<128x128xf32> to vector<128xf32>
    %191 = vector.shape_cast %190 : vector<128xf32> to vector<128x1xf32>
    %192 = vector.broadcast %191 : vector<128x1xf32> to vector<128x128xf32>
    %193 = arith.divf %189, %192 : vector<128x128xf32>
    %c0_127 = arith.constant 0 : index
    %c640_128 = arith.constant 640 : index
    %194 = vector.load %arg10[%c0_127, %c640_128] : memref<128x1024xf32, #tpu.memory_space<vmem>>, vector<128x128xf32>
    tpu.vector_store %arg10[%c0_127, %c640_128], %193 {strides = array<i32>} : memref<128x1024xf32, #tpu.memory_space<vmem>>, vector<128x128xf32>,
    %c0_129 = arith.constant 0 : index
    %c768_130 = arith.constant 768 : index
    %195 = vector.load %arg8[%c0_129, %c768_130] : memref<8x1024xbf16, #tpu.memory_space<vmem>>, vector<8x128xbf16>
    %cst_131 = arith.constant dense<0.000000e+00> : vector<128x128xf32>
    %196 = tpu.matmul %104, %195, %cst_131 {dimension_numbers = #tpu.dot_dimension_numbers<[1], [0], [0], [1], [0, 0, 1, 1], [], []>} : vector<128x8xbf16>, vector<8x128xbf16>, vector<128x128xf32> -> vector<128x128xf32>
    %c0_132 = arith.constant 0 : index
    %c768_133 = arith.constant 768 : index
    %197 = vector.load %arg9[%c0_132, %c768_133] : memref<1x1024xf32, #tpu.memory_space<vmem>>, vector<1x128xf32>
    %198 = vector.broadcast %197 : vector<1x128xf32> to vector<128x128xf32>
    %199 = arith.addf %196, %198 : vector<128x128xf32>
    %cst_134 = arith.constant dense<0xFF800000> : vector<128xf32>
    %200 = vector.multi_reduction <maximumf>, %199, %cst_134 [1] : vector<128x128xf32> to vector<128xf32>
    %201 = vector.shape_cast %200 : vector<128xf32> to vector<128x1xf32>
    %202 = vector.broadcast %201 : vector<128x1xf32> to vector<128x128xf32>
    %203 = arith.subf %199, %202 : vector<128x128xf32>
    %204 = math.exp %203 : vector<128x128xf32>
    %cst_135 = arith.constant dense<0.000000e+00> : vector<128xf32>
    %205 = vector.multi_reduction <add>, %204, %cst_135 [1] : vector<128x128xf32> to vector<128xf32>
    %206 = vector.shape_cast %205 : vector<128xf32> to vector<128x1xf32>
    %207 = vector.broadcast %206 : vector<128x1xf32> to vector<128x128xf32>
    %208 = arith.divf %204, %207 : vector<128x128xf32>
    %c0_136 = arith.constant 0 : index
    %c768_137 = arith.constant 768 : index
    %209 = vector.load %arg10[%c0_136, %c768_137] : memref<128x1024xf32, #tpu.memory_space<vmem>>, vector<128x128xf32>
    tpu.vector_store %arg10[%c0_136, %c768_137], %208 {strides = array<i32>} : memref<128x1024xf32, #tpu.memory_space<vmem>>, vector<128x128xf32>,
    %c0_138 = arith.constant 0 : index
    %c896_139 = arith.constant 896 : index
    %210 = vector.load %arg8[%c0_138, %c896_139] : memref<8x1024xbf16, #tpu.memory_space<vmem>>, vector<8x128xbf16>
    %cst_140 = arith.constant dense<0.000000e+00> : vector<128x128xf32>
    %211 = tpu.matmul %104, %210, %cst_140 {dimension_numbers = #tpu.dot_dimension_numbers<[1], [0], [0], [1], [0, 0, 1, 1], [], []>} : vector<128x8xbf16>, vector<8x128xbf16>, vector<128x128xf32> -> vector<128x128xf32>
    %c0_141 = arith.constant 0 : index
    %c896_142 = arith.constant 896 : index
    %212 = vector.load %arg9[%c0_141, %c896_142] : memref<1x1024xf32, #tpu.memory_space<vmem>>, vector<1x128xf32>
    %213 = vector.broadcast %212 : vector<1x128xf32> to vector<128x128xf32>
    %214 = arith.addf %211, %213 : vector<128x128xf32>
    %cst_143 = arith.constant dense<0xFF800000> : vector<128xf32>
    %215 = vector.multi_reduction <maximumf>, %214, %cst_143 [1] : vector<128x128xf32> to vector<128xf32>
    %216 = vector.shape_cast %215 : vector<128xf32> to vector<128x1xf32>
    %217 = vector.broadcast %216 : vector<128x1xf32> to vector<128x128xf32>
    %218 = arith.subf %214, %217 : vector<128x128xf32>
    %219 = math.exp %218 : vector<128x128xf32>
    %cst_144 = arith.constant dense<0.000000e+00> : vector<128xf32>
    %220 = vector.multi_reduction <add>, %219, %cst_144 [1] : vector<128x128xf32> to vector<128xf32>
    %221 = vector.shape_cast %220 : vector<128xf32> to vector<128x1xf32>
    %222 = vector.broadcast %221 : vector<128x1xf32> to vector<128x128xf32>
    %223 = arith.divf %219, %222 : vector<128x128xf32>
    %c0_145 = arith.constant 0 : index
    %c896_146 = arith.constant 896 : index
    %224 = vector.load %arg10[%c0_145, %c896_146] : memref<128x1024xf32, #tpu.memory_space<vmem>>, vector<128x128xf32>
    tpu.vector_store %arg10[%c0_145, %c896_146], %223 {strides = array<i32>} : memref<128x1024xf32, #tpu.memory_space<vmem>>, vector<128x128xf32>,
    return
  }
  func.func @transform_0(%arg0: i32) -> (i32, i32) {
    %c0_i32 = arith.constant 0 : i32
    %c0_i32_0 = arith.constant 0 : i32
    return %arg0, %c0_i32 : i32, i32
  }
  func.func @transform_1(%arg0: i32) -> (i32, i32) {
    %c0_i32 = arith.constant 0 : i32
    %c0_i32_0 = arith.constant 0 : i32
    %c0_i32_1 = arith.constant 0 : i32
    return %c0_i32, %c0_i32_0 : i32, i32
  }
  func.func @transform_2(%arg0: i32) -> (i32, i32) {
    %c0_i32 = arith.constant 0 : i32
    %c0_i32_0 = arith.constant 0 : i32
    %c0_i32_1 = arith.constant 0 : i32
    return %c0_i32, %c0_i32_0 : i32, i32
  }
  func.func @transform_3(%arg0: i32) -> (i32, i32) {
    %c0_i32 = arith.constant 0 : i32
    %c0_i32_0 = arith.constant 0 : i32
    %c0_i32_1 = arith.constant 0 : i32
    return %c0_i32, %c0_i32_0 : i32, i32
  }
  func.func @transform_4(%arg0: i32) -> (i32, i32) {
    %c0_i32 = arith.constant 0 : i32
    %c0_i32_0 = arith.constant 0 : i32
    %c0_i32_1 = arith.constant 0 : i32
    return %c0_i32, %c0_i32_0 : i32, i32
  }
  func.func @transform_5(%arg0: i32) -> (i32, i32) {
    %c0_i32 = arith.constant 0 : i32
    %c0_i32_0 = arith.constant 0 : i32
    %c0_i32_1 = arith.constant 0 : i32
    return %c0_i32, %c0_i32_0 : i32, i32
  }
  func.func @transform_6(%arg0: i32) -> (i32, i32) {
    %c0_i32 = arith.constant 0 : i32
    %c0_i32_0 = arith.constant 0 : i32
    %c0_i32_1 = arith.constant 0 : i32
    return %c0_i32, %c0_i32_0 : i32, i32
  }
  func.func @transform_7(%arg0: i32) -> (i32, i32) {
    %c0_i32 = arith.constant 0 : i32
    %c0_i32_0 = arith.constant 0 : i32
    %c0_i32_1 = arith.constant 0 : i32
    return %c0_i32, %c0_i32_0 : i32, i32
  }
  func.func @transform_8(%arg0: i32) -> (i32, i32) {
    %c0_i32 = arith.constant 0 : i32
    %c0_i32_0 = arith.constant 0 : i32
    %c0_i32_1 = arith.constant 0 : i32
    return %c0_i32, %c0_i32_0 : i32, i32
  }
  func.func @transform_9(%arg0: i32) -> (i32, i32) {
    %c0_i32 = arith.constant 0 : i32
    %c0_i32_0 = arith.constant 0 : i32
    return %arg0, %c0_i32 : i32, i32
  }
}

</mosaic_0001>

<bundles_post_ra>
// kernel: tpu_custom_call.1
= control target key start
LH: loop header
LB: loop body
LE: loop exit
PB: predicated region body
PF: predicated region fallthrough
CT: control target
= control target key end

     0   :  { %14 = vsyncpa [#allocation3], 0  ;;  %s9887_s0 = inlined_call_operand.vmem [shape: f32[256,8], index: 0, kind: input, shape index: {}]   ;;  %s9888_s1 = inlined_call_operand.vmem [shape: bf16[8,1024], index: 1, kind: input, shape index: {}]   ;;  %s9889_s2 = inlined_call_operand.vmem [shape: f32[1,1024], index: 2, kind: input, shape index: {}]   ;;  %s9890_s3 = inlined_call_operand.vmem [shape: bf16[1024,8], index: 3, kind: input, shape index: {}]   ;;  %s9891_s4 = inlined_call_operand.vmem [shape: f32[1,8], index: 4, kind: input, shape index: {}]   ;;  %s9892_s5 = inlined_call_operand.vmem [shape: bf16[8,8], index: 5, kind: input, shape index: {}]   ;;  %s9893_s6 = inlined_call_operand.vmem [shape: f32[1,8], index: 6, kind: input, shape index: {}]   ;;  %s9894_s7 = inlined_call_operand.vmem [shape: bf16[8,1024], index: 7, kind: input, shape index: {}]   ;;  %s9895_s8 = inlined_call_operand.vmem [shape: f32[1,1024], index: 8, kind: input, shape index: {}]   ;;  %s9896_s9 = inlined_call_operand.hbm [shape: f32[256,1024], index: 9, kind: output, shape index: {}]  }
   0x1   :  { %16 = vsyncpa [#allocation3 + $0x1], 0  ;;  %s7101_s30 = smov 0   ;;  %s7103_s10 = smov 0  }
   0x2   :  { %s7105_s11 = smov 0   ;;  %s7107_s12 = smov 0  }
   0x3 LB: > { %s7122_s13 = sadd.s32 4294967295, %s7046_s12   ;;  %s5273_s14 = sadd.s32 4294967294, %s7046_s12   ;;  %s7046_s12 = sphi %s7107_s12, %s10510_s12   ;;  %s7042_s11 = sphi %s7105_s11, %s10509_s11   ;;  %s7038_s10 = sphi %s7103_s10, %s10508_s10   ;;  %s7034_s30 = sphi %s7101_s30, %s10507_s30  }
   0x4   : > { %s7126_s15 = sadd.s32 1, %s7046_s12   ;;  %s223_s16 = sadd.s32 1, %s7042_s11 }
   0x5   : > { %s220_s17 = ssub.s32 %s7046_s12, %s7126_s15  ;;  %p233_p0 = scmp.ne.s32.totalorder %s7042_s11, %s7038_s10 }
   0x6   : > { %p221_p1 = scmp.eq.s32.totalorder %s220_s17, 0  ;;  %p234_p2 = scmp.eq.s32.totalorder %s7122_s13, 1 }
   0x7   : > { %p239_p3 = scmp.ne.s32.totalorder %s7038_s10, %s7034_s30  ;;  %p240_p4 = scmp.eq.s32.totalorder %s5273_s14, 1 }
   0x8   : > { %s7137_s18 = scalar_select %p221_p1, %s7042_s11, %s223_s16  }
   0x9   : > { %p7139_p5 = por %p234_p2, %p233_p0  ;;  %p7143_p6 = por %p240_p4, %p239_p3 }
   0xa   : > { %p5276_p7 = scmp.ge.s32.totalorder %s7046_s12, 1  ;;  %p291_p8 = scmp.lt.s32.totalorder %s7046_s12, 3 }
   0xc   : > { %p292_p9 = pnand %p5276_p7, %p291_p8 }
   0xe   : > { %295 = sbr.rel (%p292_p9) target bundleno = 1919 (0x77f), region = 56 }
  0x13   : > { %v359_v0 = vld [vmem:[%s9888_s1] sm:$0xf]  ;;  %vm392_vm0 = vcmask 1043456   ;;  %v533_v1 = vld [vmem:[%s9888_s1 + $0x4] sm:$0xf]  ;;  %s5278_s25 = sshll.u32 %s7122_s13, 4 }
  0x14   : > { %6351 = vmatprep.subr.msk.bf16.mxu0 %vm392_vm0, %v359_v0  ;;  %6352 = vmatprep.subr.msk.bf16.mxu1 %vm392_vm0, %v533_v1  ;;  %v394_v2 = vsel %vm392_vm0, %v359_v0, 0  ;;  %v542_v3 = vsel %vm392_vm0, %v533_v1, 0  ;;  %p328_p10 = scmp.lt.s32.totalorder %s5278_s25, 31  ;;  %v6410_v4 = vld [vmem:[%s9890_s3 + $0x78] sm:$0xff]   ;;  %vm367_vm1 = vcmask 64512   ;;  %v6412_v15 = vld [vmem:[%s9890_s3 + $0x70] sm:$0xff]  }
  0x15   : > { %5788 = vmatpush3.bf16.msra.mxu0 %v394_v2  ;;  %5806 = vmatpush3.bf16.msra.mxu1 %v542_v3  ;;  %v6411_v5 = vld [vmem:[%s9890_s3 + $0x38] sm:$0xff]   ;;  %v6413_v16 = vld [vmem:[%s9890_s3 + $0x30] sm:$0xff]   ;;  %v6414_v20 = vld [vmem:[%s9890_s3 + $0x68] sm:$0xff]   ;;  %s324_s17 = sand.u32 1, %s7038_s10   ;;  %s5505_s24 = sshll.u32 %s7122_s13, 14 }
  0x16   : > { %s10512_s25 = smov (!%p328_p10, %s5278_s25), 31  ;;  %5823 = vmatprep.subr.bf16.mxu0 %v6410_v4  ;;  %5855 = vmatprep.subr.bf16.mxu1 %v6411_v5  ;;  %v6415_v22 = vld [vmem:[%s9890_s3 + $0x28] sm:$0xff]   ;;  %v6416_v25 = vld [vmem:[%s9890_s3 + $0x60] sm:$0xff]   ;;  %v6418_v31 = vld [vmem:[%s9890_s3 + $0x58] sm:$0xff]   ;;  %s5277_s22 = sshll.u32 %s324_s17, 10 }
  0x17   : > { %s5279_s14 = sshll.u32 %s10512_s25, 3  ;;  %v6417_v26 = vld [vmem:[%s9890_s3 + $0x20] sm:$0xff]   ;;  %v6419_v32 = vld [vmem:[%s9890_s3 + $0x18] sm:$0xff]   ;;  %v6420_v38 = vld [vmem:[%s9890_s3 + $0x50] sm:$0xff]   ;;  %s9360_s23 = scalar_lea.vmem [#allocation2], %s5277_s22 }
  0x18   : > { %s7169_s21 = scalar_lea.vmem %s9887_s0, %s5279_s14  ;;  %v6421_v39 = vld [vmem:[%s9890_s3 + $0x10] sm:$0xff]   ;;  %v6422_v40 = vld [vmem:[%s9890_s3 + $0x48] sm:$0xff]   ;;  %v6424_v42 = vld [vmem:[%s9890_s3 + $0x40] sm:$0xff]   ;;  %s5211_s25 = sshll.u32 %s9360_s23, 4  ;;  %s9840_s25 = int_to_ptr.vmem [resolvable:$true] %s5211_s25 }
  0x19   : > { %v335_v6 = vld [vmem:[%s7169_s21] sm:$0xff]  ;;  %v336_v7 = vld [vmem:[%s7169_s21 + $0x8] sm:$0xff]  ;;  %v337_v8 = vld [vmem:[%s7169_s21 + $0x10] sm:$0xff]  ;;  %s9838_s27 = scalar_lea.hbm %s9896_s9, %s5505_s24  ;;  %s9847_s13 = scalar_lea.sflag [#allocation3], %s324_s17 }
  0x1a   : > { %v7174_v9 = vpack.c.bf16 %v336_v7, %v335_v6  ;;  %v338_v10 = vld [vmem:[%s7169_s21 + $0x18] sm:$0xff]  ;;  %v339_v11 = vld [vmem:[%s7169_s21 + $0x20] sm:$0xff]  ;;  %v340_v12 = vld [vmem:[%s7169_s21 + $0x28] sm:$0xff]  ;;  %s6986_s28 = scalar_lea.vmem %s9840_s25, 16384  ;;  %s7048_s29 = smov [#allocation2]  }
  0x1b   : > { %v7179_v13 = vpack.c.bf16 %v338_v10, %v337_v8  ;;  %v7181_v14 = vpack.c.bf16 %v340_v12, %v339_v11  ;;  %v341_v17 = vld [vmem:[%s7169_s21 + $0x30] sm:$0xff]  ;;  %v342_v18 = vld [vmem:[%s7169_s21 + $0x38] sm:$0xff]  ;;  %v343_v19 = vld [vmem:[%s7169_s21 + $0x40] sm:$0xff]  ;;  %p6987_p11 = scmp.ne.s32.totalorder %s9840_s25, %s6986_s28  ;;  %s6990_s14 = sshll.u32 %s7048_s29, 4  ;;  %s6991_s14 = int_to_ptr.vmem [resolvable:$false] %s6990_s14 }
  0x1c   : > { %5789 = vmatprep.mubr.msk.bf16.mxu0 %vm367_vm1, %v7174_v9  ;;  %5807 = vmatprep.mubr.msk.bf16.mxu1 %vm367_vm1, %v7174_v9  ;;  %v344_v21 = vld [vmem:[%s7169_s21 + $0x48] sm:$0xff]  ;;  %v7211_v23 = vpack.c.bf16 %v342_v18, %v341_v17  ;;  %v345_v27 = vld [vmem:[%s7169_s21 + $0x50] sm:$0xff]  ;;  %v346_v28 = vld [vmem:[%s7169_s21 + $0x58] sm:$0xff]  ;;  %s6992_s16 = scalar_lea.vmem %s6991_s14, 32768  ;;  %p6993_p0 = scmp.lt.s32.totalorder %s9840_s25, %s6991_s14 }
  0x1d   : > { %5790 = vmatmul.mubr.msk.bf16.vlgmr.msra.gmra.mxu0 %vm367_vm1, %v7179_v13  ;;  %5808 = vmatmul.mubr.msk.bf16.vlgmr.msra.gmra.mxu1 %vm367_vm1, %v7179_v13  ;;  %v7213_v24 = vpack.c.bf16 %v344_v21, %v343_v19  ;;  %v347_v29 = vld [vmem:[%s7169_s21 + $0x60] sm:$0xff]  ;;  %v348_v30 = vld [vmem:[%s7169_s21 + $0x68] sm:$0xff]  ;;  %v7239_v33 = vpack.c.bf16 %v346_v28, %v345_v27  ;;  %v349_v35 = vld [vmem:[%s7169_s21 + $0x70] sm:$0xff]  ;;  %p6988_p12 = pnand %p6987_p11, %p7139_p5  ;;  %p6994_p1 = scmp.lt.s32.totalorder %s6992_s16, %s6986_s28 }
  0x1e   : > { %5793 = vmatprep.mubr.msk.bf16.mxu0 %vm367_vm1, %v7181_v14  ;;  %5811 = vmatprep.mubr.msk.bf16.mxu1 %vm367_vm1, %v7181_v14  ;;  %v7241_v34 = vpack.c.bf16 %v348_v30, %v347_v29  ;;  %v350_v36 = vld [vmem:[%s7169_s21 + $0x78] sm:$0xff]  ;;  %v6423_v41 = vld [vmem:[%s9890_s3 + $0x8] sm:$0xff]   ;;  %v6425_v43 = vld [vmem:[%s9890_s3] sm:$0xff]  }
  0x1f   : > { %5824 = vmatpush3.bf16.msra.mxu0 %v6410_v4  ;;  %5856 = vmatpush3.bf16.msra.mxu1 %v6411_v5  ;;  %v7253_v37 = vpack.c.bf16 %v350_v36, %v349_v35  ;;  %v971_v44 = vld [vmem:[%s9888_s1 + $0x8] sm:$0xf]  ;;  %v7284_v45 = vld [vmem:[%s9889_s2] ss:$0 sm:$0xff]  ;;  %v7290_v51 = vld [vmem:[%s9889_s2 + $0x1] ss:$0 sm:$0xff]  ;;  %p6989_p13 = pneg %p6988_p12  ;;  %p6995_p2 = por %p6994_p1, %p6993_p0 }
  0x20   : > { %5825 = vmatprep.subr.bf16.mxu0 %v6412_v15  ;;  %5857 = vmatprep.subr.bf16.mxu1 %v6413_v16  ;;  %v7308_v28 = vld [vmem:[%s9888_s1 + $0xc] sm:$0xf] }
  0x21   : > { %p6996_p3 = pnand %p6995_p2, %p6989_p13 }
  0x23   : > { %5826 = vmatpush3.bf16.msra.mxu0 %v6412_v15  ;;  %5858 = vmatpush3.bf16.msra.mxu1 %v6413_v16 }
  0x24   : > { %5827 = vmatprep.subr.bf16.mxu0 %v6414_v20  ;;  %5859 = vmatprep.subr.bf16.mxu1 %v6415_v22 }
  0x25   : > { %5794 = vmatmul.mubr.msk.bf16.gmra.mxu0 %vm367_vm1, %v7211_v23  ;;  %5812 = vmatmul.mubr.msk.bf16.gmra.mxu1 %vm367_vm1, %v7211_v23 }
  0x26   : > { %5797 = vmatprep.mubr.msk.bf16.mxu0 %vm367_vm1, %v7213_v24  ;;  %5815 = vmatprep.mubr.msk.bf16.mxu1 %vm367_vm1, %v7213_v24 }
  0x27   : > { %5828 = vmatpush3.bf16.msra.mxu0 %v6414_v20  ;;  %5860 = vmatpush3.bf16.msra.mxu1 %v6415_v22  ;;  %v980_v22 = vsel %vm392_vm0, %v971_v44, 0 }
  0x28   : > { %5829 = vmatprep.subr.bf16.mxu0 %v6416_v25  ;;  %5861 = vmatprep.subr.bf16.mxu1 %v6417_v26 }
  0x2b   : > { %5830 = vmatpush3.bf16.msra.mxu0 %v6416_v25  ;;  %5862 = vmatpush3.bf16.msra.mxu1 %v6417_v26 }
  0x2c   : > { %5831 = vmatprep.subr.bf16.mxu0 %v6418_v31  ;;  %5863 = vmatprep.subr.bf16.mxu1 %v6419_v32 }
  0x2d   : > { %5798 = vmatmul.mubr.msk.bf16.gmra.mxu0 %vm367_vm1, %v7239_v33  ;;  %5816 = vmatmul.mubr.msk.bf16.gmra.mxu1 %vm367_vm1, %v7239_v33 }
  0x2e   : > { %5801 = vmatprep.mubr.msk.bf16.mxu0 %vm367_vm1, %v7241_v34  ;;  %5819 = vmatprep.mubr.msk.bf16.mxu1 %vm367_vm1, %v7241_v34 }
  0x2f   : > { %5832 = vmatpush3.bf16.msra.mxu0 %v6418_v31  ;;  %5864 = vmatpush3.bf16.msra.mxu1 %v6419_v32 }
  0x30   : > { %5833 = vmatprep.subr.bf16.mxu0 %v6420_v38  ;;  %5865 = vmatprep.subr.bf16.mxu1 %v6421_v39 }
  0x33   : > { %5834 = vmatpush3.bf16.msra.mxu0 %v6420_v38  ;;  %5866 = vmatpush3.bf16.msra.mxu1 %v6421_v39 }
  0x34   : > { %5835 = vmatprep.subr.bf16.mxu0 %v6422_v40  ;;  %5867 = vmatprep.subr.bf16.mxu1 %v6423_v41 }
  0x35   : > { %5802 = vmatmul.mubr.msk.bf16.gmra.mxu0 %vm367_vm1, %v7253_v37  ;;  %5820 = vmatmul.mubr.msk.bf16.gmra.mxu1 %vm367_vm1, %v7253_v37 }
  0x37   : > { %5836 = vmatpush3.bf16.msra.mxu0 %v6422_v40  ;;  %5868 = vmatpush3.bf16.msra.mxu1 %v6423_v41 }
  0x38   : > { %5837 = vmatprep.subr.bf16.mxu0 %v6424_v42  ;;  %5869 = vmatprep.subr.bf16.mxu1 %v6425_v43 }
  0x3b   : > { %5838 = vmatpush3.bf16.msra.mxu0 %v6424_v42  ;;  %5870 = vmatpush3.bf16.msra.mxu1 %v6425_v43 }
  0x3c   : > { %6353 = vmatprep.subr.msk.bf16.mxu0 %vm392_vm0, %v971_v44 }
  0xdd   : > { %v5791_v46 = vpop.f32.mrf.mxu0  ;;  %v5809_v47 = vpop.f32.mrf.mxu1 }
  0xde   : > { %v439_v48 = vadd.f32 %v5791_v46, %v7284_v45  ;;  %v587_v59 = vadd.f32 %v5809_v47, %v7290_v51 }
  0xdf   : > { %v430_v49 = vpop.f32.mrf.mxu0  ;;  %v578_v50 = vpop.f32.mrf.mxu1 }
  0xe0   : > { %v431_v52 = vadd.f32 %v7284_v45, %v430_v49  ;;  %v579_v55 = vadd.f32 %v7290_v51, %v578_v50  ;;  %v495_v58 = vmax.f32 %v439_v48, 0.0  ;;  %v643_v8 = vmax.f32 %v587_v59, 0.0 }
  0xe1   : > { %v5792_v53 = vpop.f32.mrf.mxu0  ;;  %v5810_v54 = vpop.f32.mrf.mxu1 }
  0xe2   : > { %v442_v56 = vadd.f32 %v5792_v53, %v7284_v45  ;;  %v590_v57 = vadd.f32 %v5810_v54, %v7290_v51  ;;  %v493_v62 = vmax.f32 %v431_v52, 0.0  ;;  %v641_v5 = vmax.f32 %v579_v55, 0.0 }
  0xe3   : > { %v433_v60 = vpop.f32.mrf.mxu0  ;;  %v581_v61 = vpop.f32.mrf.mxu1 }
  0xe4   : > { %v496_v63 = vmax.f32 %v442_v56, 0.0  ;;  %v434_v0 = vadd.f32 %v7284_v45, %v433_v60  ;;  %v582_v1 = vadd.f32 %v7290_v51, %v581_v61  ;;  %v644_v2 = vmax.f32 %v590_v57, 0.0 }
  0xe5   : > { %v5795_v3 = vpop.f32.mrf.mxu0  ;;  %v5813_v4 = vpop.f32.mrf.mxu1 }
  0xe6   : > { %v494_v6 = vmax.f32 %v434_v0, 0.0  ;;  %v642_v7 = vmax.f32 %v582_v1, 0.0  ;;  %v510_v10 = vpack.c.bf16 %v496_v63, %v495_v58  ;;  %v455_v11 = vadd.f32 %v5795_v3, %v7284_v45 }
  0xe7   : > { %v446_v12 = vpop.f32.mrf.mxu0  ;;  %v594_v15 = vpop.f32.mrf.mxu1  ;;  %v658_v19 = vpack.c.bf16 %v644_v2, %v643_v8  ;;  %v603_v30 = vadd.f32 %v5813_v4, %v7290_v51 }
  0xe8   : > { %v447_v16 = vadd.f32 %v7284_v45, %v446_v12  ;;  %v657_v17 = vpack.c.bf16 %v642_v7, %v641_v5  ;;  %v509_v18 = vpack.c.bf16 %v494_v6, %v493_v62  ;;  %v595_v25 = vadd.f32 %v7290_v51, %v594_v15 }
  0xe9   : > { %v5796_v20 = vpop.f32.mrf.mxu0  ;;  %v5814_v21 = vpop.f32.mrf.mxu1  ;;  %v499_v29 = vmax.f32 %v455_v11, 0.0  ;;  %v647_v47 = vmax.f32 %v603_v30, 0.0 }
  0xea   : > { %v458_v26 = vadd.f32 %v5796_v20, %v7284_v45  ;;  %v606_v27 = vadd.f32 %v5814_v21, %v7290_v51  ;;  %5839 = vmatprep.mubr.bf16.mxu0 %v657_v17  ;;  %5871 = vmatprep.mubr.bf16.mxu1 %v509_v18  ;;  %v497_v35 = vmax.f32 %v447_v16, 0.0  ;;  %v645_v43 = vmax.f32 %v595_v25, 0.0 }
  0xeb   : > { %v449_v31 = vpop.f32.mrf.mxu0  ;;  %v597_v32 = vpop.f32.mrf.mxu1  ;;  %5840 = vmatmul.mubr.bf16.vlgmr.msra.gmra.mxu0 %v658_v19  ;;  %5872 = vmatmul.mubr.bf16.vlgmr.msra.gmra.mxu1 %v510_v10 }
  0xec   : > { %v500_v36 = vmax.f32 %v458_v26, 0.0  ;;  %v450_v38 = vadd.f32 %v7284_v45, %v449_v31  ;;  %v598_v39 = vadd.f32 %v7290_v51, %v597_v32  ;;  %5888 = vmatpush3.bf16.msra.mxu0 %v980_v22  ;;  %v648_v40 = vmax.f32 %v606_v27, 0.0 }
  0xed   : > { %v5799_v41 = vpop.f32.mrf.mxu0  ;;  %v5817_v42 = vpop.f32.mrf.mxu1  ;;  %6354 = vmatprep.subr.msk.bf16.mxu0 %vm392_vm0, %v7308_v28 }
  0xee   : > { %v498_v44 = vmax.f32 %v450_v38, 0.0  ;;  %v646_v46 = vmax.f32 %v598_v39, 0.0  ;;  %v512_v48 = vpack.c.bf16 %v500_v36, %v499_v29  ;;  %v471_v49 = vadd.f32 %v5799_v41, %v7284_v45 }
  0xef   : > { %v462_v50 = vpop.f32.mrf.mxu0  ;;  %v610_v52 = vpop.f32.mrf.mxu1  ;;  %v660_v56 = vpack.c.bf16 %v648_v40, %v647_v47  ;;  %v619_v63 = vadd.f32 %v5817_v42, %v7290_v51 }
  0xf0   : > { %v463_v53 = vadd.f32 %v7284_v45, %v462_v50  ;;  %v659_v54 = vpack.c.bf16 %v646_v46, %v645_v43  ;;  %v511_v55 = vpack.c.bf16 %v498_v44, %v497_v35  ;;  %v611_v59 = vadd.f32 %v7290_v51, %v610_v52 }
  0xf1   : > { %v5800_v57 = vpop.f32.mrf.mxu0  ;;  %v5818_v58 = vpop.f32.mrf.mxu1  ;;  %v503_v62 = vmax.f32 %v471_v49, 0.0  ;;  %v651_v15 = vmax.f32 %v619_v63, 0.0  ;;  %v6432_v63 = vld [vmem:[%s9890_s3 + $0x88] sm:$0xff]  }
  0xf2   : > { %v474_v60 = vadd.f32 %v5800_v57, %v7284_v45  ;;  %v622_v61 = vadd.f32 %v5818_v58, %v7290_v51  ;;  %5843 = vmatprep.mubr.bf16.mxu0 %v659_v54  ;;  %5875 = vmatprep.mubr.bf16.mxu1 %v511_v55  ;;  %v501_v2 = vmax.f32 %v463_v53, 0.0  ;;  %v649_v10 = vmax.f32 %v611_v59, 0.0  ;;  %v1898_v54 = vld [vmem:[%s9888_s1 + $0x14] sm:$0xf]  ;;  %v6426_v55 = vld [vmem:[%s9890_s3 + $0xb8] sm:$0xff]   ;;  %v6428_v57 = vld [vmem:[%s9890_s3 + $0xa8] sm:$0xff]  }
  0xf3   : > { %v465_v0 = vpop.f32.mrf.mxu0  ;;  %v613_v1 = vpop.f32.mrf.mxu1  ;;  %5844 = vmatmul.mubr.bf16.gmra.mxu0 %v660_v56  ;;  %5876 = vmatmul.mubr.bf16.gmra.mxu1 %v512_v48  ;;  %v6427_v56 = vld [vmem:[%s9890_s3 + $0xb0] sm:$0xff]   ;;  %v6429_v58 = vld [vmem:[%s9890_s3 + $0xa0] sm:$0xff]   ;;  %v6430_v59 = vld [vmem:[%s9890_s3 + $0x98] sm:$0xff]  }
  0xf4   : > { %v504_v3 = vmax.f32 %v474_v60, 0.0  ;;  %v466_v4 = vadd.f32 %v7284_v45, %v465_v0  ;;  %v614_v5 = vadd.f32 %v7290_v51, %v613_v1  ;;  %v652_v6 = vmax.f32 %v622_v61, 0.0  ;;  %5905 = vmatprep.subr.bf16.mxu1 %v6426_v55  ;;  %v2207_v61 = vld [vmem:[%s9888_s1 + $0x18] sm:$0xf]  ;;  %v6433_v0 = vld [vmem:[%s9890_s3 + $0x80] sm:$0xff]  }
  0xf5   : > { %v5803_v7 = vpop.f32.mrf.mxu0  ;;  %v5821_v8 = vpop.f32.mrf.mxu1  ;;  %5906 = vmatpush3.bf16.msra.mxu1 %v6426_v55  ;;  %v1907_v60 = vsel %vm392_vm0, %v1898_v54, 0  ;;  %v7416_v1 = vld [vmem:[%s9890_s3 + $0xf8] sm:$0xff]  }
  0xf6   : > { %v502_v11 = vmax.f32 %v466_v4, 0.0  ;;  %v650_v12 = vmax.f32 %v614_v5, 0.0  ;;  %v514_v16 = vpack.c.bf16 %v504_v3, %v503_v62  ;;  %v487_v17 = vadd.f32 %v5803_v7, %v7284_v45  ;;  %5907 = vmatprep.subr.bf16.mxu1 %v6427_v56  ;;  %v6431_v62 = vld [vmem:[%s9890_s3 + $0x90] sm:$0xff]   ;;  %v2516_v3 = vld [vmem:[%s9888_s1 + $0x1c] sm:$0xf] }
  0xf7   : > { %v478_v18 = vpop.f32.mrf.mxu0  ;;  %v626_v19 = vpop.f32.mrf.mxu1  ;;  %v662_v25 = vpack.c.bf16 %v652_v6, %v651_v15  ;;  %v635_v35 = vadd.f32 %v5821_v8, %v7290_v51  ;;  %v2525_v4 = vsel %vm392_vm0, %v2516_v3, 0 }
  0xf8   : > { %v479_v20 = vadd.f32 %v7284_v45, %v478_v18  ;;  %v661_v21 = vpack.c.bf16 %v650_v12, %v649_v10  ;;  %v513_v22 = vpack.c.bf16 %v502_v11, %v501_v2  ;;  %v627_v29 = vadd.f32 %v7290_v51, %v626_v19 }
  0xf9   : > { %v5804_v26 = vpop.f32.mrf.mxu0  ;;  %v5822_v27 = vpop.f32.mrf.mxu1  ;;  %v507_v32 = vmax.f32 %v487_v17, 0.0  ;;  %v655_v48 = vmax.f32 %v635_v35, 0.0  ;;  %5908 = vmatpush3.bf16.msra.mxu1 %v6427_v56  ;;  %v2216_v2 = vsel %vm392_vm0, %v2207_v61, 0 }
  0xfa   : > { %v490_v30 = vadd.f32 %v5804_v26, %v7284_v45  ;;  %v638_v31 = vadd.f32 %v5822_v27, %v7290_v51  ;;  %5847 = vmatprep.mubr.bf16.mxu0 %v661_v21  ;;  %5879 = vmatprep.mubr.bf16.mxu1 %v513_v22  ;;  %v505_v39 = vmax.f32 %v479_v20, 0.0  ;;  %v653_v44 = vmax.f32 %v627_v29, 0.0 }
  0xfb   : > { %v481_v36 = vpop.f32.mrf.mxu0  ;;  %v629_v38 = vpop.f32.mrf.mxu1  ;;  %5848 = vmatmul.mubr.bf16.gmra.mxu0 %v662_v25  ;;  %5880 = vmatmul.mubr.bf16.gmra.mxu1 %v514_v16 }
  0xfc   : > { %v508_v40 = vmax.f32 %v490_v30, 0.0  ;;  %v482_v41 = vadd.f32 %v7284_v45, %v481_v36  ;;  %v630_v42 = vadd.f32 %v7290_v51, %v629_v38  ;;  %v656_v43 = vmax.f32 %v638_v31, 0.0  ;;  %v1589_v51 = vld [vmem:[%s9888_s1 + $0x10] sm:$0xf]  ;;  %5909 = vmatprep.subr.bf16.mxu1 %v6428_v57 }
  0xfd   : > { %v1289_v45 = vsel %vm392_vm0, %v7308_v28, 0  ;;  %v1598_v28 = vsel %vm392_vm0, %v1589_v51, 0  ;;  %5910 = vmatpush3.bf16.msra.mxu1 %v6428_v57 }
  0xfe   : > { %v506_v46 = vmax.f32 %v482_v41, 0.0  ;;  %v654_v47 = vmax.f32 %v630_v42, 0.0  ;;  %v516_v49 = vpack.c.bf16 %v508_v40, %v507_v32  ;;  %v664_v53 = vpack.c.bf16 %v656_v43, %v655_v48  ;;  %5911 = vmatprep.subr.bf16.mxu1 %v6429_v58 }
 0x100   : > { %v663_v50 = vpack.c.bf16 %v654_v47, %v653_v44  ;;  %v515_v52 = vpack.c.bf16 %v506_v46, %v505_v39 }
 0x101   : > { %5912 = vmatpush3.bf16.msra.mxu1 %v6429_v58 }
 0x102   : > { %5851 = vmatprep.mubr.bf16.mxu0 %v663_v50  ;;  %5883 = vmatprep.mubr.bf16.mxu1 %v515_v52 }
 0x103   : > { %5852 = vmatmul.mubr.bf16.gmra.mxu0 %v664_v53  ;;  %5884 = vmatmul.mubr.bf16.gmra.mxu1 %v516_v49 }
 0x104   : > { %5889 = vmatprep.mubr.msk.bf16.mxu0 %vm367_vm1, %v7174_v9  ;;  %5913 = vmatprep.subr.bf16.mxu1 %v6430_v59 }
 0x105   : > { %5914 = vmatpush3.bf16.msra.mxu1 %v6430_v59 }
 0x106   : > { %5915 = vmatprep.subr.bf16.mxu1 %v6431_v62 }
 0x109   : > { %5916 = vmatpush3.bf16.msra.mxu1 %v6431_v62 }
 0x10a   : > { %5917 = vmatprep.subr.bf16.mxu1 %v6432_v63 }
 0x10b   : > { %5890 = vmatmul.mubr.msk.bf16.vlgmr.msra.gmra.mxu0 %vm367_vm1, %v7179_v13 }
 0x10c   : > { %5938 = vmatpush3.bf16.msra.mxu0 %v1289_v45  ;;  %5893 = vmatprep.mubr.msk.bf16.mxu0 %vm367_vm1, %v7181_v14  ;;  %v7520_v45 = vld [vmem:[%s9889_s2 + $0x2] ss:$0 sm:$0xff] }
 0x10d   : > { %6355 = vmatprep.subr.msk.bf16.mxu0 %vm392_vm0, %v1589_v51  ;;  %5918 = vmatpush3.bf16.msra.mxu1 %v6432_v63 }
 0x10e   : > { %5919 = vmatprep.subr.bf16.mxu1 %v6433_v0 }
 0x111   : > { %5920 = vmatpush3.bf16.msra.mxu1 %v6433_v0 }
 0x112   : > { %5955 = vmatprep.subr.bf16.mxu1 %v7416_v1 }
 0x113   : > { %5894 = vmatmul.mubr.msk.bf16.gmra.mxu0 %vm367_vm1, %v7211_v23 }
 0x114   : > { %5897 = vmatprep.mubr.msk.bf16.mxu0 %vm367_vm1, %v7213_v24 }
 0x11b   : > { %5898 = vmatmul.mubr.msk.bf16.gmra.mxu0 %vm367_vm1, %v7239_v33 }
 0x11c   : > { %5901 = vmatprep.mubr.msk.bf16.mxu0 %vm367_vm1, %v7241_v34 }
 0x123   : > { %5902 = vmatmul.mubr.msk.bf16.gmra.mxu0 %vm367_vm1, %v7253_v37 }
 0x124   : > { %5939 = vmatprep.mubr.msk.bf16.mxu0 %vm367_vm1, %v7174_v9 }
 0x12b   : > { %5940 = vmatmul.mubr.msk.bf16.vlgmr.msra.gmra.mxu0 %vm367_vm1, %v7179_v13 }
 0x12c   : > { %5988 = vmatpush3.bf16.msra.mxu0 %v1598_v28  ;;  %5943 = vmatprep.mubr.msk.bf16.mxu0 %vm367_vm1, %v7181_v14 }
 0x12d   : > { %6356 = vmatprep.subr.msk.bf16.mxu0 %vm392_vm0, %v1898_v54 }
 0x133   : > { %5944 = vmatmul.mubr.msk.bf16.gmra.mxu0 %vm367_vm1, %v7211_v23 }
 0x134   : > { %5947 = vmatprep.mubr.msk.bf16.mxu0 %vm367_vm1, %v7213_v24 }
 0x13b   : > { %5948 = vmatmul.mubr.msk.bf16.gmra.mxu0 %vm367_vm1, %v7239_v33 }
 0x13c   : > { %5951 = vmatprep.mubr.msk.bf16.mxu0 %vm367_vm1, %v7241_v34 }
 0x143   : > { %5952 = vmatmul.mubr.msk.bf16.gmra.mxu0 %vm367_vm1, %v7253_v37 }
 0x144   : > { %5989 = vmatprep.mubr.msk.bf16.mxu0 %vm367_vm1, %v7174_v9 }
 0x14b   : > { %5990 = vmatmul.mubr.msk.bf16.vlgmr.msra.gmra.mxu0 %vm367_vm1, %v7179_v13 }
 0x14c   : > { %6038 = vmatpush3.bf16.msra.mxu0 %v1907_v60  ;;  %5993 = vmatprep.mubr.msk.bf16.mxu0 %vm367_vm1, %v7181_v14 }
 0x14d   : > { %6357 = vmatprep.subr.msk.bf16.mxu0 %vm392_vm0, %v2207_v61 }
 0x153   : > { %5994 = vmatmul.mubr.msk.bf16.gmra.mxu0 %vm367_vm1, %v7211_v23 }
 0x154   : > { %5997 = vmatprep.mubr.msk.bf16.mxu0 %vm367_vm1, %v7213_v24 }
 0x15b   : > { %5998 = vmatmul.mubr.msk.bf16.gmra.mxu0 %vm367_vm1, %v7239_v33 }
 0x15c   : > { %6001 = vmatprep.mubr.msk.bf16.mxu0 %vm367_vm1, %v7241_v34 }
 0x163   : > { %6002 = vmatmul.mubr.msk.bf16.gmra.mxu0 %vm367_vm1, %v7253_v37 }
 0x164   : > { %6039 = vmatprep.mubr.msk.bf16.mxu0 %vm367_vm1, %v7174_v9 }
 0x16b   : > { %6040 = vmatmul.mubr.msk.bf16.vlgmr.msra.gmra.mxu0 %vm367_vm1, %v7179_v13 }
 0x16c   : > { %6088 = vmatpush3.bf16.msra.mxu0 %v2216_v2  ;;  %6043 = vmatprep.mubr.msk.bf16.mxu0 %vm367_vm1, %v7181_v14 }
 0x16d   : > { %6358 = vmatprep.subr.msk.bf16.mxu0 %vm392_vm0, %v2516_v3  ;;  %v6435_v3 = vld [vmem:[%s9890_s3 + $0xf0] sm:$0xff]  }
 0x173   : > { %6044 = vmatmul.mubr.msk.bf16.gmra.mxu0 %vm367_vm1, %v7211_v23 }
 0x174   : > { %6047 = vmatprep.mubr.msk.bf16.mxu0 %vm367_vm1, %v7213_v24 }
 0x17b   : > { %6048 = vmatmul.mubr.msk.bf16.gmra.mxu0 %vm367_vm1, %v7239_v33 }
 0x17c   : > { %6051 = vmatprep.mubr.msk.bf16.mxu0 %vm367_vm1, %v7241_v34 }
 0x183   : > { %6052 = vmatmul.mubr.msk.bf16.gmra.mxu0 %vm367_vm1, %v7253_v37 }
 0x184   : > { %6089 = vmatprep.mubr.msk.bf16.mxu0 %vm367_vm1, %v7174_v9 }
 0x18b   : > { %6090 = vmatmul.mubr.msk.bf16.vlgmr.msra.gmra.mxu0 %vm367_vm1, %v7179_v13 }
 0x18c   : > { %6138 = vmatpush3.bf16.msra.mxu0 %v2525_v4  ;;  %6093 = vmatprep.mubr.msk.bf16.mxu0 %vm367_vm1, %v7181_v14 }
 0x193   : > { %6094 = vmatmul.mubr.msk.bf16.gmra.mxu0 %vm367_vm1, %v7211_v23 }
 0x194   : > { %6097 = vmatprep.mubr.msk.bf16.mxu0 %vm367_vm1, %v7213_v24 }
 0x19b   : > { %6098 = vmatmul.mubr.msk.bf16.gmra.mxu0 %vm367_vm1, %v7239_v33 }
 0x19c   : > { %6101 = vmatprep.mubr.msk.bf16.mxu0 %vm367_vm1, %v7241_v34 }
 0x1a3   : > { %6102 = vmatmul.mubr.msk.bf16.gmra.mxu0 %vm367_vm1, %v7253_v37 }
 0x1a4   : > { %6139 = vmatprep.mubr.msk.bf16.mxu0 %vm367_vm1, %v7174_v9 }
 0x1ab   : > { %v5841_v5 = vpop.f32.mrf.mxu0  ;;  %v5873_v6 = vpop.f32.mrf.mxu1  ;;  %6140 = vmatmul.mubr.msk.bf16.vlgmr.msra.gmra.mxu0 %vm367_vm1, %v7179_v13 }
 0x1ac   : > { %v7467_v7 = vadd.f32 %v5873_v6, %v5841_v5  ;;  %6143 = vmatprep.mubr.msk.bf16.mxu0 %vm367_vm1, %v7181_v14 }
 0x1ad   : > { %v763_v8 = vpop.f32.mrf.mxu0  ;;  %v908_v10 = vpop.f32.mrf.mxu1 }
 0x1ae   : > { %v7471_v11 = vadd.f32 %v908_v10, %v763_v8 }
 0x1af   : > { %v5842_v12 = vpop.f32.mrf.mxu0  ;;  %v5874_v15 = vpop.f32.mrf.mxu1 }
 0x1b0   : > { %v7473_v16 = vadd.f32 %v5874_v15, %v5842_v12 }
 0x1b1   : > { %v7475_v17 = vpop.f32.mrf.mxu0  ;;  %v7477_v9 = vpop.f32.mrf.mxu1 }
 0x1b3   : > { %v5845_v18 = vpop.f32.mrf.mxu0  ;;  %v5877_v19 = vpop.f32.mrf.mxu1  ;;  %6144 = vmatmul.mubr.msk.bf16.gmra.mxu0 %vm367_vm1, %v7211_v23 }
 0x1b4   : > { %v7481_v13 = vadd.f32 %v5877_v19, %v5845_v18  ;;  %6147 = vmatprep.mubr.msk.bf16.mxu0 %vm367_vm1, %v7213_v24  ;;  %v6436_v18 = vld [vmem:[%s9890_s3 + $0xe8] sm:$0xff]  }
 0x1b5   : > { %v779_v14 = vpop.f32.mrf.mxu0  ;;  %v924_v20 = vpop.f32.mrf.mxu1 }
 0x1b6   : > { %v7485_v21 = vadd.f32 %v924_v20, %v779_v14 }
 0x1b7   : > { %v5846_v22 = vpop.f32.mrf.mxu0  ;;  %v5878_v25 = vpop.f32.mrf.mxu1 }
 0x1b8   : > { %v7487_v26 = vadd.f32 %v5878_v25, %v5846_v22 }
 0x1b9   : > { %v7489_v27 = vpop.f32.mrf.mxu0  ;;  %v7491_v29 = vpop.f32.mrf.mxu1 }
 0x1bb   : > { %v5849_v30 = vpop.f32.mrf.mxu0  ;;  %v5881_v31 = vpop.f32.mrf.mxu1  ;;  %6148 = vmatmul.mubr.msk.bf16.gmra.mxu0 %vm367_vm1, %v7239_v33 }
 0x1bc   : > { %v7495_v23 = vadd.f32 %v5881_v31, %v5849_v30  ;;  %6151 = vmatprep.mubr.msk.bf16.mxu0 %vm367_vm1, %v7241_v34 }
 0x1bd   : > { %v795_v24 = vpop.f32.mrf.mxu0  ;;  %v940_v32 = vpop.f32.mrf.mxu1 }
 0x1be   : > { %v7499_v35 = vadd.f32 %v940_v32, %v795_v24 }
 0x1bf   : > { %v5850_v36 = vpop.f32.mrf.mxu0  ;;  %v5882_v38 = vpop.f32.mrf.mxu1 }
 0x1c0   : > { %v7501_v39 = vadd.f32 %v5882_v38, %v5850_v36 }
 0x1c1   : > { %v7503_v40 = vpop.f32.mrf.mxu0  ;;  %v7505_v41 = vpop.f32.mrf.mxu1 }
 0x1c3   : > { %v5853_v42 = vpop.f32.mrf.mxu0  ;;  %v5885_v43 = vpop.f32.mrf.mxu1  ;;  %6152 = vmatmul.mubr.msk.bf16.gmra.mxu0 %vm367_vm1, %v7253_v37 }
 0x1c4   : > { %v7509_v33 = vadd.f32 %v5885_v43, %v5853_v42 }
 0x1c5   : > { %v811_v34 = vpop.f32.mrf.mxu0  ;;  %v956_v44 = vpop.f32.mrf.mxu1 }
 0x1c6   : > { %v7511_v46 = vadd.f32 %v956_v44, %v811_v34  ;;  %v6438_v44 = vld [vmem:[%s9890_s3 + $0xd8] sm:$0xff]  }
 0x1c7   : > { %v5854_v47 = vpop.f32.mrf.mxu0  ;;  %v5886_v48 = vpop.f32.mrf.mxu1 }
 0x1c8   : > { %v7513_v49 = vadd.f32 %v5886_v48, %v5854_v47 }
 0x1c9   : > { %v7515_v50 = vpop.f32.mrf.mxu0 }
 0x1cb   : > { %v5891_v52 = vpop.f32.mrf.mxu0 }
 0x1cc   : > { %v1025_v54 = vadd.f32 %v5891_v52, %v7520_v45 }
 0x1cd   : > { %v1016_v53 = vpop.f32.mrf.mxu0 }
 0x1ce   : > { %v1017_v51 = vadd.f32 %v7520_v45, %v1016_v53  ;;  %v1081_v61 = vmax.f32 %v1025_v54, 0.0  ;;  %v6439_v54 = vld [vmem:[%s9890_s3 + $0xd0] sm:$0xff]  }
 0x1cf   : > { %v5892_v37 = vpop.f32.mrf.mxu0 }
 0x1d0   : > { %v1028_v28 = vadd.f32 %v5892_v37, %v7520_v45  ;;  %v1079_v59 = vmax.f32 %v1017_v51, 0.0 }
 0x1d1   : > { %v1019_v55 = vpop.f32.mrf.mxu0 }
 0x1d2   : > { %v1020_v56 = vadd.f32 %v7520_v45, %v1019_v55  ;;  %v1082_v57 = vmax.f32 %v1028_v28, 0.0 }
 0x1d3   : > { %v5895_v58 = vpop.f32.mrf.mxu0 }
 0x1d4   : > { %v1080_v60 = vmax.f32 %v1020_v56, 0.0  ;;  %v1096_v0 = vpack.c.bf16 %v1082_v57, %v1081_v61  ;;  %v1041_v6 = vadd.f32 %v5895_v58, %v7520_v45 }
 0x1d5   : > { %v1032_v62 = vpop.f32.mrf.mxu0 }
 0x1d6   : > { %v1095_v63 = vpack.c.bf16 %v1080_v60, %v1079_v59  ;;  %v1033_v4 = vadd.f32 %v7520_v45, %v1032_v62  ;;  %v1085_v20 = vmax.f32 %v1041_v6, 0.0  ;;  %v6440_v62 = vld [vmem:[%s9890_s3 + $0xc8] sm:$0xff]  }
 0x1d7   : > { %v5896_v2 = vpop.f32.mrf.mxu0 }
 0x1d8   : > { %v1044_v5 = vadd.f32 %v5896_v2, %v7520_v45  ;;  %5921 = vmatprep.mubr.bf16.mxu1 %v1095_v63  ;;  %v1083_v19 = vmax.f32 %v1033_v4, 0.0  ;;  %v7560_v4 = vld [vmem:[%s9889_s2 + $0x3] ss:$0 sm:$0xff] }
 0x1d9   : > { %v1035_v8 = vpop.f32.mrf.mxu0  ;;  %5922 = vmatmul.mubr.bf16.vlgmr.msra.gmra.mxu1 %v1096_v0 }
 0x1da   : > { %v1036_v10 = vadd.f32 %v7520_v45, %v1035_v8  ;;  %5956 = vmatpush3.bf16.msra.mxu1 %v7416_v1  ;;  %v1086_v12 = vmax.f32 %v1044_v5, 0.0  ;;  %v6437_v1 = vld [vmem:[%s9890_s3 + $0xe0] sm:$0xff]  }
 0x1db   : > { %v5899_v15 = vpop.f32.mrf.mxu0  ;;  %5957 = vmatprep.subr.bf16.mxu1 %v6435_v3  ;;  %v6441_v8 = vld [vmem:[%s9890_s3 + $0xc0] sm:$0xff]  }
 0x1dc   : > { %v1084_v14 = vmax.f32 %v1036_v10, 0.0  ;;  %v1098_v30 = vpack.c.bf16 %v1086_v12, %v1085_v20  ;;  %v1057_v36 = vadd.f32 %v5899_v15, %v7520_v45 }
 0x1dd   : > { %v1048_v22 = vpop.f32.mrf.mxu0 }
 0x1de   : > { %5958 = vmatpush3.bf16.msra.mxu1 %v6435_v3  ;;  %v1097_v25 = vpack.c.bf16 %v1084_v14, %v1083_v19  ;;  %v1049_v24 = vadd.f32 %v7520_v45, %v1048_v22  ;;  %v1089_v52 = vmax.f32 %v1057_v36, 0.0  ;;  %v6442_v22 = vld [vmem:[%s9890_s3 + $0x138] sm:$0xff]  }
 0x1df   : > { %v5900_v31 = vpop.f32.mrf.mxu0  ;;  %5959 = vmatprep.subr.bf16.mxu1 %v6436_v18 }
 0x1e0   : > { %v1060_v32 = vadd.f32 %v5900_v31, %v7520_v45  ;;  %5925 = vmatprep.mubr.bf16.mxu1 %v1097_v25  ;;  %v1087_v47 = vmax.f32 %v1049_v24, 0.0 }
 0x1e1   : > { %v1051_v38 = vpop.f32.mrf.mxu0  ;;  %5926 = vmatmul.mubr.bf16.gmra.mxu1 %v1098_v30 }
 0x1e2   : > { %v1052_v42 = vadd.f32 %v7520_v45, %v1051_v38  ;;  %5960 = vmatpush3.bf16.msra.mxu1 %v6436_v18  ;;  %v1090_v43 = vmax.f32 %v1060_v32, 0.0  ;;  %v6443_v38 = vld [vmem:[%s9890_s3 + $0x130] sm:$0xff]  }
 0x1e3   : > { %v5903_v34 = vpop.f32.mrf.mxu0  ;;  %5961 = vmatprep.subr.bf16.mxu1 %v6437_v1 }
 0x1e4   : > { %v1088_v48 = vmax.f32 %v1052_v42, 0.0  ;;  %v1100_v51 = vpack.c.bf16 %v1090_v43, %v1089_v52  ;;  %v1073_v57 = vadd.f32 %v5903_v34, %v7520_v45 }
 0x1e5   : > { %v1064_v53 = vpop.f32.mrf.mxu0 }
 0x1e6   : > { %5962 = vmatpush3.bf16.msra.mxu1 %v6437_v1  ;;  %v1099_v37 = vpack.c.bf16 %v1088_v48, %v1087_v47  ;;  %v1065_v55 = vadd.f32 %v7520_v45, %v1064_v53  ;;  %v1093_v2 = vmax.f32 %v1073_v57, 0.0  ;;  %v6444_v53 = vld [vmem:[%s9890_s3 + $0x128] sm:$0xff]  }
 0x1e7   : > { %v5904_v28 = vpop.f32.mrf.mxu0  ;;  %5963 = vmatprep.subr.bf16.mxu1 %v6438_v44 }
 0x1e8   : > { %v1076_v56 = vadd.f32 %v5904_v28, %v7520_v45  ;;  %5929 = vmatprep.mubr.bf16.mxu1 %v1099_v37  ;;  %v1091_v63 = vmax.f32 %v1065_v55, 0.0 }
 0x1e9   : > { %v1067_v58 = vpop.f32.mrf.mxu0  ;;  %5930 = vmatmul.mubr.bf16.gmra.mxu1 %v1100_v51 }
 0x1ea   : > { %v1068_v59 = vadd.f32 %v7520_v45, %v1067_v58  ;;  %5964 = vmatpush3.bf16.msra.mxu1 %v6438_v44  ;;  %v1094_v60 = vmax.f32 %v1076_v56, 0.0  ;;  %v6445_v58 = vld [vmem:[%s9890_s3 + $0x120] sm:$0xff]  }
 0x1eb   : > { %v5941_v61 = vpop.f32.mrf.mxu0  ;;  %5965 = vmatprep.subr.bf16.mxu1 %v6439_v54 }
 0x1ec   : > { %v1092_v0 = vmax.f32 %v1068_v59, 0.0  ;;  %v1102_v45 = vpack.c.bf16 %v1094_v60, %v1093_v2  ;;  %v1334_v15 = vadd.f32 %v5941_v61, %v7560_v4 }
 0x1ed   : > { %v1325_v3 = vpop.f32.mrf.mxu0 }
 0x1ee   : > { %5966 = vmatpush3.bf16.msra.mxu1 %v6439_v54  ;;  %v1101_v5 = vpack.c.bf16 %v1092_v0, %v1091_v63  ;;  %v1326_v10 = vadd.f32 %v7560_v4, %v1325_v3  ;;  %v1390_v31 = vmax.f32 %v1334_v15, 0.0  ;;  %v6446_v3 = vld [vmem:[%s9890_s3 + $0x118] sm:$0xff]  }
 0x1ef   : > { %v5942_v6 = vpop.f32.mrf.mxu0  ;;  %5967 = vmatprep.subr.bf16.mxu1 %v6440_v62 }
 0x1f0   : > { %v1337_v12 = vadd.f32 %v5942_v6, %v7560_v4  ;;  %5933 = vmatprep.mubr.bf16.mxu1 %v1101_v5  ;;  %v1388_v25 = vmax.f32 %v1326_v10, 0.0 }
 0x1f1   : > { %5934 = vmatmul.mubr.bf16.gmra.mxu1 %v1102_v45  ;;  %v1328_v18 = vpop.f32.mrf.mxu0 }
 0x1f2   : > { %v1329_v19 = vadd.f32 %v7560_v4, %v1328_v18  ;;  %5968 = vmatpush3.bf16.msra.mxu1 %v6440_v62  ;;  %v1391_v14 = vmax.f32 %v1337_v12, 0.0  ;;  %v6447_v18 = vld [vmem:[%s9890_s3 + $0x110] sm:$0xff]  }
 0x1f3   : > { %v5945_v20 = vpop.f32.mrf.mxu0  ;;  %5969 = vmatprep.subr.bf16.mxu1 %v6441_v8 }
 0x1f4   : > { %v1389_v30 = vmax.f32 %v1329_v19, 0.0  ;;  %v1405_v32 = vpack.c.bf16 %v1391_v14, %v1390_v31  ;;  %v1350_v34 = vadd.f32 %v5945_v20, %v7560_v4 }
 0x1f5   : > { %v1341_v1 = vpop.f32.mrf.mxu0 }
 0x1f6   : > { %5970 = vmatpush3.bf16.msra.mxu1 %v6441_v8  ;;  %v1404_v24 = vpack.c.bf16 %v1389_v30, %v1388_v25  ;;  %v1342_v42 = vadd.f32 %v7560_v4, %v1341_v1  ;;  %v1394_v28 = vmax.f32 %v1350_v34, 0.0  ;;  %v6448_v1 = vld [vmem:[%s9890_s3 + $0x108] sm:$0xff]  }
 0x1f7   : > { %v5946_v36 = vpop.f32.mrf.mxu0  ;;  %6005 = vmatprep.subr.bf16.mxu1 %v6442_v22 }
 0x1f8   : > { %v1353_v43 = vadd.f32 %v5946_v36, %v7560_v4  ;;  %5971 = vmatprep.mubr.bf16.mxu1 %v1404_v24  ;;  %v1392_v37 = vmax.f32 %v1342_v42, 0.0  ;;  %v7605_v42 = vld [vmem:[%s9889_s2 + $0x4] ss:$0 sm:$0xff] }
 0x1f9   : > { %v1344_v44 = vpop.f32.mrf.mxu0  ;;  %5972 = vmatmul.mubr.bf16.vlgmr.msra.gmra.mxu1 %v1405_v32 }
 0x1fa   : > { %v1345_v47 = vadd.f32 %v7560_v4, %v1344_v44  ;;  %6006 = vmatpush3.bf16.msra.mxu1 %v6442_v22  ;;  %v1395_v48 = vmax.f32 %v1353_v43, 0.0  ;;  %v6449_v44 = vld [vmem:[%s9890_s3 + $0x100] sm:$0xff]  }
 0x1fb   : > { %v5949_v52 = vpop.f32.mrf.mxu0  ;;  %6007 = vmatprep.subr.bf16.mxu1 %v6443_v38 }
 0x1fc   : > { %v1393_v51 = vmax.f32 %v1345_v47, 0.0  ;;  %v1407_v56 = vpack.c.bf16 %v1395_v48, %v1394_v28  ;;  %v1366_v61 = vadd.f32 %v5949_v52, %v7560_v4 }
 0x1fd   : > { %v1357_v54 = vpop.f32.mrf.mxu0 }
 0x1fe   : > { %6008 = vmatpush3.bf16.msra.mxu1 %v6443_v38  ;;  %v1406_v55 = vpack.c.bf16 %v1393_v51, %v1392_v37  ;;  %v1358_v59 = vadd.f32 %v7560_v4, %v1357_v54  ;;  %v1398_v6 = vmax.f32 %v1366_v61, 0.0  ;;  %v6450_v54 = vld [vmem:[%s9890_s3 + $0x178] sm:$0xff]  }
 0x1ff   : > { %v5950_v57 = vpop.f32.mrf.mxu0  ;;  %6009 = vmatprep.subr.bf16.mxu1 %v6444_v53 }
 0x200   : > { %v1369_v60 = vadd.f32 %v5950_v57, %v7560_v4  ;;  %5975 = vmatprep.mubr.bf16.mxu1 %v1406_v55  ;;  %v1396_v5 = vmax.f32 %v1358_v59, 0.0 }
 0x201   : > { %v1360_v62 = vpop.f32.mrf.mxu0  ;;  %5976 = vmatmul.mubr.bf16.gmra.mxu1 %v1407_v56 }
 0x202   : > { %v1361_v63 = vadd.f32 %v7560_v4, %v1360_v62  ;;  %6010 = vmatpush3.bf16.msra.mxu1 %v6444_v53  ;;  %v1399_v0 = vmax.f32 %v1369_v60, 0.0  ;;  %v6451_v62 = vld [vmem:[%s9890_s3 + $0x170] sm:$0xff]  }
 0x203   : > { %v5953_v2 = vpop.f32.mrf.mxu0  ;;  %6011 = vmatprep.subr.bf16.mxu1 %v6445_v58 }
 0x204   : > { %v1397_v45 = vmax.f32 %v1361_v63, 0.0  ;;  %v1409_v12 = vpack.c.bf16 %v1399_v0, %v1398_v6  ;;  %v1382_v20 = vadd.f32 %v5953_v2, %v7560_v4 }
 0x205   : > { %v1373_v8 = vpop.f32.mrf.mxu0 }
 0x206   : > { %6012 = vmatpush3.bf16.msra.mxu1 %v6445_v58  ;;  %v1408_v10 = vpack.c.bf16 %v1397_v45, %v1396_v5  ;;  %v1374_v19 = vadd.f32 %v7560_v4, %v1373_v8  ;;  %v1402_v36 = vmax.f32 %v1382_v20, 0.0  ;;  %v6452_v8 = vld [vmem:[%s9890_s3 + $0x168] sm:$0xff]  }
 0x207   : > { %v5954_v15 = vpop.f32.mrf.mxu0  ;;  %6013 = vmatprep.subr.bf16.mxu1 %v6446_v3 }
 0x208   : > { %v1385_v14 = vadd.f32 %v5954_v15, %v7560_v4  ;;  %5979 = vmatprep.mubr.bf16.mxu1 %v1408_v10  ;;  %v1400_v24 = vmax.f32 %v1374_v19, 0.0 }
 0x209   : > { %v1376_v22 = vpop.f32.mrf.mxu0  ;;  %5980 = vmatmul.mubr.bf16.gmra.mxu1 %v1409_v12 }
 0x20a   : > { %v1377_v25 = vadd.f32 %v7560_v4, %v1376_v22  ;;  %6014 = vmatpush3.bf16.msra.mxu1 %v6446_v3  ;;  %v1403_v30 = vmax.f32 %v1385_v14, 0.0  ;;  %v6453_v22 = vld [vmem:[%s9890_s3 + $0x160] sm:$0xff]  }
 0x20b   : > { %v5991_v31 = vpop.f32.mrf.mxu0  ;;  %6015 = vmatprep.subr.bf16.mxu1 %v6447_v18 }
 0x20c   : > { %v1401_v32 = vmax.f32 %v1377_v25, 0.0  ;;  %v1411_v4 = vpack.c.bf16 %v1403_v30, %v1402_v36  ;;  %v1643_v52 = vadd.f32 %v5991_v31, %v7605_v42 }
 0x20d   : > { %v1634_v38 = vpop.f32.mrf.mxu0 }
 0x20e   : > { %6016 = vmatpush3.bf16.msra.mxu1 %v6447_v18  ;;  %v1410_v43 = vpack.c.bf16 %v1401_v32, %v1400_v24  ;;  %v1635_v47 = vadd.f32 %v7605_v42, %v1634_v38  ;;  %v1699_v57 = vmax.f32 %v1643_v52, 0.0  ;;  %v6454_v38 = vld [vmem:[%s9890_s3 + $0x158] sm:$0xff]  }
 0x20f   : > { %v5992_v34 = vpop.f32.mrf.mxu0  ;;  %6017 = vmatprep.subr.bf16.mxu1 %v6448_v1 }
 0x210   : > { %v1646_v48 = vadd.f32 %v5992_v34, %v7605_v42  ;;  %5983 = vmatprep.mubr.bf16.mxu1 %v1410_v43  ;;  %v1697_v55 = vmax.f32 %v1635_v47, 0.0 }
 0x211   : > { %5984 = vmatmul.mubr.bf16.gmra.mxu1 %v1411_v4  ;;  %v1637_v53 = vpop.f32.mrf.mxu0 }
 0x212   : > { %v1638_v37 = vadd.f32 %v7605_v42, %v1637_v53  ;;  %6018 = vmatpush3.bf16.msra.mxu1 %v6448_v1  ;;  %v1700_v51 = vmax.f32 %v1646_v48, 0.0  ;;  %v6455_v53 = vld [vmem:[%s9890_s3 + $0x150] sm:$0xff]  }
 0x213   : > { %v5995_v28 = vpop.f32.mrf.mxu0  ;;  %6019 = vmatprep.subr.bf16.mxu1 %v6449_v44 }
 0x214   : > { %v1698_v56 = vmax.f32 %v1638_v37, 0.0  ;;  %v1714_v60 = vpack.c.bf16 %v1700_v51, %v1699_v57  ;;  %v1659_v2 = vadd.f32 %v5995_v28, %v7605_v42 }
 0x215   : > { %v1650_v58 = vpop.f32.mrf.mxu0 }
 0x216   : > { %6020 = vmatpush3.bf16.msra.mxu1 %v6449_v44  ;;  %v1713_v59 = vpack.c.bf16 %v1698_v56, %v1697_v55  ;;  %v1651_v63 = vadd.f32 %v7605_v42, %v1650_v58  ;;  %v1703_v15 = vmax.f32 %v1659_v2, 0.0  ;;  %v6456_v58 = vld [vmem:[%s9890_s3 + $0x148] sm:$0xff]  }
 0x217   : > { %v5996_v61 = vpop.f32.mrf.mxu0  ;;  %6055 = vmatprep.subr.bf16.mxu1 %v6450_v54 }
 0x218   : > { %v1662_v0 = vadd.f32 %v5996_v61, %v7605_v42  ;;  %6021 = vmatprep.mubr.bf16.mxu1 %v1713_v59  ;;  %v1701_v10 = vmax.f32 %v1651_v63, 0.0  ;;  %v7650_v63 = vld [vmem:[%s9889_s2 + $0x5] ss:$0 sm:$0xff] }
 0x219   : > { %v1653_v3 = vpop.f32.mrf.mxu0  ;;  %6022 = vmatmul.mubr.bf16.vlgmr.msra.gmra.mxu1 %v1714_v60 }
 0x21a   : > { %v1654_v5 = vadd.f32 %v7605_v42, %v1653_v3  ;;  %6056 = vmatpush3.bf16.msra.mxu1 %v6450_v54  ;;  %v1704_v45 = vmax.f32 %v1662_v0, 0.0  ;;  %v6457_v3 = vld [vmem:[%s9890_s3 + $0x140] sm:$0xff]  }
 0x21b   : > { %v5999_v6 = vpop.f32.mrf.mxu0  ;;  %6057 = vmatprep.subr.bf16.mxu1 %v6451_v62 }
 0x21c   : > { %v1702_v12 = vmax.f32 %v1654_v5, 0.0  ;;  %v1716_v14 = vpack.c.bf16 %v1704_v45, %v1703_v15  ;;  %v1675_v31 = vadd.f32 %v5999_v6, %v7605_v42 }
 0x21d   : > { %v1666_v18 = vpop.f32.mrf.mxu0 }
 0x21e   : > { %6058 = vmatpush3.bf16.msra.mxu1 %v6451_v62  ;;  %v1715_v19 = vpack.c.bf16 %v1702_v12, %v1701_v10  ;;  %v1667_v25 = vadd.f32 %v7605_v42, %v1666_v18  ;;  %v1707_v34 = vmax.f32 %v1675_v31, 0.0  ;;  %v6458_v18 = vld [vmem:[%s9890_s3 + $0x1b8] sm:$0xff]  }
 0x21f   : > { %v6000_v20 = vpop.f32.mrf.mxu0  ;;  %6059 = vmatprep.subr.bf16.mxu1 %v6452_v8 }
 0x220   : > { %v1678_v30 = vadd.f32 %v6000_v20, %v7605_v42  ;;  %6025 = vmatprep.mubr.bf16.mxu1 %v1715_v19  ;;  %v1705_v43 = vmax.f32 %v1667_v25, 0.0 }
 0x221   : > { %v1669_v1 = vpop.f32.mrf.mxu0  ;;  %6026 = vmatmul.mubr.bf16.gmra.mxu1 %v1716_v14 }
 0x222   : > { %v1670_v24 = vadd.f32 %v7605_v42, %v1669_v1  ;;  %6060 = vmatpush3.bf16.msra.mxu1 %v6452_v8  ;;  %v1708_v32 = vmax.f32 %v1678_v30, 0.0  ;;  %v6459_v1 = vld [vmem:[%s9890_s3 + $0x1b0] sm:$0xff]  }
 0x223   : > { %v6003_v36 = vpop.f32.mrf.mxu0  ;;  %6061 = vmatprep.subr.bf16.mxu1 %v6453_v22 }
 0x224   : > { %v1706_v4 = vmax.f32 %v1670_v24, 0.0  ;;  %v1718_v48 = vpack.c.bf16 %v1708_v32, %v1707_v34  ;;  %v1691_v28 = vadd.f32 %v6003_v36, %v7605_v42 }
 0x225   : > { %v1682_v44 = vpop.f32.mrf.mxu0 }
 0x226   : > { %6062 = vmatpush3.bf16.msra.mxu1 %v6453_v22  ;;  %v1717_v47 = vpack.c.bf16 %v1706_v4, %v1705_v43  ;;  %v1683_v37 = vadd.f32 %v7605_v42, %v1682_v44  ;;  %v1711_v61 = vmax.f32 %v1691_v28, 0.0  ;;  %v6460_v44 = vld [vmem:[%s9890_s3 + $0x1a8] sm:$0xff]  }
 0x227   : > { %v6004_v52 = vpop.f32.mrf.mxu0  ;;  %6063 = vmatprep.subr.bf16.mxu1 %v6454_v38 }
 0x228   : > { %v1694_v51 = vadd.f32 %v6004_v52, %v7605_v42  ;;  %6029 = vmatprep.mubr.bf16.mxu1 %v1717_v47  ;;  %v1709_v59 = vmax.f32 %v1683_v37, 0.0 }
 0x229   : > { %v1685_v54 = vpop.f32.mrf.mxu0  ;;  %6030 = vmatmul.mubr.bf16.gmra.mxu1 %v1718_v48 }
 0x22a   : > { %v1686_v55 = vadd.f32 %v7605_v42, %v1685_v54  ;;  %6064 = vmatpush3.bf16.msra.mxu1 %v6454_v38  ;;  %v1712_v56 = vmax.f32 %v1694_v51, 0.0  ;;  %v6461_v54 = vld [vmem:[%s9890_s3 + $0x1a0] sm:$0xff]  }
 0x22b   : > { %v6041_v57 = vpop.f32.mrf.mxu0  ;;  %6065 = vmatprep.subr.bf16.mxu1 %v6455_v53 }
 0x22c   : > { %v1710_v60 = vmax.f32 %v1686_v55, 0.0  ;;  %v1720_v42 = vpack.c.bf16 %v1712_v56, %v1711_v61  ;;  %v1952_v6 = vadd.f32 %v6041_v57, %v7650_v63 }
 0x22d   : > { %v1943_v62 = vpop.f32.mrf.mxu0 }
 0x22e   : > { %6066 = vmatpush3.bf16.msra.mxu1 %v6455_v53  ;;  %v1719_v0 = vpack.c.bf16 %v1710_v60, %v1709_v59  ;;  %v1944_v5 = vadd.f32 %v7650_v63, %v1943_v62  ;;  %v2008_v20 = vmax.f32 %v1952_v6, 0.0  ;;  %v6462_v62 = vld [vmem:[%s9890_s3 + $0x198] sm:$0xff]  }
 0x22f   : > { %v6042_v2 = vpop.f32.mrf.mxu0  ;;  %6067 = vmatprep.subr.bf16.mxu1 %v6456_v58 }
 0x230   : > { %v1955_v45 = vadd.f32 %v6042_v2, %v7650_v63  ;;  %6033 = vmatprep.mubr.bf16.mxu1 %v1719_v0  ;;  %v2006_v19 = vmax.f32 %v1944_v5, 0.0 }
 0x231   : > { %6034 = vmatmul.mubr.bf16.gmra.mxu1 %v1720_v42  ;;  %v1946_v8 = vpop.f32.mrf.mxu0 }
 0x232   : > { %v1947_v10 = vadd.f32 %v7650_v63, %v1946_v8  ;;  %6068 = vmatpush3.bf16.msra.mxu1 %v6456_v58  ;;  %v2009_v12 = vmax.f32 %v1955_v45, 0.0  ;;  %v6463_v8 = vld [vmem:[%s9890_s3 + $0x190] sm:$0xff]  }
 0x233   : > { %v6045_v15 = vpop.f32.mrf.mxu0  ;;  %6069 = vmatprep.subr.bf16.mxu1 %v6457_v3 }
 0x234   : > { %v2007_v14 = vmax.f32 %v1947_v10, 0.0  ;;  %v2023_v30 = vpack.c.bf16 %v2009_v12, %v2008_v20  ;;  %v1968_v36 = vadd.f32 %v6045_v15, %v7650_v63 }
 0x235   : > { %v1959_v22 = vpop.f32.mrf.mxu0 }
 0x236   : > { %6070 = vmatpush3.bf16.msra.mxu1 %v6457_v3  ;;  %v2022_v25 = vpack.c.bf16 %v2007_v14, %v2006_v19  ;;  %v1960_v24 = vadd.f32 %v7650_v63, %v1959_v22  ;;  %v2012_v52 = vmax.f32 %v1968_v36, 0.0  ;;  %v6464_v22 = vld [vmem:[%s9890_s3 + $0x188] sm:$0xff]  }
 0x237   : > { %v6046_v31 = vpop.f32.mrf.mxu0  ;;  %6105 = vmatprep.subr.bf16.mxu1 %v6458_v18 }
 0x238   : > { %v1971_v32 = vadd.f32 %v6046_v31, %v7650_v63  ;;  %6071 = vmatprep.mubr.bf16.mxu1 %v2022_v25  ;;  %v2010_v47 = vmax.f32 %v1960_v24, 0.0 }
 0x239   : > { %v1962_v38 = vpop.f32.mrf.mxu0  ;;  %6072 = vmatmul.mubr.bf16.vlgmr.msra.gmra.mxu1 %v2023_v30 }
 0x23a   : > { %v1963_v43 = vadd.f32 %v7650_v63, %v1962_v38  ;;  %6106 = vmatpush3.bf16.msra.mxu1 %v6458_v18  ;;  %v2013_v4 = vmax.f32 %v1971_v32, 0.0  ;;  %v7695_v32 = vld [vmem:[%s9889_s2 + $0x6] ss:$0 sm:$0xff] }
 0x23b   : > { %v6049_v34 = vpop.f32.mrf.mxu0  ;;  %6107 = vmatprep.subr.bf16.mxu1 %v6459_v1  ;;  %v6465_v38 = vld [vmem:[%s9890_s3 + $0x180] sm:$0xff]  }
 0x23c   : > { %v2011_v48 = vmax.f32 %v1963_v43, 0.0  ;;  %v2025_v51 = vpack.c.bf16 %v2013_v4, %v2012_v52  ;;  %v1984_v57 = vadd.f32 %v6049_v34, %v7650_v63 }
 0x23d   : > { %v1975_v53 = vpop.f32.mrf.mxu0 }
 0x23e   : > { %6108 = vmatpush3.bf16.msra.mxu1 %v6459_v1  ;;  %v2024_v37 = vpack.c.bf16 %v2011_v48, %v2010_v47  ;;  %v1976_v55 = vadd.f32 %v7650_v63, %v1975_v53  ;;  %v2016_v2 = vmax.f32 %v1984_v57, 0.0  ;;  %v6466_v53 = vld [vmem:[%s9890_s3 + $0x1f8] sm:$0xff]  }
 0x23f   : > { %v6050_v28 = vpop.f32.mrf.mxu0  ;;  %6109 = vmatprep.subr.bf16.mxu1 %v6460_v44 }
 0x240   : > { %v1987_v56 = vadd.f32 %v6050_v28, %v7650_v63  ;;  %6075 = vmatprep.mubr.bf16.mxu1 %v2024_v37  ;;  %v2014_v0 = vmax.f32 %v1976_v55, 0.0 }
 0x241   : > { %v1978_v58 = vpop.f32.mrf.mxu0  ;;  %6076 = vmatmul.mubr.bf16.gmra.mxu1 %v2025_v51 }
 0x242   : > { %v1979_v59 = vadd.f32 %v7650_v63, %v1978_v58  ;;  %6110 = vmatpush3.bf16.msra.mxu1 %v6460_v44  ;;  %v2017_v60 = vmax.f32 %v1987_v56, 0.0  ;;  %v6467_v58 = vld [vmem:[%s9890_s3 + $0x1f0] sm:$0xff]  }
 0x243   : > { %v6053_v61 = vpop.f32.mrf.mxu0  ;;  %6111 = vmatprep.subr.bf16.mxu1 %v6461_v54 }
 0x244   : > { %v2015_v42 = vmax.f32 %v1979_v59, 0.0  ;;  %v2027_v45 = vpack.c.bf16 %v2017_v60, %v2016_v2  ;;  %v2000_v15 = vadd.f32 %v6053_v61, %v7650_v63 }
 0x245   : > { %v1991_v3 = vpop.f32.mrf.mxu0 }
 0x246   : > { %v2026_v5 = vpack.c.bf16 %v2015_v42, %v2014_v0  ;;  %6112 = vmatpush3.bf16.msra.mxu1 %v6461_v54  ;;  %v1992_v10 = vadd.f32 %v7650_v63, %v1991_v3  ;;  %v2020_v31 = vmax.f32 %v2000_v15, 0.0  ;;  %v6468_v3 = vld [vmem:[%s9890_s3 + $0x1e8] sm:$0xff]  }
 0x247   : > { %v6054_v6 = vpop.f32.mrf.mxu0  ;;  %6113 = vmatprep.subr.bf16.mxu1 %v6462_v62 }
 0x248   : > { %v2003_v12 = vadd.f32 %v6054_v6, %v7650_v63  ;;  %6079 = vmatprep.mubr.bf16.mxu1 %v2026_v5  ;;  %v2018_v25 = vmax.f32 %v1992_v10, 0.0 }
 0x249   : > { %v1994_v18 = vpop.f32.mrf.mxu0  ;;  %6080 = vmatmul.mubr.bf16.gmra.mxu1 %v2027_v45 }
 0x24a   : > { %v1995_v19 = vadd.f32 %v7650_v63, %v1994_v18  ;;  %6114 = vmatpush3.bf16.msra.mxu1 %v6462_v62  ;;  %v2021_v14 = vmax.f32 %v2003_v12, 0.0  ;;  %v6469_v18 = vld [vmem:[%s9890_s3 + $0x1e0] sm:$0xff]  }
 0x24b   : > { %v6091_v20 = vpop.f32.mrf.mxu0  ;;  %6115 = vmatprep.subr.bf16.mxu1 %v6463_v8 }
 0x24c   : > { %v2019_v30 = vmax.f32 %v1995_v19, 0.0  ;;  %v2029_v63 = vpack.c.bf16 %v2021_v14, %v2020_v31  ;;  %v2261_v34 = vadd.f32 %v6091_v20, %v7695_v32 }
 0x24d   : > { %v2252_v1 = vpop.f32.mrf.mxu0 }
 0x24e   : > { %v2028_v24 = vpack.c.bf16 %v2019_v30, %v2018_v25  ;;  %6116 = vmatpush3.bf16.msra.mxu1 %v6463_v8  ;;  %v2253_v43 = vadd.f32 %v7695_v32, %v2252_v1  ;;  %v2317_v28 = vmax.f32 %v2261_v34, 0.0  ;;  %v6470_v1 = vld [vmem:[%s9890_s3 + $0x1d8] sm:$0xff]  }
 0x24f   : > { %v6092_v36 = vpop.f32.mrf.mxu0  ;;  %6117 = vmatprep.subr.bf16.mxu1 %v6464_v22 }
 0x250   : > { %v2264_v4 = vadd.f32 %v6092_v36, %v7695_v32  ;;  %6083 = vmatprep.mubr.bf16.mxu1 %v2028_v24  ;;  %v2315_v37 = vmax.f32 %v2253_v43, 0.0 }
 0x251   : > { %6084 = vmatmul.mubr.bf16.gmra.mxu1 %v2029_v63  ;;  %v2255_v44 = vpop.f32.mrf.mxu0 }
 0x252   : > { %v2256_v47 = vadd.f32 %v7695_v32, %v2255_v44  ;;  %6118 = vmatpush3.bf16.msra.mxu1 %v6464_v22  ;;  %v2318_v48 = vmax.f32 %v2264_v4, 0.0  ;;  %v6471_v44 = vld [vmem:[%s9890_s3 + $0x1d0] sm:$0xff]  }
 0x253   : > { %v6095_v52 = vpop.f32.mrf.mxu0  ;;  %6119 = vmatprep.subr.bf16.mxu1 %v6465_v38 }
 0x254   : > { %v2316_v51 = vmax.f32 %v2256_v47, 0.0  ;;  %v2332_v56 = vpack.c.bf16 %v2318_v48, %v2317_v28  ;;  %v2277_v61 = vadd.f32 %v6095_v52, %v7695_v32 }
 0x255   : > { %v2268_v54 = vpop.f32.mrf.mxu0 }
 0x256   : > { %v2331_v55 = vpack.c.bf16 %v2316_v51, %v2315_v37  ;;  %6120 = vmatpush3.bf16.msra.mxu1 %v6465_v38  ;;  %v2269_v59 = vadd.f32 %v7695_v32, %v2268_v54  ;;  %v2321_v6 = vmax.f32 %v2277_v61, 0.0  ;;  %v6472_v54 = vld [vmem:[%s9890_s3 + $0x1c8] sm:$0xff]  }
 0x257   : > { %v6096_v57 = vpop.f32.mrf.mxu0  ;;  %6155 = vmatprep.subr.bf16.mxu1 %v6466_v53 }
 0x258   : > { %v2280_v60 = vadd.f32 %v6096_v57, %v7695_v32  ;;  %6121 = vmatprep.mubr.bf16.mxu1 %v2331_v55  ;;  %v2319_v5 = vmax.f32 %v2269_v59, 0.0 }
 0x259   : > { %v2271_v62 = vpop.f32.mrf.mxu0  ;;  %6122 = vmatmul.mubr.bf16.vlgmr.msra.gmra.mxu1 %v2332_v56 }
 0x25a   : > { %v2272_v0 = vadd.f32 %v7695_v32, %v2271_v62  ;;  %6156 = vmatpush3.bf16.msra.mxu1 %v6466_v53  ;;  %v2322_v42 = vmax.f32 %v2280_v60, 0.0  ;;  %v7740_v60 = vld [vmem:[%s9889_s2 + $0x7] ss:$0 sm:$0xff] }
 0x25b   : > { %v6099_v2 = vpop.f32.mrf.mxu0  ;;  %6157 = vmatprep.subr.bf16.mxu1 %v6467_v58  ;;  %v6473_v62 = vld [vmem:[%s9890_s3 + $0x1c0] sm:$0xff]  }
 0x25c   : > { %v2320_v45 = vmax.f32 %v2272_v0, 0.0  ;;  %v2334_v12 = vpack.c.bf16 %v2322_v42, %v2321_v6  ;;  %v2293_v20 = vadd.f32 %v6099_v2, %v7695_v32 }
 0x25d   : > { %v2284_v8 = vpop.f32.mrf.mxu0 }
 0x25e   : > { %v2333_v10 = vpack.c.bf16 %v2320_v45, %v2319_v5  ;;  %6158 = vmatpush3.bf16.msra.mxu1 %v6467_v58  ;;  %v2285_v19 = vadd.f32 %v7695_v32, %v2284_v8  ;;  %v2325_v36 = vmax.f32 %v2293_v20, 0.0 }
 0x25f   : > { %v6100_v15 = vpop.f32.mrf.mxu0  ;;  %6159 = vmatprep.subr.bf16.mxu1 %v6468_v3 }
 0x260   : > { %v2296_v14 = vadd.f32 %v6100_v15, %v7695_v32  ;;  %6125 = vmatprep.mubr.bf16.mxu1 %v2333_v10  ;;  %v2323_v24 = vmax.f32 %v2285_v19, 0.0 }
 0x261   : > { %v2287_v22 = vpop.f32.mrf.mxu0  ;;  %6126 = vmatmul.mubr.bf16.gmra.mxu1 %v2334_v12 }
 0x262   : > { %v2288_v25 = vadd.f32 %v7695_v32, %v2287_v22  ;;  %6160 = vmatpush3.bf16.msra.mxu1 %v6468_v3  ;;  %v2326_v30 = vmax.f32 %v2296_v14, 0.0 }
 0x263   : > { %v6103_v31 = vpop.f32.mrf.mxu0  ;;  %6161 = vmatprep.subr.bf16.mxu1 %v6469_v18 }
 0x264   : > { %v2324_v63 = vmax.f32 %v2288_v25, 0.0  ;;  %v2336_v4 = vpack.c.bf16 %v2326_v30, %v2325_v36  ;;  %v2309_v52 = vadd.f32 %v6103_v31, %v7695_v32 }
 0x265   : > { %v2300_v38 = vpop.f32.mrf.mxu0 }
 0x266   : > { %v2335_v43 = vpack.c.bf16 %v2324_v63, %v2323_v24  ;;  %6162 = vmatpush3.bf16.msra.mxu1 %v6469_v18  ;;  %v2301_v47 = vadd.f32 %v7695_v32, %v2300_v38  ;;  %v2329_v57 = vmax.f32 %v2309_v52, 0.0 }
 0x267   : > { %v6104_v34 = vpop.f32.mrf.mxu0  ;;  %6163 = vmatprep.subr.bf16.mxu1 %v6470_v1 }
 0x268   : > { %v2312_v48 = vadd.f32 %v6104_v34, %v7695_v32  ;;  %6129 = vmatprep.mubr.bf16.mxu1 %v2335_v43  ;;  %v2327_v55 = vmax.f32 %v2301_v47, 0.0 }
 0x269   : > { %v2303_v53 = vpop.f32.mrf.mxu0  ;;  %6130 = vmatmul.mubr.bf16.gmra.mxu1 %v2336_v4 }
 0x26a   : > { %v2304_v37 = vadd.f32 %v7695_v32, %v2303_v53  ;;  %6164 = vmatpush3.bf16.msra.mxu1 %v6470_v1  ;;  %v2330_v51 = vmax.f32 %v2312_v48, 0.0 }
 0x26b   : > { %v6141_v28 = vpop.f32.mrf.mxu0  ;;  %6165 = vmatprep.subr.bf16.mxu1 %v6471_v44 }
 0x26c   : > { %v2328_v56 = vmax.f32 %v2304_v37, 0.0  ;;  %v2338_v32 = vpack.c.bf16 %v2330_v51, %v2329_v57  ;;  %v2570_v2 = vadd.f32 %v6141_v28, %v7740_v60 }
 0x26d   : > { %v2561_v58 = vpop.f32.mrf.mxu0 }
 0x26e   : > { %v2337_v59 = vpack.c.bf16 %v2328_v56, %v2327_v55  ;;  %6166 = vmatpush3.bf16.msra.mxu1 %v6471_v44  ;;  %v2562_v0 = vadd.f32 %v7740_v60, %v2561_v58  ;;  %v2626_v12 = vmax.f32 %v2570_v2, 0.0 }
 0x26f   : > { %v6142_v61 = vpop.f32.mrf.mxu0  ;;  %6167 = vmatprep.subr.bf16.mxu1 %v6472_v54 }
 0x270   : > { %v2573_v42 = vadd.f32 %v6142_v61, %v7740_v60  ;;  %6133 = vmatprep.mubr.bf16.mxu1 %v2337_v59  ;;  %v2624_v8 = vmax.f32 %v2562_v0, 0.0 }
 0x271   : > { %6134 = vmatmul.mubr.bf16.gmra.mxu1 %v2338_v32  ;;  %v2564_v3 = vpop.f32.mrf.mxu0 }
 0x272   : > { %v2565_v5 = vadd.f32 %v7740_v60, %v2564_v3  ;;  %6168 = vmatpush3.bf16.msra.mxu1 %v6472_v54  ;;  %v2627_v45 = vmax.f32 %v2573_v42, 0.0 }
 0x273   : > { %v6145_v6 = vpop.f32.mrf.mxu0  ;;  %6169 = vmatprep.subr.bf16.mxu1 %v6473_v62 }
 0x274   : > { %v2625_v10 = vmax.f32 %v2565_v5, 0.0  ;;  %v2641_v19 = vpack.c.bf16 %v2627_v45, %v2626_v12  ;;  %v2586_v14 = vadd.f32 %v6145_v6, %v7740_v60  ;;  %v7761_v12 = vpop.f32.mrf.mxu1 }
 0x275   : > { %v2577_v15 = vpop.f32.mrf.mxu0 }
 0x276   : > { %v2640_v18 = vpack.c.bf16 %v2625_v10, %v2624_v8  ;;  %6170 = vmatpush3.bf16.msra.mxu1 %v6473_v62  ;;  %v2578_v22 = vadd.f32 %v7740_v60, %v2577_v15  ;;  %v2630_v1 = vmax.f32 %v2586_v14, 0.0 }
 0x277   : > { %v6146_v20 = vpop.f32.mrf.mxu0 }
 0x278   : > { %v2589_v25 = vadd.f32 %v6146_v20, %v7740_v60  ;;  %6171 = vmatprep.mubr.bf16.mxu1 %v2640_v18  ;;  %v2628_v36 = vmax.f32 %v2578_v22, 0.0 }
 0x279   : > { %v2580_v30 = vpop.f32.mrf.mxu0  ;;  %6172 = vmatmul.mubr.bf16.vlgmr.msra.gmra.mxu1 %v2641_v19 }
 0x27a   : > { %v2581_v31 = vadd.f32 %v7740_v60, %v2580_v30  ;;  %v2631_v24 = vmax.f32 %v2589_v25, 0.0 }
 0x27b   : > { %v6149_v63 = vpop.f32.mrf.mxu0 }
 0x27c   : > { %v2629_v38 = vmax.f32 %v2581_v31, 0.0  ;;  %v2602_v43 = vadd.f32 %v6149_v63, %v7740_v60  ;;  %v2643_v47 = vpack.c.bf16 %v2631_v24, %v2630_v1 }
 0x27d   : > { %v2593_v4 = vpop.f32.mrf.mxu0 }
 0x27e   : > { %v2642_v34 = vpack.c.bf16 %v2629_v38, %v2628_v36  ;;  %v2594_v44 = vadd.f32 %v7740_v60, %v2593_v4  ;;  %v2634_v53 = vmax.f32 %v2602_v43, 0.0 }
 0x27f   : > { %v6150_v48 = vpop.f32.mrf.mxu0 }
 0x280   : > { %v2605_v52 = vadd.f32 %v6150_v48, %v7740_v60  ;;  %6175 = vmatprep.mubr.bf16.mxu1 %v2642_v34  ;;  %v2632_v51 = vmax.f32 %v2594_v44, 0.0 }
 0x281   : > { %v2596_v37 = vpop.f32.mrf.mxu0  ;;  %6176 = vmatmul.mubr.bf16.gmra.mxu1 %v2643_v47 }
 0x282   : > { %v2635_v28 = vmax.f32 %v2605_v52, 0.0  ;;  %v2597_v54 = vadd.f32 %v7740_v60, %v2596_v37 }
 0x283   : > { %v6153_v55 = vpop.f32.mrf.mxu0 }
 0x284   : > { %v2633_v56 = vmax.f32 %v2597_v54, 0.0  ;;  %v2645_v57 = vpack.c.bf16 %v2635_v28, %v2634_v53  ;;  %v2618_v58 = vadd.f32 %v6153_v55, %v7740_v60 }
 0x285   : > { %v2609_v59 = vpop.f32.mrf.mxu0 }
 0x286   : > { %v2644_v32 = vpack.c.bf16 %v2633_v56, %v2632_v51  ;;  %v2610_v61 = vadd.f32 %v7740_v60, %v2609_v59  ;;  %v2638_v42 = vmax.f32 %v2618_v58, 0.0 }
 0x287   : > { %v6154_v62 = vpop.f32.mrf.mxu0 }
 0x288   : > { %v2621_v0 = vadd.f32 %v6154_v62, %v7740_v60  ;;  %6179 = vmatprep.mubr.bf16.mxu1 %v2644_v32  ;;  %v2636_v3 = vmax.f32 %v2610_v61, 0.0 }
 0x289   : > { %v2612_v2 = vpop.f32.mrf.mxu0  ;;  %6180 = vmatmul.mubr.bf16.gmra.mxu1 %v2645_v57 }
 0x28a   : > { %v2639_v5 = vmax.f32 %v2621_v0, 0.0  ;;  %v2613_v45 = vadd.f32 %v7740_v60, %v2612_v2 }
 0x28c   : > { %v2637_v6 = vmax.f32 %v2613_v45, 0.0  ;;  %v2647_v8 = vpack.c.bf16 %v2639_v5, %v2638_v42 }
 0x28e   : > { %v2646_v10 = vpack.c.bf16 %v2637_v6, %v2636_v3 }
 0x290   : > { %6183 = vmatprep.mubr.bf16.mxu1 %v2646_v10 }
 0x291   : > { %6184 = vmatmul.mubr.bf16.gmra.mxu1 %v2647_v8 }
 0x299   : > { %v5923_v15 = vpop.f32.mrf.mxu1 }
 0x29a   : > { %v1266_v18 = vadd.f32 %v5923_v15, %v7467_v7  ;;  %v2872_v7 = vld [vmem:[%s9892_s5] sm:$0xf] }
 0x29b   : > { %v1201_v19 = vpop.f32.mrf.mxu1  ;;  %6359 = vmatprep.subr.msk.bf16.mxu0 %vm392_vm0, %v2872_v7  ;;  %6360 = vmatprep.subr.msk.bf16.mxu1 %vm392_vm0, %v2872_v7 }
 0x29c   : > { %v1264_v14 = vadd.f32 %v1201_v19, %v7471_v11 }
 0x29d   : > { %v5924_v20 = vpop.f32.mrf.mxu1 }
 0x29e   : > { %v1267_v22 = vadd.f32 %v5924_v20, %v7473_v16 }
 0x29f   : > { %v7766_v25 = vpop.f32.mrf.mxu1 }
 0x2a1   : > { %v5927_v30 = vpop.f32.mrf.mxu1 }
 0x2a2   : > { %v1270_v60 = vadd.f32 %v5927_v30, %v7481_v13  ;;  %v2905_v13 = vsel %vm392_vm0, %v2872_v7, 0 }
 0x2a3   : > { %v1217_v31 = vpop.f32.mrf.mxu1  ;;  %6188 = vmatpush3.bf16.msra.mxu0 %v2905_v13  ;;  %6350 = vmatpush3.bf16.msra.mxu1 %v2905_v13 }
 0x2a4   : > { %v1268_v1 = vadd.f32 %v1217_v31, %v7485_v21 }
 0x2a5   : > { %v5928_v24 = vpop.f32.mrf.mxu1 }
 0x2a6   : > { %v1271_v63 = vadd.f32 %v5928_v24, %v7487_v26  ;;  %v7804_v24 = vld [vmem:[%s9894_s7] sm:$0xf] }
 0x2a7   : > { %v7771_v36 = vpop.f32.mrf.mxu1  ;;  %10081 = vst [vmem:[#allocation5_spill] sm:$0xff] %v7804_v24  ;;  %6361 = vmatprep.subr.msk.bf16.mxu1 %vm392_vm0, %v7804_v24 }
 0x2a9   : > { %v5931_v11 = vpop.f32.mrf.mxu1 }
 0x2aa   : > { %v1274_v16 = vadd.f32 %v5931_v11, %v7495_v23 }
 0x2ab   : > { %v1233_v38 = vpop.f32.mrf.mxu1 }
 0x2ac   : > { %v1272_v21 = vadd.f32 %v1233_v38, %v7499_v35 }
 0x2ad   : > { %v5932_v26 = vpop.f32.mrf.mxu1 }
 0x2ae   : > { %v1275_v43 = vadd.f32 %v5932_v26, %v7501_v39 }
 0x2af   : > { %v7782_v4 = vpop.f32.mrf.mxu1 }
 0x2b1   : > { %v5935_v34 = vpop.f32.mrf.mxu1 }
 0x2b2   : > { %v1278_v44 = vadd.f32 %v5935_v34, %v7509_v33 }
 0x2b3   : > { %v1249_v47 = vpop.f32.mrf.mxu1 }
 0x2b4   : > { %v1276_v48 = vadd.f32 %v1249_v47, %v7511_v46 }
 0x2b5   : > { %v5936_v52 = vpop.f32.mrf.mxu1 }
 0x2b6   : > { %v1279_v23 = vadd.f32 %v5936_v52, %v7513_v49 }
 0x2b7   : > { %v7787_v53 = vpop.f32.mrf.mxu1 }
 0x2b9   : > { %v5973_v37 = vpop.f32.mrf.mxu1 }
 0x2ba   : > { %v1575_v51 = vadd.f32 %v5973_v37, %v1266_v18 }
 0x2bb   : > { %v1510_v28 = vpop.f32.mrf.mxu1 }
 0x2bc   : > { %v1573_v35 = vadd.f32 %v1510_v28, %v1264_v14 }
 0x2bd   : > { %v5974_v54 = vpop.f32.mrf.mxu1 }
 0x2be   : > { %v1576_v55 = vadd.f32 %v5974_v54, %v1267_v22 }
 0x2bf   : > { %v7789_v39 = vpop.f32.mrf.mxu1 }
 0x2c1   : > { %v5977_v56 = vpop.f32.mrf.mxu1 }
 0x2c2   : > { %v1579_v57 = vadd.f32 %v5977_v56, %v1270_v60 }
 0x2c3   : > { %v1526_v58 = vpop.f32.mrf.mxu1 }
 0x2c4   : > { %v1577_v33 = vadd.f32 %v1526_v58, %v1268_v1 }
 0x2c5   : > { %v5978_v59 = vpop.f32.mrf.mxu1 }
 0x2c6   : > { %v1580_v32 = vadd.f32 %v5978_v59, %v1271_v63  ;;  %v7809_v63 = vld [vmem:[%s9894_s7 + $0x4] sm:$0xf] }
 0x2c7   : > { %v7791_v46 = vpop.f32.mrf.mxu1  ;;  %6362 = vmatprep.subr.msk.bf16.mxu0 %vm392_vm0, %v7809_v63 }
 0x2c9   : > { %v5981_v61 = vpop.f32.mrf.mxu1 }
 0x2ca   : > { %v1583_v49 = vadd.f32 %v5981_v61, %v1274_v16 }
 0x2cb   : > { %v1542_v62 = vpop.f32.mrf.mxu1 }
 0x2cc   : > { %v1581_v0 = vadd.f32 %v1542_v62, %v1272_v21 }
 0x2cd   : > { %v5982_v42 = vpop.f32.mrf.mxu1 }
 0x2ce   : > { %v1584_v2 = vadd.f32 %v5982_v42, %v1275_v43 }
 0x2cf   : > { %v7793_v3 = vpop.f32.mrf.mxu1 }
 0x2d1   : > { %v5985_v5 = vpop.f32.mrf.mxu1 }
 0x2d2   : > { %v1587_v45 = vadd.f32 %v5985_v5, %v1278_v44 }
 0x2d3   : > { %v1558_v6 = vpop.f32.mrf.mxu1 }
 0x2d4   : > { %v1585_v8 = vadd.f32 %v1558_v6, %v1276_v48 }
 0x2d5   : > { %v5986_v10 = vpop.f32.mrf.mxu1 }
 0x2d6   : > { %v1588_v15 = vadd.f32 %v5986_v10, %v1279_v23 }
 0x2d7   : > { %v7795_v18 = vpop.f32.mrf.mxu1 }
 0x2d9   : > { %v6023_v19 = vpop.f32.mrf.mxu1 }
 0x2da   : > { %v1884_v14 = vadd.f32 %v6023_v19, %v1575_v51 }
 0x2db   : > { %v1819_v20 = vpop.f32.mrf.mxu1 }
 0x2dc   : > { %v1882_v22 = vadd.f32 %v1819_v20, %v1573_v35 }
 0x2dd   : > { %v6024_v30 = vpop.f32.mrf.mxu1 }
 0x2de   : > { %v7797_v60 = vadd.f32 %v6024_v30, %v1576_v55 }
 0x2df   : > { %v7799_v31 = vpop.f32.mrf.mxu1 }
 0x2e1   : > { %v6027_v1 = vpop.f32.mrf.mxu1 }
 0x2e2   : > { %v1888_v7 = vadd.f32 %v6027_v1, %v1579_v57 }
 0x2e3   : > { %v1835_v11 = vpop.f32.mrf.mxu1 }
 0x2e4   : > { %v1886_v16 = vadd.f32 %v1835_v11, %v1577_v33 }
 0x2e5   : > { %v6028_v13 = vpop.f32.mrf.mxu1 }
 0x2e6   : > { %v7815_v38 = vadd.f32 %v6028_v13, %v1580_v32 }
 0x2e7   : > { %v7817_v21 = vpop.f32.mrf.mxu1 }
 0x2e9   : > { %v6031_v26 = vpop.f32.mrf.mxu1 }
 0x2ea   : > { %v1892_v43 = vadd.f32 %v6031_v26, %v1583_v49 }
 0x2eb   : > { %v1851_v34 = vpop.f32.mrf.mxu1 }
 0x2ec   : > { %v1890_v44 = vadd.f32 %v1851_v34, %v1581_v0 }
 0x2ed   : > { %v6032_v47 = vpop.f32.mrf.mxu1 }
 0x2ee   : > { %v7819_v48 = vadd.f32 %v6032_v47, %v1584_v2 }
 0x2ef   : > { %v7821_v52 = vpop.f32.mrf.mxu1 }
 0x2f1   : > { %v6035_v23 = vpop.f32.mrf.mxu1 }
 0x2f2   : > { %v1896_v37 = vadd.f32 %v6035_v23, %v1587_v45 }
 0x2f3   : > { %v1867_v51 = vpop.f32.mrf.mxu1 }
 0x2f4   : > { %v1894_v28 = vadd.f32 %v1867_v51, %v1585_v8 }
 0x2f5   : > { %v6036_v35 = vpop.f32.mrf.mxu1 }
 0x2f6   : > { %v7823_v54 = vadd.f32 %v6036_v35, %v1588_v15 }
 0x2f7   : > { %v7825_v55 = vpop.f32.mrf.mxu1 }
 0x2f9   : > { %v6073_v56 = vpop.f32.mrf.mxu1 }
 0x2fa   : > { %v2193_v57 = vadd.f32 %v6073_v56, %v1884_v14  ;;  %v912_v56 = vadd.f32 %v7477_v9, %v7475_v17  ;;  %v7870_v17 = vld [vmem:[%s9891_s4] ss:$0 sm:$0xff] }
 0x2fb   : > { %v2128_v58 = vpop.f32.mrf.mxu1 }
 0x2fc   : > { %v2191_v33 = vadd.f32 %v2128_v58, %v1882_v22 }
 0x2fd   : > { %v6074_v59 = vpop.f32.mrf.mxu1 }
 0x2fe   : > { %v2194_v24 = vadd.f32 %v6074_v59, %v7797_v60 }
 0x2ff   : > { %v2131_v32 = vpop.f32.mrf.mxu1 }
 0x301   : > { %v6077_v61 = vpop.f32.mrf.mxu1 }
 0x302   : > { %v2197_v49 = vadd.f32 %v6077_v61, %v1888_v7  ;;  %v1265_v61 = vadd.f32 %v7766_v25, %v912_v56 }
 0x303   : > { %v2144_v62 = vpop.f32.mrf.mxu1 }
 0x304   : > { %v2195_v0 = vadd.f32 %v2144_v62, %v1886_v16 }
 0x305   : > { %v6078_v42 = vpop.f32.mrf.mxu1 }
 0x307   : > { %v7827_v2 = vpop.f32.mrf.mxu1 }
 0x309   : > { %v6081_v5 = vpop.f32.mrf.mxu1 }
 0x30a   : > { %v7829_v45 = vadd.f32 %v6081_v5, %v1892_v43  ;;  %v1574_v5 = vadd.f32 %v7789_v39, %v1265_v61 }
 0x30b   : > { %v2160_v6 = vpop.f32.mrf.mxu1 }
 0x30c   : > { %v7831_v8 = vadd.f32 %v2160_v6, %v1890_v44 }
 0x30d   : > { %v7833_v10 = vpop.f32.mrf.mxu1 }
 0x30f   : > { %v7835_v15 = vpop.f32.mrf.mxu1 }
 0x311   : > { %v6085_v19 = vpop.f32.mrf.mxu1 }
 0x312   : > { %v7837_v14 = vadd.f32 %v6085_v19, %v1896_v37 }
 0x313   : > { %v2176_v20 = vpop.f32.mrf.mxu1 }
 0x314   : > { %v7839_v22 = vadd.f32 %v2176_v20, %v1894_v28  ;;  %v1883_v20 = vadd.f32 %v7799_v31, %v1574_v5 }
 0x315   : > { %v7841_v30 = vpop.f32.mrf.mxu1 }
 0x316   : > { %10082 = vst [vmem:[#allocation6_spill] sm:$0xff] %v7839_v22  ;;  %v2192_v25 = vadd.f32 %v2131_v32, %v1883_v20 }
 0x317   : > { %v7843_v1 = vpop.f32.mrf.mxu1 }
 0x318   : > { %10083 = vst [vmem:[#allocation7_spill] sm:$0xff] %v7843_v1 }
 0x319   : > { %v6123_v7 = vpop.f32.mrf.mxu1 }
 0x31a   : > { %v2502_v6 = vadd.f32 %v6123_v7, %v2193_v57 }
 0x31b   : > { %v2437_v11 = vpop.f32.mrf.mxu1 }
 0x31c   : > { %v2500_v1 = vadd.f32 %v2437_v11, %v2191_v33 }
 0x31d   : > { %v6124_v16 = vpop.f32.mrf.mxu1 }
 0x31e   : > { %v2503_v56 = vadd.f32 %v6124_v16, %v2194_v24  ;;  %v2198_v24 = vadd.f32 %v6078_v42, %v7815_v38 }
 0x31f   : > { %v2440_v13 = vpop.f32.mrf.mxu1 }
 0x320   : > { %v2501_v31 = vadd.f32 %v2440_v13, %v2192_v25 }
 0x321   : > { %v6127_v26 = vpop.f32.mrf.mxu1 }
 0x323   : > { %v2453_v43 = vpop.f32.mrf.mxu1 }
 0x325   : > { %v6128_v34 = vpop.f32.mrf.mxu1 }
 0x327   : > { %v2456_v44 = vpop.f32.mrf.mxu1 }
 0x329   : > { %v6131_v47 = vpop.f32.mrf.mxu1 }
 0x32b   : > { %v7845_v23 = vpop.f32.mrf.mxu1 }
 0x32d   : > { %v7847_v37 = vpop.f32.mrf.mxu1 }
 0x32f   : > { %v7849_v51 = vpop.f32.mrf.mxu1 }
 0x331   : > { %v7851_v28 = vpop.f32.mrf.mxu1 }
 0x333   : > { %v7853_v35 = vpop.f32.mrf.mxu1 }
 0x334   : > { %10084 = vst [vmem:[#allocation8_spill] sm:$0xff] %v7853_v35  ;;  %v928_v35 = vadd.f32 %v7491_v29, %v7489_v27  ;;  %v2506_v27 = vadd.f32 %v6127_v26, %v2197_v49  ;;  %v2507_v26 = vadd.f32 %v6128_v34, %v2198_v24 }
 0x335   : > { %v7857_v58 = vpop.f32.mrf.mxu1 }
 0x336   : > { %v1269_v57 = vadd.f32 %v7771_v36, %v928_v35 }
 0x337   : > { %v7860_v62 = vpop.f32.mrf.mxu1 }
 0x338   : > { %v1578_v59 = vadd.f32 %v7791_v46, %v1269_v57  ;;  %v944_v46 = vadd.f32 %v7505_v41, %v7503_v40  ;;  %v3329_v40 = vsel %vm392_vm0, %v7809_v63, 0  ;;  %v2510_v41 = vadd.f32 %v6131_v47, %v7829_v45 }
 0x339   : > { %v6173_v19 = vpop.f32.mrf.mxu1 }
 0x33a   : > { %v2811_v22 = vadd.f32 %v6173_v19, %v2502_v6  ;;  %v1887_v32 = vadd.f32 %v7817_v21, %v1578_v59  ;;  %v1273_v38 = vadd.f32 %v7782_v4, %v944_v46 }
 0x33b   : > { %v2746_v9 = vpop.f32.mrf.mxu1 }
 0x33c   : > { %v2809_v39 = vadd.f32 %v2746_v9, %v2500_v1  ;;  %v2834_v60 = vadd.f32 %v7870_v17, %v2811_v22  ;;  %v2504_v1 = vadd.f32 %v2453_v43, %v2195_v0  ;;  %v2196_v49 = vadd.f32 %v7827_v2, %v1887_v32 }
 0x33d   : > { %v6174_v7 = vpop.f32.mrf.mxu1 }
 0x33e   : > { %v2812_v33 = vadd.f32 %v6174_v7, %v2503_v56  ;;  %v2832_v29 = vadd.f32 %v7870_v17, %v2809_v39  ;;  %v2850_v16 = vmax.f32 %v2834_v60, 0.0  ;;  %v2505_v42 = vadd.f32 %v2456_v44, %v2196_v49  ;;  %v10087_v49 = vld [vmem:[#allocation7_spill] sm:$0xff] }
 0x33f   : > { %v2749_v11 = vpop.f32.mrf.mxu1  ;;  %v1582_v39 = vadd.f32 %v7793_v3, %v1273_v38  ;;  %v2202_v44 = vadd.f32 %v7833_v10, %v7819_v48  ;;  %v2508_v3 = vadd.f32 %v7845_v23, %v7831_v8 }
 0x340   : > { %v2835_v61 = vadd.f32 %v7870_v17, %v2812_v33  ;;  %v2810_v5 = vadd.f32 %v2749_v11, %v2501_v31  ;;  %v2848_v19 = vmax.f32 %v2832_v29, 0.0  ;;  %v960_v33 = vadd.f32 %v7761_v12, %v7515_v50 }
 0x341   : > { %v6177_v36 = vpop.f32.mrf.mxu1  ;;  %v1891_v4 = vadd.f32 %v7821_v52, %v1582_v39  ;;  %v2511_v59 = vadd.f32 %v7847_v37, %v2202_v44  ;;  %v3588_v44 = vld [vmem:[%s9894_s7 + $0x8] sm:$0xf] }
 0x342   : > { %v2851_v13 = vmax.f32 %v2835_v61, 0.0  ;;  %v2833_v22 = vadd.f32 %v7870_v17, %v2810_v5  ;;  %v2815_v35 = vadd.f32 %v6177_v36, %v2506_v27  ;;  %v1277_v27 = vadd.f32 %v7787_v53, %v960_v33 }
 0x343   : > { %v2762_v6 = vpop.f32.mrf.mxu1  ;;  %v2200_v52 = vadd.f32 %v7835_v15, %v1891_v4  ;;  %v2514_v15 = vadd.f32 %v7851_v28, %v7837_v14 }
 0x344   : > { %v2865_v20 = vpack.c.bf16 %v2851_v13, %v2850_v16  ;;  %v2849_v9 = vmax.f32 %v2833_v22, 0.0  ;;  %v2813_v21 = vadd.f32 %v2762_v6, %v2504_v1  ;;  %v2838_v25 = vadd.f32 %v7870_v17, %v2815_v35  ;;  %v10085_v16 = vld [vmem:[#allocation6_spill] sm:$0xff]  ;;  %v10086_v13 = vld [vmem:[#allocation8_spill] sm:$0xff] }
 0x345   : > { %v6178_v0 = vpop.f32.mrf.mxu1  ;;  %v2509_v61 = vadd.f32 %v7849_v51, %v2200_v52  ;;  %v1586_v50 = vadd.f32 %v7795_v18, %v1277_v27  ;;  %v2206_v51 = vadd.f32 %v7841_v30, %v7823_v54  ;;  %v2512_v22 = vadd.f32 %v10086_v13, %v10085_v16 }
 0x346   : > { %v2864_v43 = vpack.c.bf16 %v2849_v9, %v2848_v19  ;;  %v2816_v56 = vadd.f32 %v6178_v0, %v2507_v26  ;;  %v2836_v2 = vadd.f32 %v7870_v17, %v2813_v21  ;;  %v2854_v63 = vmax.f32 %v2838_v25, 0.0  ;;  %v10088_v25 = vld [vmem:[#allocation5_spill] sm:$0xff] }
 0x347   : > { %v2765_v57 = vpop.f32.mrf.mxu1  ;;  %v1895_v53 = vadd.f32 %v7825_v55, %v1586_v50  ;;  %v2515_v6 = vadd.f32 %v7857_v58, %v2206_v51 }
 0x348   : > { %v2839_v34 = vadd.f32 %v7870_v17, %v2816_v56  ;;  %v2814_v7 = vadd.f32 %v2765_v57, %v2505_v42  ;;  %6189 = vmatprep.mubr.msk.bf16.mxu0 %vm367_vm1, %v2864_v43  ;;  %v2852_v10 = vmax.f32 %v2836_v2, 0.0  ;;  %v3061_v56 = vsel %vm392_vm0, %v10088_v25, 0 }
 0x349   : > { %v6181_v31 = vpop.f32.mrf.mxu1  ;;  %6190 = vmatmul.mubr.msk.bf16.vlgmr.msra.gmra.mxu0 %vm367_vm1, %v2865_v20  ;;  %v2204_v26 = vadd.f32 %v10087_v49, %v1895_v53 }
 0x34a   : > { %v2855_v45 = vmax.f32 %v2839_v34, 0.0  ;;  %v2837_v47 = vadd.f32 %v7870_v17, %v2814_v7  ;;  %v2819_v60 = vadd.f32 %v6181_v31, %v2510_v41  ;;  %6224 = vmatpush3.bf16.msra.mxu0 %v3329_v40 }
 0x34b   : > { %v2778_v48 = vpop.f32.mrf.mxu1  ;;  %v2513_v21 = vadd.f32 %v7860_v62, %v2204_v26 }
 0x34c   : > { %v2867_v11 = vpack.c.bf16 %v2855_v45, %v2854_v63  ;;  %v2853_v8 = vmax.f32 %v2837_v47, 0.0  ;;  %v2817_v23 = vadd.f32 %v2778_v48, %v2508_v3  ;;  %v2842_v32 = vadd.f32 %v7870_v17, %v2819_v60  ;;  %v3856_v3 = vld [vmem:[%s9894_s7 + $0xc] sm:$0xf]  ;;  %v7943_v63 = vld [vmem:[%s9893_s6] ss:$0 sm:$0xff] }
 0x34d   : > { %v6182_v29 = vpop.f32.mrf.mxu1  ;;  %6364 = vmatprep.subr.msk.bf16.mxu0 %vm392_vm0, %v3856_v3 }
 0x34e   : > { %v2866_v5 = vpack.c.bf16 %v2853_v8, %v2852_v10  ;;  %v2820_v24 = vadd.f32 %v6182_v29, %v2511_v59  ;;  %v2840_v37 = vadd.f32 %v7870_v17, %v2817_v23  ;;  %v2858_v35 = vmax.f32 %v2842_v32, 0.0 }
 0x34f   : > { %v2781_v12 = vpop.f32.mrf.mxu1  ;;  %v3597_v32 = vsel %vm392_vm0, %v3588_v44, 0 }
 0x350   : > { %v2843_v1 = vadd.f32 %v7870_v17, %v2820_v24  ;;  %v2818_v36 = vadd.f32 %v2781_v12, %v2509_v61  ;;  %6193 = vmatprep.mubr.msk.bf16.mxu0 %vm367_vm1, %v2866_v5  ;;  %v2856_v55 = vmax.f32 %v2840_v37, 0.0  ;;  %v3865_v24 = vsel %vm392_vm0, %v3856_v3, 0  ;;  %v4392_v37 = vld [vmem:[%s9894_s7 + $0x14] sm:$0xf]  ;;  %v4660_v3 = vld [vmem:[%s9894_s7 + $0x18] sm:$0xf] }
 0x351   : > { %v6185_v18 = vpop.f32.mrf.mxu1  ;;  %6194 = vmatmul.mubr.msk.bf16.gmra.mxu0 %vm367_vm1, %v2867_v11 }
 0x352   : > { %v2859_v14 = vmax.f32 %v2843_v1, 0.0  ;;  %v2841_v28 = vadd.f32 %v7870_v17, %v2818_v36  ;;  %v2823_v46 = vadd.f32 %v6185_v18, %v2514_v15  ;;  %v4124_v15 = vld [vmem:[%s9894_s7 + $0x10] sm:$0xf] }
 0x353   : > { %v2794_v19 = vpop.f32.mrf.mxu1 }
 0x354   : > { %v2869_v20 = vpack.c.bf16 %v2859_v14, %v2858_v35  ;;  %v2857_v9 = vmax.f32 %v2841_v28, 0.0  ;;  %v2821_v54 = vadd.f32 %v2794_v19, %v2512_v22  ;;  %v2846_v0 = vadd.f32 %v7870_v17, %v2823_v46 }
 0x355   : > { %v6186_v30 = vpop.f32.mrf.mxu1 }
 0x356   : > { %v2868_v38 = vpack.c.bf16 %v2857_v9, %v2856_v55  ;;  %v2824_v42 = vadd.f32 %v6186_v30, %v2515_v6  ;;  %v2844_v39 = vadd.f32 %v7870_v17, %v2821_v54  ;;  %v2862_v40 = vmax.f32 %v2846_v0, 0.0 }
 0x357   : > { %v2797_v43 = vpop.f32.mrf.mxu1 }
 0x358   : > { %v2847_v58 = vadd.f32 %v7870_v17, %v2824_v42  ;;  %v2822_v57 = vadd.f32 %v2797_v43, %v2513_v21  ;;  %6197 = vmatprep.mubr.msk.bf16.mxu1 %vm367_vm1, %v2868_v38  ;;  %v2860_v2 = vmax.f32 %v2844_v39, 0.0 }
 0x359   : > { %6198 = vmatmul.mubr.msk.bf16.vlgmr.msra.gmra.mxu1 %vm367_vm1, %v2869_v20 }
 0x35a   : > { %v2863_v41 = vmax.f32 %v2847_v58, 0.0  ;;  %v2845_v62 = vadd.f32 %v7870_v17, %v2822_v57  ;;  %6206 = vmatpush3.bf16.msra.mxu1 %v3061_v56 }
 0x35b   : > { %6363 = vmatprep.subr.msk.bf16.mxu1 %vm392_vm0, %v3588_v44  ;;  %v4401_v44 = vsel %vm392_vm0, %v4392_v37, 0 }
 0x35c   : > { %v2871_v34 = vpack.c.bf16 %v2863_v41, %v2862_v40  ;;  %v2861_v7 = vmax.f32 %v2845_v62, 0.0 }
 0x35e   : > { %v2870_v4 = vpack.c.bf16 %v2861_v7, %v2860_v2 }
 0x360   : > { %6201 = vmatprep.mubr.msk.bf16.mxu1 %vm367_vm1, %v2870_v4  ;;  %v4133_v4 = vsel %vm392_vm0, %v4124_v15, 0 }
 0x361   : > { %6202 = vmatmul.mubr.msk.bf16.gmra.mxu1 %vm367_vm1, %v2871_v34 }
 0x409   : > { %v6191_v17 = vpop.f32.mrf.mxu0 }
 0x40a   : > { %v2950_v33 = vadd.f32 %v6191_v17, %v7943_v63  ;;  %v4928_v17 = vld [vmem:[%s9894_s7 + $0x1c] sm:$0xf] }
 0x40b   : > { %v2941_v31 = vpop.f32.mrf.mxu0 }
 0x40c   : > { %v2942_v47 = vadd.f32 %v7943_v63, %v2941_v31  ;;  %v3006_v23 = vmax.f32 %v2950_v33, 0.0  ;;  %v4669_v31 = vsel %vm392_vm0, %v4660_v3, 0 }
 0x40d   : > { %v6192_v45 = vpop.f32.mrf.mxu0 }
 0x40e   : > { %v2953_v60 = vadd.f32 %v6192_v45, %v7943_v63  ;;  %v3004_v11 = vmax.f32 %v2942_v47, 0.0  ;;  %v8130_v45 = vld [vmem:[%s9895_s8] ss:$0 sm:$0xff]  ;;  %v8135_v47 = vld [vmem:[%s9895_s8 + $0x1] ss:$0 sm:$0xff] }
 0x40f   : > { %v2944_v52 = vpop.f32.mrf.mxu0 }
 0x410   : > { %v2945_v59 = vadd.f32 %v7943_v63, %v2944_v52  ;;  %v3007_v48 = vmax.f32 %v2953_v60, 0.0 }
 0x411   : > { %v6195_v10 = vpop.f32.mrf.mxu0 }
 0x412   : > { %v3005_v8 = vmax.f32 %v2945_v59, 0.0  ;;  %v7951_v61 = vpack.c.bf16 %v3007_v48, %v3006_v23  ;;  %v2966_v1 = vadd.f32 %v6195_v10, %v7943_v63 }
 0x413   : > { %v2957_v27 = vpop.f32.mrf.mxu0 }
 0x414   : > { %v7949_v29 = vpack.c.bf16 %v3005_v8, %v3004_v11  ;;  %v2958_v50 = vadd.f32 %v7943_v63, %v2957_v27  ;;  %v3010_v18 = vmax.f32 %v2966_v1, 0.0 }
 0x415   : > { %v6196_v5 = vpop.f32.mrf.mxu0 }
 0x416   : > { %v2969_v12 = vadd.f32 %v6196_v5, %v7943_v63  ;;  %6207 = vmatprep.mubr.msk.bf16.mxu1 %vm367_vm1, %v7949_v29  ;;  %6225 = vmatprep.mubr.msk.bf16.mxu0 %vm367_vm1, %v7949_v29  ;;  %v3008_v13 = vmax.f32 %v2958_v50, 0.0 }
 0x417   : > { %v2960_v36 = vpop.f32.mrf.mxu0  ;;  %6208 = vmatmul.mubr.msk.bf16.vlgmr.msra.gmra.mxu1 %vm367_vm1, %v7951_v61  ;;  %6226 = vmatmul.mubr.msk.bf16.vlgmr.msra.gmra.mxu0 %vm367_vm1, %v7951_v61 }
 0x418   : > { %v2961_v53 = vadd.f32 %v7943_v63, %v2960_v36  ;;  %6242 = vmatpush3.bf16.msra.mxu1 %v3597_v32  ;;  %6260 = vmatpush3.bf16.msra.mxu0 %v3865_v24  ;;  %v3011_v51 = vmax.f32 %v2969_v12, 0.0 }
 0x419   : > { %v6199_v16 = vpop.f32.mrf.mxu1  ;;  %6365 = vmatprep.subr.msk.bf16.mxu1 %vm392_vm0, %v4124_v15  ;;  %6366 = vmatprep.subr.msk.bf16.mxu0 %vm392_vm0, %v4392_v37 }
 0x41a   : > { %v3009_v22 = vmax.f32 %v2961_v53, 0.0  ;;  %v7977_v28 = vpack.c.bf16 %v3011_v51, %v3010_v18  ;;  %v2982_v6 = vadd.f32 %v6199_v16, %v7943_v63 }
 0x41b   : > { %v2973_v35 = vpop.f32.mrf.mxu1 }
 0x41c   : > { %v7975_v14 = vpack.c.bf16 %v3009_v22, %v3008_v13  ;;  %v2974_v49 = vadd.f32 %v7943_v63, %v2973_v35  ;;  %v3014_v21 = vmax.f32 %v2982_v6, 0.0 }
 0x41d   : > { %v6200_v46 = vpop.f32.mrf.mxu1 }
 0x41e   : > { %v2985_v26 = vadd.f32 %v6200_v46, %v7943_v63  ;;  %6211 = vmatprep.mubr.msk.bf16.mxu1 %vm367_vm1, %v7975_v14  ;;  %6229 = vmatprep.mubr.msk.bf16.mxu0 %vm367_vm1, %v7975_v14  ;;  %v3012_v54 = vmax.f32 %v2974_v49, 0.0 }
 0x41f   : > { %v2976_v19 = vpop.f32.mrf.mxu1  ;;  %6212 = vmatmul.mubr.msk.bf16.gmra.mxu1 %vm367_vm1, %v7977_v28  ;;  %6230 = vmatmul.mubr.msk.bf16.gmra.mxu0 %vm367_vm1, %v7977_v28 }
 0x420   : > { %v2977_v55 = vadd.f32 %v7943_v63, %v2976_v19  ;;  %v3015_v20 = vmax.f32 %v2985_v26, 0.0 }
 0x421   : > { %v6203_v9 = vpop.f32.mrf.mxu1 }
 0x422   : > { %v3013_v30 = vmax.f32 %v2977_v55, 0.0  ;;  %v7993_v42 = vpack.c.bf16 %v3015_v20, %v3014_v21  ;;  %v2998_v39 = vadd.f32 %v6203_v9, %v7943_v63 }
 0x423   : > { %v2989_v38 = vpop.f32.mrf.mxu1 }
 0x424   : > { %v7991_v0 = vpack.c.bf16 %v3013_v30, %v3012_v54  ;;  %v2990_v25 = vadd.f32 %v7943_v63, %v2989_v38  ;;  %v3018_v2 = vmax.f32 %v2998_v39, 0.0 }
 0x425   : > { %v6204_v43 = vpop.f32.mrf.mxu1 }
 0x426   : > { %v3001_v56 = vadd.f32 %v6204_v43, %v7943_v63  ;;  %6215 = vmatprep.mubr.msk.bf16.mxu1 %vm367_vm1, %v7991_v0  ;;  %6233 = vmatprep.mubr.msk.bf16.mxu0 %vm367_vm1, %v7991_v0  ;;  %v3016_v41 = vmax.f32 %v2990_v25, 0.0 }
 0x427   : > { %v2992_v58 = vpop.f32.mrf.mxu1  ;;  %6216 = vmatmul.mubr.msk.bf16.gmra.mxu1 %vm367_vm1, %v7993_v42  ;;  %6234 = vmatmul.mubr.msk.bf16.gmra.mxu0 %vm367_vm1, %v7993_v42 }
 0x428   : > { %v2993_v57 = vadd.f32 %v7943_v63, %v2992_v58  ;;  %v3019_v40 = vmax.f32 %v3001_v56, 0.0  ;;  %v4937_v63 = vsel %vm392_vm0, %v4928_v17, 0 }
 0x42a   : > { %v3017_v62 = vmax.f32 %v2993_v57, 0.0  ;;  %v8009_v7 = vpack.c.bf16 %v3019_v40, %v3018_v2 }
 0x42c   : > { %v8007_v34 = vpack.c.bf16 %v3017_v62, %v3016_v41 }
 0x42e   : > { %6219 = vmatprep.mubr.msk.bf16.mxu1 %vm367_vm1, %v8007_v34  ;;  %6237 = vmatprep.mubr.msk.bf16.mxu0 %vm367_vm1, %v8007_v34 }
 0x42f   : > { %6220 = vmatmul.mubr.msk.bf16.gmra.mxu1 %vm367_vm1, %v8009_v7  ;;  %6238 = vmatmul.mubr.msk.bf16.gmra.mxu0 %vm367_vm1, %v8009_v7 }
 0x430   : > { %6243 = vmatprep.mubr.msk.bf16.mxu1 %vm367_vm1, %v7949_v29  ;;  %6261 = vmatprep.mubr.msk.bf16.mxu0 %vm367_vm1, %v7949_v29 }
 0x437   : > { %6244 = vmatmul.mubr.msk.bf16.vlgmr.msra.gmra.mxu1 %vm367_vm1, %v7951_v61  ;;  %6262 = vmatmul.mubr.msk.bf16.vlgmr.msra.gmra.mxu0 %vm367_vm1, %v7951_v61 }
 0x438   : > { %6247 = vmatprep.mubr.msk.bf16.mxu1 %vm367_vm1, %v7975_v14  ;;  %6265 = vmatprep.mubr.msk.bf16.mxu0 %vm367_vm1, %v7975_v14 }
 0x439   : > { %6278 = vmatpush3.bf16.msra.mxu1 %v4133_v4  ;;  %6296 = vmatpush3.bf16.msra.mxu0 %v4401_v44 }
 0x43a   : > { %6367 = vmatprep.subr.msk.bf16.mxu1 %vm392_vm0, %v4660_v3  ;;  %6368 = vmatprep.subr.msk.bf16.mxu0 %vm392_vm0, %v4928_v17 }
 0x43f   : > { %6248 = vmatmul.mubr.msk.bf16.gmra.mxu1 %vm367_vm1, %v7977_v28  ;;  %6266 = vmatmul.mubr.msk.bf16.gmra.mxu0 %vm367_vm1, %v7977_v28 }
 0x440   : > { %6251 = vmatprep.mubr.msk.bf16.mxu1 %vm367_vm1, %v7991_v0  ;;  %6269 = vmatprep.mubr.msk.bf16.mxu0 %vm367_vm1, %v7991_v0 }
 0x447   : > { %6252 = vmatmul.mubr.msk.bf16.gmra.mxu1 %vm367_vm1, %v7993_v42  ;;  %6270 = vmatmul.mubr.msk.bf16.gmra.mxu0 %vm367_vm1, %v7993_v42 }
 0x448   : > { %6255 = vmatprep.mubr.msk.bf16.mxu1 %vm367_vm1, %v8007_v34  ;;  %6273 = vmatprep.mubr.msk.bf16.mxu0 %vm367_vm1, %v8007_v34 }
 0x44f   : > { %6256 = vmatmul.mubr.msk.bf16.gmra.mxu1 %vm367_vm1, %v8009_v7  ;;  %6274 = vmatmul.mubr.msk.bf16.gmra.mxu0 %vm367_vm1, %v8009_v7 }
 0x450   : > { %6279 = vmatprep.mubr.msk.bf16.mxu1 %vm367_vm1, %v7949_v29  ;;  %6297 = vmatprep.mubr.msk.bf16.mxu0 %vm367_vm1, %v7949_v29 }
 0x457   : > { %6280 = vmatmul.mubr.msk.bf16.vlgmr.msra.gmra.mxu1 %vm367_vm1, %v7951_v61  ;;  %6298 = vmatmul.mubr.msk.bf16.vlgmr.msra.gmra.mxu0 %vm367_vm1, %v7951_v61 }
 0x458   : > { %6283 = vmatprep.mubr.msk.bf16.mxu1 %vm367_vm1, %v7975_v14  ;;  %6301 = vmatprep.mubr.msk.bf16.mxu0 %vm367_vm1, %v7975_v14 }
 0x459   : > { %6314 = vmatpush3.bf16.msra.mxu1 %v4669_v31  ;;  %6332 = vmatpush3.bf16.msra.mxu0 %v4937_v63 }
 0x45f   : > { %6284 = vmatmul.mubr.msk.bf16.gmra.mxu1 %vm367_vm1, %v7977_v28  ;;  %6302 = vmatmul.mubr.msk.bf16.gmra.mxu0 %vm367_vm1, %v7977_v28 }
 0x460   : > { %6287 = vmatprep.mubr.msk.bf16.mxu1 %vm367_vm1, %v7991_v0  ;;  %6305 = vmatprep.mubr.msk.bf16.mxu0 %vm367_vm1, %v7991_v0 }
 0x467   : > { %6288 = vmatmul.mubr.msk.bf16.gmra.mxu1 %vm367_vm1, %v7993_v42  ;;  %6306 = vmatmul.mubr.msk.bf16.gmra.mxu0 %vm367_vm1, %v7993_v42 }
 0x468   : > { %6291 = vmatprep.mubr.msk.bf16.mxu1 %vm367_vm1, %v8007_v34  ;;  %6309 = vmatprep.mubr.msk.bf16.mxu0 %vm367_vm1, %v8007_v34 }
 0x46f   : > { %6292 = vmatmul.mubr.msk.bf16.gmra.mxu1 %vm367_vm1, %v8009_v7  ;;  %6310 = vmatmul.mubr.msk.bf16.gmra.mxu0 %vm367_vm1, %v8009_v7 }
 0x470   : > { %6315 = vmatprep.mubr.msk.bf16.mxu1 %vm367_vm1, %v7949_v29  ;;  %6333 = vmatprep.mubr.msk.bf16.mxu0 %vm367_vm1, %v7949_v29 }
 0x477   : > { %6316 = vmatmul.mubr.msk.bf16.vlgmr.msra.gmra.mxu1 %vm367_vm1, %v7951_v61  ;;  %6334 = vmatmul.mubr.msk.bf16.vlgmr.msra.gmra.mxu0 %vm367_vm1, %v7951_v61 }
 0x478   : > { %6319 = vmatprep.mubr.msk.bf16.mxu1 %vm367_vm1, %v7975_v14  ;;  %6337 = vmatprep.mubr.msk.bf16.mxu0 %vm367_vm1, %v7975_v14 }
 0x47f   : > { %6320 = vmatmul.mubr.msk.bf16.gmra.mxu1 %vm367_vm1, %v7977_v28  ;;  %6338 = vmatmul.mubr.msk.bf16.gmra.mxu0 %vm367_vm1, %v7977_v28 }
 0x480   : > { %6323 = vmatprep.mubr.msk.bf16.mxu1 %vm367_vm1, %v7991_v0  ;;  %6341 = vmatprep.mubr.msk.bf16.mxu0 %vm367_vm1, %v7991_v0 }
 0x487   : > { %6324 = vmatmul.mubr.msk.bf16.gmra.mxu1 %vm367_vm1, %v7993_v42  ;;  %6342 = vmatmul.mubr.msk.bf16.gmra.mxu0 %vm367_vm1, %v7993_v42 }
 0x488   : > { %6327 = vmatprep.mubr.msk.bf16.mxu1 %vm367_vm1, %v8007_v34  ;;  %6345 = vmatprep.mubr.msk.bf16.mxu0 %vm367_vm1, %v8007_v34 }
 0x48f   : > { %6328 = vmatmul.mubr.msk.bf16.gmra.mxu1 %vm367_vm1, %v8009_v7  ;;  %6346 = vmatmul.mubr.msk.bf16.gmra.mxu0 %vm367_vm1, %v8009_v7 }
 0x4d7   : > { %v6209_v60 = vpop.f32.mrf.mxu1  ;;  %v6227_v33 = vpop.f32.mrf.mxu0 }
 0x4d8   : > { %v8138_v52 = vadd.f32 %v6209_v60, %v8130_v45  ;;  %v8141_v59 = vadd.f32 %v6227_v33, %v8135_v47 }
 0x4d9   : > { %v3097_v48 = vpop.f32.mrf.mxu1  ;;  %v3365_v10 = vpop.f32.mrf.mxu0 }
 0x4da   : > { %3432 = vmax.xlane.f32.xlu0 %v8141_v59  ;;  %3164 = vmax.xlane.f32.xlu1 %v8138_v52  ;;  %v8146_v23 = vadd.f32 %v8130_v45, %v3097_v48  ;;  %v8154_v32 = vadd.f32 %v8135_v47, %v3365_v10 }
 0x4db   : > { %v6210_v11 = vpop.f32.mrf.mxu1  ;;  %v6228_v8 = vpop.f32.mrf.mxu0 }
 0x4dc   : > { %v8149_v27 = vadd.f32 %v6210_v11, %v8130_v45  ;;  %v8157_v24 = vadd.f32 %v6228_v8, %v8135_v47  ;;  %v8266_v8 = vld [vmem:[%s9895_s8 + $0x2] ss:$0 sm:$0xff] }
 0x4dd   : > { %v3100_v29 = vpop.f32.mrf.mxu1  ;;  %v3368_v61 = vpop.f32.mrf.mxu0 }
 0x4de   : > { %3166 = vmax.xlane.f32.xlu1 %v8149_v27  ;;  %3160 = vmax.xlane.f32.xlu0 %v8146_v23  ;;  %v8162_v15 = vadd.f32 %v8130_v45, %v3100_v29  ;;  %v8165_v37 = vadd.f32 %v8135_v47, %v3368_v61 }
 0x4df   : > { %v6213_v5 = vpop.f32.mrf.mxu1  ;;  %v6231_v50 = vpop.f32.mrf.mxu0 }
 0x4e0   : > { %v8170_v53 = vadd.f32 %v6213_v5, %v8130_v45  ;;  %v8178_v22 = vadd.f32 %v6231_v50, %v8135_v47 }
 0x4e1   : > { %v3113_v12 = vpop.f32.mrf.mxu1  ;;  %v3381_v1 = vpop.f32.mrf.mxu0 }
 0x4e2   : > { %3434 = vmax.xlane.f32.xlu1 %v8157_v24  ;;  %3428 = vmax.xlane.f32.xlu0 %v8154_v32  ;;  %v8186_v28 = vadd.f32 %v8130_v45, %v3113_v12  ;;  %v8194_v6 = vadd.f32 %v8135_v47, %v3381_v1 }
 0x4e3   : > { %v6214_v36 = vpop.f32.mrf.mxu1  ;;  %v6232_v16 = vpop.f32.mrf.mxu0 }
 0x4e4   : > { %v8173_v51 = vadd.f32 %v6214_v36, %v8130_v45  ;;  %v8181_v18 = vadd.f32 %v6232_v16, %v8135_v47 }
 0x4e5   : > { %v3116_v13 = vpop.f32.mrf.mxu1  ;;  %v3384_v35 = vpop.f32.mrf.mxu0 }
 0x4e6   : > { %3430 = vmax.xlane.f32.xlu1 %v8165_v37  ;;  %3162 = vmax.xlane.f32.xlu0 %v8162_v15  ;;  %v8189_v46 = vadd.f32 %v8130_v45, %v3116_v13  ;;  %v8197_v19 = vadd.f32 %v8135_v47, %v3384_v35 }
 0x4e7   : > { %v6217_v14 = vpop.f32.mrf.mxu1  ;;  %v6235_v49 = vpop.f32.mrf.mxu0 }
 0x4e8   : > { %v8202_v9 = vadd.f32 %v6217_v14, %v8130_v45  ;;  %v8210_v38 = vadd.f32 %v6235_v49, %v8135_v47 }
 0x4e9   : > { %v3129_v26 = vpop.f32.mrf.mxu1  ;;  %v3397_v55 = vpop.f32.mrf.mxu0 }
 0x4ea   : > { %3174 = vmax.xlane.f32.xlu1 %v8173_v51  ;;  %3172 = vmax.xlane.f32.xlu0 %v8170_v53  ;;  %v8218_v25 = vadd.f32 %v8130_v45, %v3129_v26  ;;  %v8226_v57 = vadd.f32 %v8135_v47, %v3397_v55 }
 0x4eb   : > { %v6218_v20 = vpop.f32.mrf.mxu1  ;;  %v6236_v30 = vpop.f32.mrf.mxu0 }
 0x4ec   : > { %v8205_v54 = vadd.f32 %v6218_v20, %v8130_v45  ;;  %v8213_v0 = vadd.f32 %v6236_v30, %v8135_v47 }
 0x4ed   : > { %v3132_v21 = vpop.f32.mrf.mxu1  ;;  %v3400_v42 = vpop.f32.mrf.mxu0 }
 0x4ee   : > { %3442 = vmax.xlane.f32.xlu1 %v8181_v18  ;;  %3440 = vmax.xlane.f32.xlu0 %v8178_v22  ;;  %v8221_v56 = vadd.f32 %v8130_v45, %v3132_v21  ;;  %v8229_v40 = vadd.f32 %v8135_v47, %v3400_v42 }
 0x4ef   : > { %v6221_v43 = vpop.f32.mrf.mxu1  ;;  %v6239_v39 = vpop.f32.mrf.mxu0 }
 0x4f0   : > { %v8234_v2 = vadd.f32 %v6221_v43, %v8130_v45  ;;  %v8242_v44 = vadd.f32 %v6239_v39, %v8135_v47 }
 0x4f1   : > { %v3145_v58 = vpop.f32.mrf.mxu1  ;;  %v3413_v41 = vpop.f32.mrf.mxu0 }
 0x4f2   : > { %3170 = vmax.xlane.f32.xlu1 %v8189_v46  ;;  %3168 = vmax.xlane.f32.xlu0 %v8186_v28  ;;  %10089 = vst [vmem:[#allocation6_spill] sm:$0xff] %v8234_v2  ;;  %10091 = vst [vmem:[#allocation7_spill] sm:$0xff] %v8242_v44  ;;  %v8250_v63 = vadd.f32 %v8130_v45, %v3145_v58  ;;  %v8258_v10 = vadd.f32 %v8135_v47, %v3413_v41 }
 0x4f3   : > { %v6222_v62 = vpop.f32.mrf.mxu1  ;;  %v6240_v7 = vpop.f32.mrf.mxu0 }
 0x4f4   : > { %v8237_v34 = vadd.f32 %v6222_v62, %v8130_v45  ;;  %v8245_v3 = vadd.f32 %v6240_v7, %v8135_v47  ;;  %10093 = vst [vmem:[#allocation9_spill] sm:$0xff] %v8250_v63  ;;  %10095 = vst [vmem:[#allocation11_spill] sm:$0xff] %v8258_v10 }
 0x4f5   : > { %v3148_v4 = vpop.f32.mrf.mxu1  ;;  %v3416_v17 = vpop.f32.mrf.mxu0 }
 0x4f6   : > { %3438 = vmax.xlane.f32.xlu1 %v8197_v19  ;;  %3436 = vmax.xlane.f32.xlu0 %v8194_v6  ;;  %10090 = vst [vmem:[#allocation8_spill] sm:$0xff] %v8237_v34  ;;  %10092 = vst [vmem:[#allocation5_spill] sm:$0xff] %v8245_v3  ;;  %v8253_v60 = vadd.f32 %v8130_v45, %v3148_v4  ;;  %v8261_v11 = vadd.f32 %v8135_v47, %v3416_v17  ;;  %v8279_v47 = vld [vmem:[%s9895_s8 + $0x3] ss:$0 sm:$0xff] }
 0x4f7   : > { %v6245_v31 = vpop.f32.mrf.mxu1  ;;  %v6263_v33 = vpop.f32.mrf.mxu0 }
 0x4f8   : > { %10094 = vst [vmem:[#allocation10_spill] sm:$0xff] %v8253_v60  ;;  %10096 = vst [vmem:[#allocation12_spill] sm:$0xff] %v8261_v11  ;;  %v8271_v61 = vadd.f32 %v6245_v31, %v8266_v8  ;;  %v8284_v1 = vadd.f32 %v6263_v33, %v8279_v47 }
 0x4f9   : > { %v3633_v48 = vpop.f32.mrf.mxu1  ;;  %v3901_v29 = vpop.f32.mrf.mxu0 }
 0x4fa   : > { %3182 = vmax.xlane.f32.xlu1 %v8205_v54  ;;  %3180 = vmax.xlane.f32.xlu0 %v8202_v9  ;;  %10097 = vst [vmem:[#allocation13_spill] sm:$0xff] %v8271_v61  ;;  %10099 = vst [vmem:[#allocation15_spill] sm:$0xff] %v8284_v1  ;;  %v8292_v35 = vadd.f32 %v8266_v8, %v3633_v48  ;;  %v8300_v55 = vadd.f32 %v8279_v47, %v3901_v29 }
 0x4fb   : > { %v6246_v45 = vpop.f32.mrf.mxu1  ;;  %v6264_v50 = vpop.f32.mrf.mxu0 }
 0x4fc   : > { %v8274_v5 = vadd.f32 %v6246_v45, %v8266_v8  ;;  %v8287_v36 = vadd.f32 %v6264_v50, %v8279_v47  ;;  %10101 = vst [vmem:[#allocation17_spill] sm:$0xff] %v8292_v35  ;;  %10103 = vst [vmem:[#allocation19_spill] sm:$0xff] %v8300_v55 }
 0x4fd   : > { %v3636_v12 = vpop.f32.mrf.mxu1  ;;  %v3904_v16 = vpop.f32.mrf.mxu0 }
 0x4fe   : > { %3450 = vmax.xlane.f32.xlu1 %v8213_v0  ;;  %3448 = vmax.xlane.f32.xlu0 %v8210_v38  ;;  %10098 = vst [vmem:[#allocation14_spill] sm:$0xff] %v8274_v5  ;;  %10100 = vst [vmem:[#allocation16_spill] sm:$0xff] %v8287_v36  ;;  %v8295_v14 = vadd.f32 %v8266_v8, %v3636_v12  ;;  %v8303_v20 = vadd.f32 %v8279_v47, %v3904_v16 }
 0x4ff   : > { %v6249_v13 = vpop.f32.mrf.mxu1  ;;  %v6267_v49 = vpop.f32.mrf.mxu0 }
 0x500   : > { %10102 = vst [vmem:[#allocation18_spill] sm:$0xff] %v8295_v14  ;;  %10104 = vst [vmem:[#allocation20_spill] sm:$0xff] %v8303_v20  ;;  %v8308_v42 = vadd.f32 %v6249_v13, %v8266_v8  ;;  %v8316_v41 = vadd.f32 %v6267_v49, %v8279_v47 }
 0x501   : > { %v3649_v26 = vpop.f32.mrf.mxu1  ;;  %v3917_v30 = vpop.f32.mrf.mxu0 }
 0x502   : > { %3178 = vmax.xlane.f32.xlu1 %v8221_v56  ;;  %3176 = vmax.xlane.f32.xlu0 %v8218_v25  ;;  %10105 = vst [vmem:[#allocation21_spill] sm:$0xff] %v8308_v42  ;;  %10107 = vst [vmem:[#allocation23_spill] sm:$0xff] %v8316_v41  ;;  %v8324_v17 = vadd.f32 %v8266_v8, %v3649_v26  ;;  %v8332_v29 = vadd.f32 %v8279_v47, %v3917_v30 }
 0x503   : > { %v6250_v21 = vpop.f32.mrf.mxu1  ;;  %v6268_v39 = vpop.f32.mrf.mxu0 }
 0x504   : > { %v8311_v43 = vadd.f32 %v6250_v21, %v8266_v8  ;;  %v8319_v62 = vadd.f32 %v6268_v39, %v8279_v47  ;;  %10109 = vst [vmem:[#allocation25_spill] sm:$0xff] %v8324_v17  ;;  %10111 = vst [vmem:[#allocation27_spill] sm:$0xff] %v8332_v29 }
 0x505   : > { %v3652_v58 = vpop.f32.mrf.mxu1  ;;  %v3920_v7 = vpop.f32.mrf.mxu0 }
 0x506   : > { %3446 = vmax.xlane.f32.xlu1 %v8229_v40  ;;  %3444 = vmax.xlane.f32.xlu0 %v8226_v57  ;;  %10106 = vst [vmem:[#allocation22_spill] sm:$0xff] %v8311_v43  ;;  %10108 = vst [vmem:[#allocation24_spill] sm:$0xff] %v8319_v62  ;;  %v8327_v31 = vadd.f32 %v8266_v8, %v3652_v58  ;;  %v8335_v45 = vadd.f32 %v8279_v47, %v3920_v7 }
 0x507   : > { %v6253_v4 = vpop.f32.mrf.mxu1  ;;  %v6271_v33 = vpop.f32.mrf.mxu0 }
 0x508   : > { %10110 = vst [vmem:[#allocation26_spill] sm:$0xff] %v8327_v31  ;;  %10112 = vst [vmem:[#allocation28_spill] sm:$0xff] %v8335_v45  ;;  %v8340_v16 = vadd.f32 %v6253_v4, %v8266_v8  ;;  %v8348_v30 = vadd.f32 %v6271_v33, %v8279_v47 }
 0x509   : > { %v3665_v48 = vpop.f32.mrf.mxu1  ;;  %v3933_v50 = vpop.f32.mrf.mxu0 }
 0x50a   : > { %3190 = vmax.xlane.f32.xlu1 %v8237_v34  ;;  %3188 = vmax.xlane.f32.xlu0 %v8234_v2  ;;  %10113 = vst [vmem:[#allocation29_spill] sm:$0xff] %v8340_v16  ;;  %10115 = vst [vmem:[#allocation31_spill] sm:$0xff] %v8348_v30  ;;  %v8356_v7 = vadd.f32 %v8266_v8, %v3665_v48  ;;  %v8364_v33 = vadd.f32 %v8279_v47, %v3933_v50 }
 0x50b   : > { %v6254_v12 = vpop.f32.mrf.mxu1  ;;  %v6272_v49 = vpop.f32.mrf.mxu0 }
 0x50c   : > { %v8343_v13 = vadd.f32 %v6254_v12, %v8266_v8  ;;  %v8351_v21 = vadd.f32 %v6272_v49, %v8279_v47  ;;  %10117 = vst [vmem:[#allocation33_spill] sm:$0xff] %v8356_v7  ;;  %10119 = vst [vmem:[#allocation35_spill] sm:$0xff] %v8364_v33 }
 0x50d   : > { %v3668_v26 = vpop.f32.mrf.mxu1  ;;  %v3936_v39 = vpop.f32.mrf.mxu0 }
 0x50e   : > { %3458 = vmax.xlane.f32.xlu1 %v8245_v3  ;;  %3456 = vmax.xlane.f32.xlu0 %v8242_v44  ;;  %10114 = vst [vmem:[#allocation30_spill] sm:$0xff] %v8343_v13  ;;  %10116 = vst [vmem:[#allocation32_spill] sm:$0xff] %v8351_v21  ;;  %v8359_v4 = vadd.f32 %v8266_v8, %v3668_v26  ;;  %v8367_v49 = vadd.f32 %v8279_v47, %v3936_v39 }
 0x50f   : > { %v6257_v58 = vpop.f32.mrf.mxu1  ;;  %v6275_v12 = vpop.f32.mrf.mxu0 }
 0x510   : > { %10118 = vst [vmem:[#allocation34_spill] sm:$0xff] %v8359_v4  ;;  %10120 = vst [vmem:[#allocation36_spill] sm:$0xff] %v8367_v49  ;;  %v8372_v48 = vadd.f32 %v6257_v58, %v8266_v8  ;;  %v8380_v50 = vadd.f32 %v6275_v12, %v8279_v47 }
 0x512   : > { %3186 = vmax.xlane.f32.xlu1 %v8253_v60  ;;  %3184 = vmax.xlane.f32.xlu0 %v8250_v63  ;;  %10121 = vst [vmem:[#allocation37_spill] sm:$0xff] %v8372_v48  ;;  %10123 = vst [vmem:[#allocation39_spill] sm:$0xff] %v8380_v50 }
 0x516   : > { %3454 = vmax.xlane.f32.xlu1 %v8261_v11  ;;  %3452 = vmax.xlane.f32.xlu0 %v8258_v10 }
 0x51a   : > { %3702 = vmax.xlane.f32.xlu1 %v8274_v5  ;;  %3700 = vmax.xlane.f32.xlu0 %v8271_v61 }
 0x51e   : > { %3970 = vmax.xlane.f32.xlu1 %v8287_v36  ;;  %3968 = vmax.xlane.f32.xlu0 %v8284_v1 }
 0x522   : > { %3698 = vmax.xlane.f32.xlu1 %v8295_v14  ;;  %3696 = vmax.xlane.f32.xlu0 %v8292_v35 }
 0x526   : > { %3966 = vmax.xlane.f32.xlu1 %v8303_v20  ;;  %3964 = vmax.xlane.f32.xlu0 %v8300_v55 }
 0x52a   : > { %3710 = vmax.xlane.f32.xlu1 %v8311_v43  ;;  %3708 = vmax.xlane.f32.xlu0 %v8308_v42 }
 0x52e   : > { %3978 = vmax.xlane.f32.xlu1 %v8319_v62  ;;  %3976 = vmax.xlane.f32.xlu0 %v8316_v41 }
 0x532   : > { %3706 = vmax.xlane.f32.xlu1 %v8327_v31  ;;  %3704 = vmax.xlane.f32.xlu0 %v8324_v17 }
 0x536   : > { %3974 = vmax.xlane.f32.xlu1 %v8335_v45  ;;  %3972 = vmax.xlane.f32.xlu0 %v8332_v29 }
 0x53a   : > { %3718 = vmax.xlane.f32.xlu1 %v8343_v13  ;;  %3716 = vmax.xlane.f32.xlu0 %v8340_v16  ;;  %v3681_v16 = vpop.f32.mrf.mxu1 }
 0x53e   : > { %3986 = vmax.xlane.f32.xlu1 %v8351_v21  ;;  %3984 = vmax.xlane.f32.xlu0 %v8348_v30  ;;  %v3949_v21 = vpop.f32.mrf.mxu0  ;;  %v6258_v30 = vpop.f32.mrf.mxu1 }
 0x53f   : > { %v8375_v26 = vadd.f32 %v6258_v30, %v8266_v8  ;;  %v8388_v30 = vadd.f32 %v8266_v8, %v3681_v16  ;;  %v8404_v16 = vld [vmem:[%s9895_s8 + $0x4] ss:$0 sm:$0xff] }
 0x541   : > { %10122 = vst [vmem:[#allocation38_spill] sm:$0xff] %v8375_v26  ;;  %10125 = vst [vmem:[#allocation41_spill] sm:$0xff] %v8388_v30 }
 0x542   : > { %3714 = vmax.xlane.f32.xlu1 %v8359_v4  ;;  %3712 = vmax.xlane.f32.xlu0 %v8356_v7  ;;  %v6276_v4 = vpop.f32.mrf.mxu0  ;;  %v3684_v7 = vpop.f32.mrf.mxu1 }
 0x543   : > { %v8383_v39 = vadd.f32 %v6276_v4, %v8279_v47  ;;  %v8391_v58 = vadd.f32 %v8266_v8, %v3684_v7  ;;  %v8396_v4 = vadd.f32 %v8279_v47, %v3949_v21 }
 0x545   : > { %10124 = vst [vmem:[#allocation40_spill] sm:$0xff] %v8383_v39  ;;  %10126 = vst [vmem:[#allocation42_spill] sm:$0xff] %v8391_v58 }
 0x546   : > { %3982 = vmax.xlane.f32.xlu1 %v8367_v49  ;;  %3980 = vmax.xlane.f32.xlu0 %v8364_v33  ;;  %v3952_v49 = vpop.f32.mrf.mxu0  ;;  %v6281_v33 = vpop.f32.mrf.mxu1  ;;  %10127 = vst [vmem:[#allocation43_spill] sm:$0xff] %v8396_v4 }
 0x547   : > { %v8399_v12 = vadd.f32 %v8279_v47, %v3952_v49  ;;  %v8409_v7 = vadd.f32 %v6281_v33, %v8404_v16  ;;  %v8417_v47 = vld [vmem:[%s9895_s8 + $0x5] ss:$0 sm:$0xff] }
 0x549   : > { %10128 = vst [vmem:[#allocation44_spill] sm:$0xff] %v8399_v12  ;;  %10129 = vst [vmem:[#allocation45_spill] sm:$0xff] %v8409_v7 }
 0x54a   : > { %3726 = vmax.xlane.f32.xlu1 %v8375_v26  ;;  %3724 = vmax.xlane.f32.xlu0 %v8372_v48  ;;  %v6299_v26 = vpop.f32.mrf.mxu0  ;;  %v4169_v48 = vpop.f32.mrf.mxu1 }
 0x54c   : > { %v6282_v8 = vpop.f32.mrf.mxu1 }
 0x54d   : > { %v8412_v21 = vadd.f32 %v6282_v8, %v8404_v16 }
 0x54e   : > { %3994 = vmax.xlane.f32.xlu1 %v8383_v39  ;;  %3992 = vmax.xlane.f32.xlu0 %v8380_v50  ;;  %v4437_v50 = vpop.f32.mrf.mxu0 }
 0x54f   : > { %10130 = vst [vmem:[#allocation46_spill] sm:$0xff] %v8412_v21 }
 0x550   : > { %v6300_v49 = vpop.f32.mrf.mxu0 }
 0x551   : > { %v8425_v33 = vadd.f32 %v6300_v49, %v8417_v47 }
 0x552   : > { %3722 = vmax.xlane.f32.xlu1 %v8391_v58  ;;  %3720 = vmax.xlane.f32.xlu0 %v8388_v30  ;;  %v4172_v30 = vpop.f32.mrf.mxu1  ;;  %v8430_v58 = vadd.f32 %v8404_v16, %v4169_v48 }
 0x553   : > { %10132 = vst [vmem:[#allocation48_spill] sm:$0xff] %v8425_v33  ;;  %v8433_v39 = vadd.f32 %v8404_v16, %v4172_v30 }
 0x554   : > { %v6285_v8 = vpop.f32.mrf.mxu1  ;;  %10133 = vst [vmem:[#allocation49_spill] sm:$0xff] %v8430_v58 }
 0x555   : > { %10134 = vst [vmem:[#allocation50_spill] sm:$0xff] %v8433_v39 }
 0x556   : > { %3990 = vmax.xlane.f32.xlu1 %v8399_v12  ;;  %3988 = vmax.xlane.f32.xlu0 %v8396_v4  ;;  %v8422_v12 = vadd.f32 %v6299_v26, %v8417_v47  ;;  %v4440_v4 = vpop.f32.mrf.mxu0 }
 0x558   : > { %10131 = vst [vmem:[#allocation47_spill] sm:$0xff] %v8422_v12 }
 0x55a   : > { %4238 = vmax.xlane.f32.xlu1 %v8412_v21  ;;  %4236 = vmax.xlane.f32.xlu0 %v8409_v7  ;;  %v6303_v21 = vpop.f32.mrf.mxu0  ;;  %v4185_v7 = vpop.f32.mrf.mxu1 }
 0x55c   : > { %v4453_v48 = vpop.f32.mrf.mxu0  ;;  %v6286_v13 = vpop.f32.mrf.mxu1 }
 0x55d   : > { %v8457_v29 = vadd.f32 %v6286_v13, %v8404_v16 }
 0x55e   : > { %4506 = vmax.xlane.f32.xlu1 %v8425_v33  ;;  %4504 = vmax.xlane.f32.xlu0 %v8422_v12  ;;  %v8442_v33 = vadd.f32 %v8417_v47, %v4437_v50  ;;  %v8445_v12 = vadd.f32 %v8417_v47, %v4440_v4  ;;  %v6304_v50 = vpop.f32.mrf.mxu0  ;;  %v4188_v45 = vpop.f32.mrf.mxu1 }
 0x55f   : > { %10138 = vst [vmem:[#allocation54_spill] sm:$0xff] %v8457_v29  ;;  %v8469_v17 = vadd.f32 %v6304_v50, %v8417_v47  ;;  %v8481_v41 = vadd.f32 %v8404_v16, %v4188_v45 }
 0x560   : > { %10135 = vst [vmem:[#allocation51_spill] sm:$0xff] %v8442_v33  ;;  %10136 = vst [vmem:[#allocation52_spill] sm:$0xff] %v8445_v12  ;;  %v6289_v31 = vpop.f32.mrf.mxu1 }
 0x561   : > { %10140 = vst [vmem:[#allocation56_spill] sm:$0xff] %v8469_v17  ;;  %10142 = vst [vmem:[#allocation58_spill] sm:$0xff] %v8481_v41 }
 0x562   : > { %4234 = vmax.xlane.f32.xlu1 %v8433_v39  ;;  %4232 = vmax.xlane.f32.xlu0 %v8430_v58  ;;  %v8454_v58 = vadd.f32 %v6285_v8, %v8404_v16  ;;  %v4456_v8 = vpop.f32.mrf.mxu0  ;;  %v4201_v62 = vpop.f32.mrf.mxu1 }
 0x563   : > { %v8437_v26 = vpop.xlane.xlu0 %3432  ;;  %v8439_v49 = vpop.xlane.xlu1 %3164  ;;  %v8493_v42 = vadd.f32 %v8417_v47, %v4456_v8 }
 0x564   : > { %10137 = vst [vmem:[#allocation53_spill] sm:$0xff] %v8454_v58  ;;  %v6290_v43 = vpop.f32.mrf.mxu1 }
 0x565   : > { %10144 = vst [vmem:[#allocation60_spill] sm:$0xff] %v8493_v42  ;;  %v8505_v55 = vadd.f32 %v6290_v43, %v8404_v16 }
 0x566   : > { %4502 = vmax.xlane.f32.xlu1 %v8445_v12  ;;  %4500 = vmax.xlane.f32.xlu0 %v8442_v33  ;;  %v8466_v33 = vadd.f32 %v6303_v21, %v8417_v47  ;;  %v6307_v21 = vpop.f32.mrf.mxu0  ;;  %v4204_v20 = vpop.f32.mrf.mxu1 }
 0x567   : > { %v8449_v30 = vpop.xlane.xlu1 %3166  ;;  %v8451_v39 = vpop.xlane.xlu0 %3160  ;;  %10146 = vst [vmem:[#allocation62_spill] sm:$0xff] %v8505_v55  ;;  %v8529_v1 = vadd.f32 %v8404_v16, %v4204_v20 }
 0x568   : > { %10139 = vst [vmem:[#allocation55_spill] sm:$0xff] %v8466_v33  ;;  %v6293_v14 = vpop.f32.mrf.mxu1 }
 0x569   : > { %10150 = vst [vmem:[#allocation66_spill] sm:$0xff] %v8529_v1 }
 0x56a   : > { %4246 = vmax.xlane.f32.xlu1 %v8457_v29  ;;  %4244 = vmax.xlane.f32.xlu0 %v8454_v58  ;;  %v8478_v58 = vadd.f32 %v8404_v16, %v4185_v7  ;;  %v4469_v7 = vpop.f32.mrf.mxu0  ;;  %v4217_v36 = vpop.f32.mrf.mxu1 }
 0x56b   : > { %v8461_v4 = vpop.xlane.xlu1 %3434  ;;  %v8463_v12 = vpop.xlane.xlu0 %3428 }
 0x56c   : > { %10141 = vst [vmem:[#allocation57_spill] sm:$0xff] %v8478_v58  ;;  %v6294_v5 = vpop.f32.mrf.mxu1 }
 0x56d   : > { %v8553_v10 = vadd.f32 %v6294_v5, %v8404_v16 }
 0x56e   : > { %4514 = vmax.xlane.f32.xlu1 %v8469_v17  ;;  %4512 = vmax.xlane.f32.xlu0 %v8466_v33  ;;  %v8490_v33 = vadd.f32 %v8417_v47, %v4453_v48  ;;  %v6308_v48 = vpop.f32.mrf.mxu0  ;;  %v4220_v11 = vpop.f32.mrf.mxu1 }
 0x56f   : > { %v8473_v13 = vpop.xlane.xlu1 %3430  ;;  %v8475_v29 = vpop.xlane.xlu0 %3162  ;;  %v8517_v35 = vadd.f32 %v6308_v48, %v8417_v47  ;;  %10154 = vst [vmem:[#allocation70_spill] sm:$0xff] %v8553_v10  ;;  %v8577_v44 = vadd.f32 %v8404_v16, %v4220_v11  ;;  %v8594_v11 = vld [vmem:[%s9895_s8 + $0x6] ss:$0 sm:$0xff] }
 0x570   : > { %10143 = vst [vmem:[#allocation59_spill] sm:$0xff] %v8490_v33  ;;  %v6317_v60 = vpop.f32.mrf.mxu1 }
 0x571   : > { %10148 = vst [vmem:[#allocation64_spill] sm:$0xff] %v8517_v35  ;;  %10158 = vst [vmem:[#allocation74_spill] sm:$0xff] %v8577_v44 }
 0x572   : > { %4242 = vmax.xlane.f32.xlu1 %v8481_v41  ;;  %4240 = vmax.xlane.f32.xlu0 %v8478_v58  ;;  %v8502_v58 = vadd.f32 %v6289_v31, %v8404_v16  ;;  %v4472_v31 = vpop.f32.mrf.mxu0  ;;  %v4705_v3 = vpop.f32.mrf.mxu1 }
 0x573   : > { %v8485_v50 = vpop.xlane.xlu1 %3174  ;;  %v8487_v17 = vpop.xlane.xlu0 %3172  ;;  %v8541_v61 = vadd.f32 %v8417_v47, %v4472_v31 }
 0x574   : > { %10145 = vst [vmem:[#allocation61_spill] sm:$0xff] %v8502_v58 }
 0x575   : > { %10152 = vst [vmem:[#allocation68_spill] sm:$0xff] %v8541_v61 }
 0x576   : > { %4510 = vmax.xlane.f32.xlu1 %v8493_v42  ;;  %4508 = vmax.xlane.f32.xlu0 %v8490_v33  ;;  %v8514_v33 = vadd.f32 %v6307_v21, %v8417_v47  ;;  %v6311_v21 = vpop.f32.mrf.mxu0 }
 0x577   : > { %v8497_v45 = vpop.xlane.xlu1 %3442  ;;  %v8499_v41 = vpop.xlane.xlu0 %3440 }
 0x578   : > { %10147 = vst [vmem:[#allocation63_spill] sm:$0xff] %v8514_v33 }
 0x57a   : > { %4254 = vmax.xlane.f32.xlu1 %v8505_v55  ;;  %4252 = vmax.xlane.f32.xlu0 %v8502_v58  ;;  %v8526_v58 = vadd.f32 %v8404_v16, %v4201_v62  ;;  %v4485_v62 = vpop.f32.mrf.mxu0 }
 0x57b   : > { %v8509_v8 = vpop.xlane.xlu1 %3170  ;;  %v8511_v42 = vpop.xlane.xlu0 %3168 }
 0x57c   : > { %10149 = vst [vmem:[#allocation65_spill] sm:$0xff] %v8526_v58 }
 0x57e   : > { %4522 = vmax.xlane.f32.xlu1 %v8517_v35  ;;  %4520 = vmax.xlane.f32.xlu0 %v8514_v33  ;;  %v8538_v33 = vadd.f32 %v8417_v47, %v4469_v7  ;;  %v6312_v7 = vpop.f32.mrf.mxu0 }
 0x57f   : > { %v8521_v43 = vpop.xlane.xlu1 %3438  ;;  %v8523_v55 = vpop.xlane.xlu0 %3436  ;;  %v8565_v63 = vadd.f32 %v6312_v7, %v8417_v47 }
 0x580   : > { %10151 = vst [vmem:[#allocation67_spill] sm:$0xff] %v8538_v33 }
 0x581   : > { %10156 = vst [vmem:[#allocation72_spill] sm:$0xff] %v8565_v63 }
 0x582   : > { %4250 = vmax.xlane.f32.xlu1 %v8529_v1  ;;  %4248 = vmax.xlane.f32.xlu0 %v8526_v58  ;;  %v8550_v58 = vadd.f32 %v6293_v14, %v8404_v16  ;;  %v4488_v14 = vpop.f32.mrf.mxu0 }
 0x583   : > { %v8533_v48 = vpop.xlane.xlu1 %3182  ;;  %v8535_v35 = vpop.xlane.xlu0 %3180  ;;  %v8589_v2 = vadd.f32 %v8417_v47, %v4488_v14  ;;  %v8611_v14 = vld [vmem:[%s9895_s8 + $0x7] ss:$0 sm:$0xff] }
 0x584   : > { %10153 = vst [vmem:[#allocation69_spill] sm:$0xff] %v8550_v58 }
 0x585   : > { %10162 = vst [vmem:[#allocation78_spill] sm:$0xff] %v8589_v2 }
 0x586   : > { %4518 = vmax.xlane.f32.xlu1 %v8541_v61  ;;  %4516 = vmax.xlane.f32.xlu0 %v8538_v33  ;;  %v8562_v33 = vadd.f32 %v6311_v21, %v8417_v47  ;;  %v6335_v21 = vpop.f32.mrf.mxu0 }
 0x587   : > { %v8545_v20 = vpop.xlane.xlu1 %3450  ;;  %v8547_v1 = vpop.xlane.xlu0 %3448 }
 0x588   : > { %10155 = vst [vmem:[#allocation71_spill] sm:$0xff] %v8562_v33 }
 0x58a   : > { %4262 = vmax.xlane.f32.xlu1 %v8553_v10  ;;  %4260 = vmax.xlane.f32.xlu0 %v8550_v58  ;;  %v8574_v58 = vadd.f32 %v8404_v16, %v4217_v36  ;;  %v4973_v36 = vpop.f32.mrf.mxu0  ;;  %v6318_v16 = vpop.f32.mrf.mxu1 }
 0x58b   : > { %v8557_v31 = vpop.xlane.xlu1 %3178  ;;  %v8559_v61 = vpop.xlane.xlu0 %3176 }
 0x58c   : > { %10157 = vst [vmem:[#allocation73_spill] sm:$0xff] %v8574_v58  ;;  %v4708_v34 = vpop.f32.mrf.mxu1 }
 0x58e   : > { %4530 = vmax.xlane.f32.xlu1 %v8565_v63  ;;  %4528 = vmax.xlane.f32.xlu0 %v8562_v33  ;;  %v8586_v33 = vadd.f32 %v8417_v47, %v4485_v62  ;;  %v8603_v62 = vadd.f32 %v6317_v60, %v8594_v11  ;;  %v8606_v47 = vadd.f32 %v6318_v16, %v8594_v11 }
 0x58f   : > { %v8569_v5 = vpop.xlane.xlu1 %3446  ;;  %v8571_v10 = vpop.xlane.xlu0 %3444  ;;  %v8620_v60 = vadd.f32 %v6335_v21, %v8611_v14 }
 0x590   : > { %10161 = vst [vmem:[#allocation77_spill] sm:$0xff] %v8586_v33  ;;  %10165 = vst [vmem:[#allocation81_spill] sm:$0xff] %v8603_v62 }
 0x591   : > { %10166 = vst [vmem:[#allocation82_spill] sm:$0xff] %v8606_v47  ;;  %10169 = vst [vmem:[#allocation85_spill] sm:$0xff] %v8620_v60 }
 0x592   : > { %4258 = vmax.xlane.f32.xlu1 %v8577_v44  ;;  %4256 = vmax.xlane.f32.xlu0 %v8574_v58 }
 0x593   : > { %v8581_v7 = vpop.xlane.xlu1 %3190  ;;  %v8583_v63 = vpop.xlane.xlu0 %3188 }
 0x594   : > { %10159 = vst [vmem:[#allocation75_spill] sm:$0xff] %v8581_v7  ;;  %10160 = vst [vmem:[#allocation76_spill] sm:$0xff] %v8583_v63  ;;  %v6336_v63 = vpop.f32.mrf.mxu0 }
 0x595   : > { %v8623_v16 = vadd.f32 %v6336_v63, %v8611_v14 }
 0x596   : > { %4526 = vmax.xlane.f32.xlu1 %v8589_v2  ;;  %4524 = vmax.xlane.f32.xlu0 %v8586_v33 }
 0x597   : > { %v8598_v58 = vpop.xlane.xlu1 %3458  ;;  %v8600_v44 = vpop.xlane.xlu0 %3456  ;;  %10170 = vst [vmem:[#allocation86_spill] sm:$0xff] %v8623_v16 }
 0x598   : > { %10163 = vst [vmem:[#allocation79_spill] sm:$0xff] %v8598_v58  ;;  %10164 = vst [vmem:[#allocation80_spill] sm:$0xff] %v8600_v44  ;;  %v4976_v44 = vpop.f32.mrf.mxu0  ;;  %v6321_v58 = vpop.f32.mrf.mxu1 }
 0x59a   : > { %4774 = vmax.xlane.f32.xlu1 %v8606_v47  ;;  %4772 = vmax.xlane.f32.xlu0 %v8603_v62  ;;  %v8632_v62 = vadd.f32 %v8594_v11, %v4705_v3  ;;  %v6339_v21 = vpop.f32.mrf.mxu0 }
 0x59b   : > { %v8615_v33 = vpop.xlane.xlu1 %3186  ;;  %v8617_v2 = vpop.xlane.xlu0 %3184 }
 0x59c   : > { %10167 = vst [vmem:[#allocation83_spill] sm:$0xff] %v8615_v33  ;;  %10168 = vst [vmem:[#allocation84_spill] sm:$0xff] %v8617_v2  ;;  %v8635_v2 = vadd.f32 %v8594_v11, %v4708_v34  ;;  %v4721_v33 = vpop.f32.mrf.mxu1  ;;  %v4989_v3 = vpop.f32.mrf.mxu0 }
 0x59d   : > { %10173 = vst [vmem:[#allocation89_spill] sm:$0xff] %v8632_v62 }
 0x59e   : > { %5042 = vmax.xlane.f32.xlu1 %v8623_v16  ;;  %5040 = vmax.xlane.f32.xlu0 %v8620_v60  ;;  %10174 = vst [vmem:[#allocation90_spill] sm:$0xff] %v8635_v2  ;;  %v8644_v60 = vadd.f32 %v8611_v14, %v4973_v36  ;;  %v6340_v36 = vpop.f32.mrf.mxu0 }
 0x59f   : > { %v8627_v7 = vpop.xlane.xlu1 %3454  ;;  %v8629_v47 = vpop.xlane.xlu0 %3452 }
 0x5a0   : > { %10171 = vst [vmem:[#allocation87_spill] sm:$0xff] %v8627_v7  ;;  %10172 = vst [vmem:[#allocation88_spill] sm:$0xff] %v8629_v47  ;;  %v8647_v47 = vadd.f32 %v8611_v14, %v4976_v44  ;;  %v6322_v7 = vpop.f32.mrf.mxu1 }
 0x5a1   : > { %10177 = vst [vmem:[#allocation93_spill] sm:$0xff] %v8644_v60 }
 0x5a2   : > { %4770 = vmax.xlane.f32.xlu1 %v8635_v2  ;;  %4768 = vmax.xlane.f32.xlu0 %v8632_v62  ;;  %10178 = vst [vmem:[#allocation94_spill] sm:$0xff] %v8647_v47  ;;  %v8656_v62 = vadd.f32 %v6321_v58, %v8594_v11  ;;  %v4992_v58 = vpop.f32.mrf.mxu0 }
 0x5a3   : > { %v8639_v63 = vpop.xlane.xlu1 %3702  ;;  %v8641_v16 = vpop.xlane.xlu0 %3700 }
 0x5a4   : > { %10175 = vst [vmem:[#allocation91_spill] sm:$0xff] %v8639_v63  ;;  %10176 = vst [vmem:[#allocation92_spill] sm:$0xff] %v8641_v16  ;;  %v8659_v16 = vadd.f32 %v6322_v7, %v8594_v11  ;;  %v4724_v63 = vpop.f32.mrf.mxu1 }
 0x5a5   : > { %10181 = vst [vmem:[#allocation97_spill] sm:$0xff] %v8656_v62 }
 0x5a6   : > { %5038 = vmax.xlane.f32.xlu1 %v8647_v47  ;;  %5036 = vmax.xlane.f32.xlu0 %v8644_v60  ;;  %10182 = vst [vmem:[#allocation98_spill] sm:$0xff] %v8659_v16  ;;  %v8668_v60 = vadd.f32 %v6339_v21, %v8611_v14  ;;  %v6343_v21 = vpop.f32.mrf.mxu0 }
 0x5a7   : > { %v8651_v34 = vpop.xlane.xlu1 %3970  ;;  %v8653_v2 = vpop.xlane.xlu0 %3968 }
 0x5a8   : > { %10179 = vst [vmem:[#allocation95_spill] sm:$0xff] %v8651_v34  ;;  %10180 = vst [vmem:[#allocation96_spill] sm:$0xff] %v8653_v2  ;;  %v8671_v2 = vadd.f32 %v6340_v36, %v8611_v14  ;;  %v6325_v34 = vpop.f32.mrf.mxu1 }
 0x5a9   : > { %10185 = vst [vmem:[#allocation101_spill] sm:$0xff] %v8668_v60 }
 0x5aa   : > { %4782 = vmax.xlane.f32.xlu1 %v8659_v16  ;;  %4780 = vmax.xlane.f32.xlu0 %v8656_v62  ;;  %10186 = vst [vmem:[#allocation102_spill] sm:$0xff] %v8671_v2  ;;  %v8680_v62 = vadd.f32 %v8594_v11, %v4721_v33  ;;  %v5005_v33 = vpop.f32.mrf.mxu0 }
 0x5ab   : > { %v8663_v44 = vpop.xlane.xlu1 %3698  ;;  %v8665_v47 = vpop.xlane.xlu0 %3696 }
 0x5ac   : > { %10183 = vst [vmem:[#allocation99_spill] sm:$0xff] %v8663_v44  ;;  %10184 = vst [vmem:[#allocation100_spill] sm:$0xff] %v8665_v47  ;;  %v8683_v47 = vadd.f32 %v8594_v11, %v4724_v63  ;;  %v4737_v44 = vpop.f32.mrf.mxu1 }
 0x5ad   : > { %10189 = vst [vmem:[#allocation105_spill] sm:$0xff] %v8680_v62 }
 0x5ae   : > { %5050 = vmax.xlane.f32.xlu1 %v8671_v2  ;;  %5048 = vmax.xlane.f32.xlu0 %v8668_v60  ;;  %10190 = vst [vmem:[#allocation106_spill] sm:$0xff] %v8683_v47  ;;  %v8692_v60 = vadd.f32 %v8611_v14, %v4989_v3  ;;  %v6344_v3 = vpop.f32.mrf.mxu0 }
 0x5af   : > { %v8675_v7 = vpop.xlane.xlu1 %3966  ;;  %v8677_v16 = vpop.xlane.xlu0 %3964 }
 0x5b0   : > { %10187 = vst [vmem:[#allocation103_spill] sm:$0xff] %v8675_v7  ;;  %10188 = vst [vmem:[#allocation104_spill] sm:$0xff] %v8677_v16  ;;  %v8695_v16 = vadd.f32 %v8611_v14, %v4992_v58  ;;  %v6326_v7 = vpop.f32.mrf.mxu1 }
 0x5b1   : > { %10193 = vst [vmem:[#allocation109_spill] sm:$0xff] %v8692_v60 }
 0x5b2   : > { %4778 = vmax.xlane.f32.xlu1 %v8683_v47  ;;  %4776 = vmax.xlane.f32.xlu0 %v8680_v62  ;;  %10194 = vst [vmem:[#allocation110_spill] sm:$0xff] %v8695_v16  ;;  %v8704_v62 = vadd.f32 %v6325_v34, %v8594_v11  ;;  %v5008_v34 = vpop.f32.mrf.mxu0 }
 0x5b3   : > { %v8687_v36 = vpop.xlane.xlu1 %3710  ;;  %v8689_v2 = vpop.xlane.xlu0 %3708 }
 0x5b4   : > { %10191 = vst [vmem:[#allocation107_spill] sm:$0xff] %v8687_v36  ;;  %10192 = vst [vmem:[#allocation108_spill] sm:$0xff] %v8689_v2  ;;  %v8707_v2 = vadd.f32 %v6326_v7, %v8594_v11  ;;  %v4740_v36 = vpop.f32.mrf.mxu1 }
 0x5b5   : > { %10197 = vst [vmem:[#allocation113_spill] sm:$0xff] %v8704_v62 }
 0x5b6   : > { %5046 = vmax.xlane.f32.xlu1 %v8695_v16  ;;  %5044 = vmax.xlane.f32.xlu0 %v8692_v60  ;;  %10198 = vst [vmem:[#allocation114_spill] sm:$0xff] %v8707_v2  ;;  %v8716_v60 = vadd.f32 %v6343_v21, %v8611_v14  ;;  %v6347_v21 = vpop.f32.mrf.mxu0 }
 0x5b7   : > { %v8699_v63 = vpop.xlane.xlu1 %3978  ;;  %v8701_v47 = vpop.xlane.xlu0 %3976 }
 0x5b8   : > { %10195 = vst [vmem:[#allocation111_spill] sm:$0xff] %v8699_v63  ;;  %10196 = vst [vmem:[#allocation112_spill] sm:$0xff] %v8701_v47  ;;  %v8719_v47 = vadd.f32 %v6344_v3, %v8611_v14  ;;  %v6329_v63 = vpop.f32.mrf.mxu1  ;;  %v3194_v3 = vsub.f32 %v8138_v52, %v8439_v49  ;;  %v3462_v52 = vsub.f32 %v8141_v59, %v8437_v26 }
 0x5b9   : > { %10201 = vst [vmem:[#allocation117_spill] sm:$0xff] %v8716_v60  ;;  %v8768_v59 = vadd.f32 %v6347_v21, %v8611_v14 }
 0x5ba   : > { %4790 = vmax.xlane.f32.xlu1 %v8707_v2  ;;  %4788 = vmax.xlane.f32.xlu0 %v8704_v62  ;;  %10202 = vst [vmem:[#allocation118_spill] sm:$0xff] %v8719_v47  ;;  %v8728_v62 = vadd.f32 %v8594_v11, %v4737_v44  ;;  %v8745_v44 = vadd.f32 %v8611_v14, %v5008_v34  ;;  %v3212_v49 = vmul.f32 1.442695, %v3194_v3  ;;  %v3480_v26 = vmul.f32 1.442695, %v3462_v52 }
 0x5bb   : > { %v8711_v58 = vpop.xlane.xlu1 %3706  ;;  %v8713_v16 = vpop.xlane.xlu0 %3704  ;;  %v8758_v34 = vadd.f32 %v6329_v63, %v8594_v11  ;;  %10212 = vst [vmem:[#allocation128_spill] sm:$0xff] %v8768_v59  ;;  %v3192_v63 = vsub.f32 %v8146_v23, %v8451_v39  ;;  %v3460_v39 = vsub.f32 %v8154_v32, %v8463_v12  ;;  %v3199_v12 = vsub.f32 %v8173_v51, %v8485_v50 }
 0x5bc   : > { %10199 = vst [vmem:[#allocation115_spill] sm:$0xff] %v8711_v58  ;;  %10200 = vst [vmem:[#allocation116_spill] sm:$0xff] %v8713_v16  ;;  %v8731_v16 = vadd.f32 %v8594_v11, %v4740_v36  ;;  %v4753_v58 = vpop.f32.mrf.mxu1  ;;  %v3195_v36 = vsub.f32 %v8149_v27, %v8449_v30  ;;  %v3463_v30 = vsub.f32 %v8157_v24, %v8461_v4  ;;  %6474 = vpow2.f32 %v3212_v49 }
 0x5bd   : > { %10205 = vst [vmem:[#allocation121_spill] sm:$0xff] %v8728_v62  ;;  %10209 = vst [vmem:[#allocation125_spill] sm:$0xff] %v8745_v44  ;;  %v3193_v4 = vsub.f32 %v8162_v15, %v8475_v29  ;;  %v8784_v21 = vadd.f32 %v8594_v11, %v4753_v58  ;;  %v3208_v23 = vmul.f32 1.442695, %v3192_v63  ;;  %v3461_v15 = vsub.f32 %v8165_v37, %v8473_v13 }
 0x5be   : > { %5058 = vmax.xlane.f32.xlu1 %v8719_v47  ;;  %5056 = vmax.xlane.f32.xlu0 %v8716_v60  ;;  %10206 = vst [vmem:[#allocation122_spill] sm:$0xff] %v8731_v16  ;;  %10210 = vst [vmem:[#allocation126_spill] sm:$0xff] %v8758_v34  ;;  %v3214_v27 = vmul.f32 1.442695, %v3195_v36  ;;  %v3482_v24 = vmul.f32 1.442695, %v3463_v30  ;;  %v3198_v30 = vsub.f32 %v8170_v53, %v8487_v17 }
 0x5bf   : > { %v8723_v7 = vpop.xlane.xlu1 %3974  ;;  %v8725_v2 = vpop.xlane.xlu0 %3972  ;;  %10214 = vst [vmem:[#allocation130_spill] sm:$0xff] %v8784_v21  ;;  %v3210_v29 = vmul.f32 1.442695, %v3193_v4  ;;  %v3476_v32 = vmul.f32 1.442695, %v3460_v39  ;;  %v3467_v51 = vsub.f32 %v8181_v18, %v8497_v45  ;;  %v3466_v53 = vsub.f32 %v8178_v22, %v8499_v41 }
 0x5c0   : > { %10203 = vst [vmem:[#allocation119_spill] sm:$0xff] %v8723_v7  ;;  %10204 = vst [vmem:[#allocation120_spill] sm:$0xff] %v8725_v2  ;;  %v8742_v2 = vadd.f32 %v8611_v14, %v5005_v33  ;;  %v5021_v7 = vpop.f32.mrf.mxu0  ;;  %6476 = vpow2.f32 %v3214_v27  ;;  %v3478_v13 = vmul.f32 1.442695, %v3461_v15  ;;  %v3220_v63 = vmul.f32 1.442695, %v3198_v30 }
 0x5c1   : > { %6478 = vpow2.f32 %v3480_v26  ;;  %v8800_v58 = vadd.f32 %v8611_v14, %v5021_v7  ;;  %v3222_v7 = vmul.f32 1.442695, %v3199_v12  ;;  %v3197_v18 = vsub.f32 %v8189_v46, %v8509_v8 }
 0x5c2   : > { %4786 = vmax.xlane.f32.xlu1 %v8731_v16  ;;  %4784 = vmax.xlane.f32.xlu0 %v8728_v62  ;;  %10208 = vst [vmem:[#allocation124_spill] sm:$0xff] %v8742_v2  ;;  %v6330_v16 = vpop.f32.mrf.mxu1  ;;  %6480 = vpow2.f32 %v3482_v24  ;;  %v3490_v24 = vmul.f32 1.442695, %v3467_v51  ;;  %v3488_v39 = vmul.f32 1.442695, %v3466_v53  ;;  %v3196_v22 = vsub.f32 %v8186_v28, %v8511_v42 }
 0x5c3   : > { %v8737_v60 = vpop.xlane.xlu1 %3718  ;;  %v8739_v47 = vpop.xlane.xlu0 %3716  ;;  %10216 = vst [vmem:[#allocation132_spill] sm:$0xff] %v8800_v58  ;;  %6482 = vpow2.f32 %v3208_v23  ;;  %v3218_v15 = vmul.f32 1.442695, %v3197_v18  ;;  %v3465_v46 = vsub.f32 %v8197_v19, %v8521_v43  ;;  %v3464_v28 = vsub.f32 %v8194_v6, %v8523_v55 }
 0x5c4   : > { %10207 = vst [vmem:[#allocation123_spill] sm:$0xff] %v8739_v47  ;;  %v8761_v47 = vadd.f32 %v6330_v16, %v8594_v11  ;;  %6484 = vpow2.f32 %v3210_v29  ;;  %v3203_v19 = vsub.f32 %v8205_v54, %v8533_v48  ;;  %v3202_v6 = vsub.f32 %v8202_v9, %v8535_v35 }
 0x5c5   : > { %6486 = vpow2.f32 %v3476_v32  ;;  %v3216_v32 = vmul.f32 1.442695, %v3196_v22  ;;  %v3486_v12 = vmul.f32 1.442695, %v3465_v46  ;;  %v3471_v54 = vsub.f32 %v8213_v0, %v8545_v20 }
 0x5c6   : > { %5054 = vmax.xlane.f32.xlu1 %v8745_v44  ;;  %5052 = vmax.xlane.f32.xlu0 %v8742_v2  ;;  %10211 = vst [vmem:[#allocation127_spill] sm:$0xff] %v8761_v47  ;;  %v6348_v44 = vpop.f32.mrf.mxu0  ;;  %6488 = vpow2.f32 %v3478_v13  ;;  %v3230_v51 = vmul.f32 1.442695, %v3203_v19  ;;  %v3470_v9 = vsub.f32 %v8210_v38, %v8547_v1  ;;  %v3201_v0 = vsub.f32 %v8221_v56, %v8557_v31 }
 0x5c7   : > { %v8753_v62 = vpop.xlane.xlu1 %3986  ;;  %v8755_v33 = vpop.xlane.xlu0 %3984  ;;  %v8777_v36 = vadd.f32 %v6348_v44, %v8611_v14  ;;  %6490 = vpow2.f32 %v3222_v7  ;;  %v3484_v7 = vmul.f32 1.442695, %v3464_v28  ;;  %v3498_v18 = vmul.f32 1.442695, %v3471_v54 }
 0x5c8   : > { %v5024_v27 = vpop.f32.mrf.mxu0  ;;  %6492 = vpow2.f32 %v3220_v63  ;;  %v3200_v38 = vsub.f32 %v8218_v25, %v8559_v61  ;;  %v3226_v46 = vmul.f32 1.442695, %v3201_v0  ;;  %v3469_v56 = vsub.f32 %v8229_v40, %v8569_v5  ;;  %v10229_v40 = vld [vmem:[#allocation75_spill] sm:$0xff]  ;;  %v10230_v5 = vld [vmem:[#allocation8_spill] sm:$0xff] }
 0x5c9   : > { %10213 = vst [vmem:[#allocation129_spill] sm:$0xff] %v8777_v36  ;;  %v8809_v37 = vadd.f32 %v8611_v14, %v5024_v27  ;;  %v8821_v14 = vpop.eup %6474  ;;  %6494 = vpow2.f32 %v3490_v24  ;;  %v3228_v24 = vmul.f32 1.442695, %v3202_v6  ;;  %v3468_v25 = vsub.f32 %v8226_v57, %v8571_v10  ;;  %v10232_v57 = vld [vmem:[#allocation76_spill] sm:$0xff]  ;;  %v10233_v10 = vld [vmem:[#allocation6_spill] sm:$0xff] }
 0x5ca   : > { %4798 = vmax.xlane.f32.xlu1 %v8761_v47  ;;  %4796 = vmax.xlane.f32.xlu0 %v8758_v34  ;;  %v4756_v34 = vpop.f32.mrf.mxu1  ;;  %6496 = vpow2.f32 %v3488_v39  ;;  %v3494_v19 = vmul.f32 1.442695, %v3469_v56 }
 0x5cb   : > { %v8772_v3 = vpop.xlane.xlu1 %3714  ;;  %v8774_v16 = vpop.xlane.xlu0 %3712  ;;  %v8793_v49 = vadd.f32 %v8594_v11, %v4756_v34  ;;  %10217 = vst [vmem:[#allocation133_spill] sm:$0xff] %v8809_v37  ;;  %6498 = vpow2.f32 %v3218_v15  ;;  %v3496_v15 = vmul.f32 1.442695, %v3470_v9  ;;  %v3206_v9 = vsub.f32 %v10233_v10, %v10232_v57  ;;  %v10239_v57 = vld [vmem:[#allocation7_spill] sm:$0xff] }
 0x5cc   : > { %6500 = vpow2.f32 %v3216_v32 }
 0x5cd   : > { %10215 = vst [vmem:[#allocation131_spill] sm:$0xff] %v8793_v49  ;;  %v8825_v17 = vpop.eup %6476  ;;  %6502 = vpow2.f32 %v3486_v12  ;;  %v3224_v12 = vmul.f32 1.442695, %v3200_v38  ;;  %v10236_v38 = vld [vmem:[#allocation5_spill] sm:$0xff] }
 0x5ce   : > { %5066 = vmax.xlane.f32.xlu1 %v8777_v36  ;;  %5064 = vmax.xlane.f32.xlu0 %v8768_v59  ;;  %v8835_v23 = vpop.eup %6478  ;;  %6504 = vpow2.f32 %v3484_v7  ;;  %v3207_v7 = vsub.f32 %v10230_v5, %v10229_v40  ;;  %v10238_v5 = vld [vmem:[#allocation80_spill] sm:$0xff] }
 0x5cf   : > { %v8788_v44 = vpop.xlane.xlu1 %3982  ;;  %v8790_v52 = vpop.xlane.xlu0 %3980  ;;  %10218 = vst [vmem:[#allocation134_spill] sm:$0xff] %v8835_v23  ;;  %6506 = vpow2.f32 %v3230_v51  ;;  %v3474_v10 = vsub.f32 %v10239_v57, %v10238_v5  ;;  %v10244_v5 = vld [vmem:[#allocation84_spill] sm:$0xff]  ;;  %v10245_v57 = vld [vmem:[#allocation9_spill] sm:$0xff] }
 0x5d0   : > { %v8839_v41 = vpop.eup %6480  ;;  %6508 = vpow2.f32 %v3228_v24  ;;  %v3492_v24 = vmul.f32 1.442695, %v3468_v25  ;;  %v3238_v0 = vmul.f32 1.442695, %v3207_v7  ;;  %v3236_v25 = vmul.f32 1.442695, %v3206_v9 }
 0x5d1   : > { %v8849_v27 = vpop.eup %6482  ;;  %6510 = vpow2.f32 %v3498_v18  ;;  %v10241_v7 = vld [vmem:[#allocation83_spill] sm:$0xff]  ;;  %v3504_v9 = vmul.f32 1.442695, %v3474_v10 }
 0x5d2   : > { %4794 = vmax.xlane.f32.xlu1 %v8793_v49  ;;  %4792 = vmax.xlane.f32.xlu0 %v8784_v21  ;;  %10219 = vst [vmem:[#allocation135_spill] sm:$0xff] %v8849_v27  ;;  %v8853_v42 = vpop.eup %6484  ;;  %6512 = vpow2.f32 %v3496_v15  ;;  %v10235_v15 = vld [vmem:[#allocation79_spill] sm:$0xff] }
 0x5d3   : > { %v8804_v11 = vpop.xlane.xlu1 %3726  ;;  %v8806_v34 = vpop.xlane.xlu0 %3724  ;;  %10220 = vst [vmem:[#allocation136_spill] sm:$0xff] %v8853_v42  ;;  %6514 = vpow2.f32 %v3226_v46  ;;  %v3475_v46 = vsub.f32 %v10236_v38, %v10235_v15  ;;  %v10242_v15 = vld [vmem:[#allocation10_spill] sm:$0xff] }
 0x5d4   : > { %v8863_v30 = vpop.eup %6486  ;;  %6516 = vpow2.f32 %v3224_v12  ;;  %v3205_v38 = vsub.f32 %v10242_v15, %v10241_v7  ;;  %v10248_v7 = vld [vmem:[#allocation12_spill] sm:$0xff] }
 0x5d5   : > { %10221 = vst [vmem:[#allocation137_spill] sm:$0xff] %v8863_v30  ;;  %v8867_v55 = vpop.eup %6488  ;;  %6518 = vpow2.f32 %v3494_v19  ;;  %v3506_v19 = vmul.f32 1.442695, %v3475_v46  ;;  %v10247_v46 = vld [vmem:[#allocation87_spill] sm:$0xff] }
 0x5d6   : > { %5062 = vmax.xlane.f32.xlu1 %v8809_v37  ;;  %5060 = vmax.xlane.f32.xlu0 %v8800_v58  ;;  %10222 = vst [vmem:[#allocation138_spill] sm:$0xff] %v8867_v55  ;;  %v8877_v53 = vpop.eup %6490  ;;  %6520 = vpow2.f32 %v3492_v24  ;;  %v3204_v37 = vsub.f32 %v10245_v57, %v10244_v5  ;;  %v3473_v15 = vsub.f32 %v10248_v7, %v10247_v46  ;;  %v10250_v5 = vld [vmem:[#allocation88_spill] sm:$0xff]  ;;  %v10251_v57 = vld [vmem:[#allocation11_spill] sm:$0xff]  ;;  %v10254_v46 = vld [vmem:[#allocation14_spill] sm:$0xff] }
 0x5d7   : > { %v8817_v50 = vpop.xlane.xlu1 %3994  ;;  %v8819_v26 = vpop.xlane.xlu0 %3992  ;;  %10223 = vst [vmem:[#allocation139_spill] sm:$0xff] %v8877_v53  ;;  %6522 = vpow2.f32 %v3238_v0  ;;  %v3234_v0 = vmul.f32 1.442695, %v3205_v38  ;;  %v3472_v2 = vsub.f32 %v10251_v57, %v10250_v5  ;;  %v10253_v38 = vld [vmem:[#allocation91_spill] sm:$0xff]  ;;  %v10256_v5 = vld [vmem:[#allocation92_spill] sm:$0xff]  ;;  %v10257_v57 = vld [vmem:[#allocation13_spill] sm:$0xff] }
 0x5d8   : > { %v8881_v35 = vpop.eup %6492  ;;  %6524 = vpow2.f32 %v3236_v25  ;;  %v3232_v10 = vmul.f32 1.442695, %v3204_v37  ;;  %v3731_v7 = vsub.f32 %v10254_v46, %v10253_v38  ;;  %v10260_v38 = vld [vmem:[#allocation16_spill] sm:$0xff] }
 0x5d9   : > { %10224 = vst [vmem:[#allocation140_spill] sm:$0xff] %v8881_v35  ;;  %v8891_v22 = vpop.eup %6494  ;;  %6526 = vpow2.f32 %v3506_v19  ;;  %v3502_v19 = vmul.f32 1.442695, %v3473_v15  ;;  %v3500_v37 = vmul.f32 1.442695, %v3472_v2  ;;  %v10259_v15 = vld [vmem:[#allocation95_spill] sm:$0xff] }
 0x5da   : > { %3246 = vadd.xlane.f32.xlu1 %v8825_v17  ;;  %3244 = vadd.xlane.f32.xlu0 %v8821_v14  ;;  %10225 = vst [vmem:[#allocation141_spill] sm:$0xff] %v8891_v22  ;;  %v8895_v1 = vpop.eup %6496  ;;  %6528 = vpow2.f32 %v3504_v9  ;;  %v3999_v46 = vsub.f32 %v10260_v38, %v10259_v15  ;;  %v10266_v15 = vld [vmem:[#allocation18_spill] sm:$0xff] }
 0x5db   : > { %v8831_v45 = vpop.xlane.xlu1 %3722  ;;  %v8833_v4 = vpop.xlane.xlu0 %3720  ;;  %10226 = vst [vmem:[#allocation142_spill] sm:$0xff] %v8895_v1 }
 0x5dc   : > { %v8905_v28 = vpop.eup %6498  ;;  %6530 = vpow2.f32 %v3234_v0  ;;  %v3750_v0 = vmul.f32 1.442695, %v3731_v7  ;;  %v10265_v7 = vld [vmem:[#allocation99_spill] sm:$0xff] }
 0x5dd   : > { %10227 = vst [vmem:[#allocation143_spill] sm:$0xff] %v8905_v28  ;;  %v8909_v61 = vpop.eup %6500  ;;  %6532 = vpow2.f32 %v3232_v10  ;;  %v3729_v38 = vsub.f32 %v10266_v15, %v10265_v7  ;;  %v10272_v7 = vld [vmem:[#allocation20_spill] sm:$0xff] }
 0x5de   : > { %3514 = vadd.xlane.f32.xlu1 %v8839_v41  ;;  %3512 = vadd.xlane.f32.xlu0 %v8835_v23  ;;  %10228 = vst [vmem:[#allocation144_spill] sm:$0xff] %v8909_v61  ;;  %v8919_v54 = vpop.eup %6502  ;;  %6534 = vpow2.f32 %v3502_v19  ;;  %v4018_v19 = vmul.f32 1.442695, %v3999_v46  ;;  %v10271_v46 = vld [vmem:[#allocation103_spill] sm:$0xff] }
 0x5df   : > { %v8845_v8 = vpop.xlane.xlu1 %3990  ;;  %v8847_v29 = vpop.xlane.xlu0 %3988  ;;  %10231 = vst [vmem:[#allocation75_spill] sm:$0xff] %v8919_v54  ;;  %v3997_v15 = vsub.f32 %v10272_v7, %v10271_v46  ;;  %v10278_v46 = vld [vmem:[#allocation22_spill] sm:$0xff] }
 0x5e0   : > { %v8923_v18 = vpop.eup %6504  ;;  %6536 = vpow2.f32 %v3500_v37 }
 0x5e1   : > { %10234 = vst [vmem:[#allocation8_spill] sm:$0xff] %v8923_v18  ;;  %v8933_v12 = vpop.eup %6506  ;;  %6538 = vpow2.f32 %v3750_v0  ;;  %v3746_v0 = vmul.f32 1.442695, %v3729_v38  ;;  %v10277_v38 = vld [vmem:[#allocation107_spill] sm:$0xff] }
 0x5e2   : > { %3242 = vadd.xlane.f32.xlu1 %v8853_v42  ;;  %3240 = vadd.xlane.f32.xlu0 %v8849_v27  ;;  %10237 = vst [vmem:[#allocation76_spill] sm:$0xff] %v8933_v12  ;;  %v8937_v59 = vpop.eup %6508  ;;  %v3735_v7 = vsub.f32 %v10278_v46, %v10277_v38  ;;  %v10284_v38 = vld [vmem:[#allocation24_spill] sm:$0xff] }
 0x5e3   : > { %v8859_v43 = vpop.xlane.xlu1 %4238  ;;  %v8861_v13 = vpop.xlane.xlu0 %4236  ;;  %10240 = vst [vmem:[#allocation6_spill] sm:$0xff] %v8937_v59 }
 0x5e4   : > { %v8947_v24 = vpop.eup %6510 }
 0x5e5   : > { %10243 = vst [vmem:[#allocation79_spill] sm:$0xff] %v8947_v24  ;;  %v8951_v21 = vpop.eup %6512 }
 0x5e6   : > { %3510 = vadd.xlane.f32.xlu1 %v8867_v55  ;;  %3508 = vadd.xlane.f32.xlu0 %v8863_v30  ;;  %10246 = vst [vmem:[#allocation5_spill] sm:$0xff] %v8951_v21  ;;  %v8961_v25 = vpop.eup %6514 }
 0x5e7   : > { %v8873_v48 = vpop.xlane.xlu1 %4506  ;;  %v8875_v63 = vpop.xlane.xlu0 %4504  ;;  %10249 = vst [vmem:[#allocation80_spill] sm:$0xff] %v8961_v25 }
 0x5ea   : > { %3254 = vadd.xlane.f32.xlu1 %v8877_v53  ;;  %3252 = vadd.xlane.f32.xlu0 %v8881_v35 }
 0x5eb   : > { %v8887_v20 = vpop.xlane.xlu1 %4234  ;;  %v8889_v39 = vpop.xlane.xlu0 %4232 }
 0x5ee   : > { %3522 = vadd.xlane.f32.xlu1 %v8891_v22  ;;  %3520 = vadd.xlane.f32.xlu0 %v8895_v1 }
 0x5ef   : > { %v8901_v31 = vpop.xlane.xlu1 %4502  ;;  %v8903_v32 = vpop.xlane.xlu0 %4500 }
 0x5f2   : > { %3250 = vadd.xlane.f32.xlu1 %v8905_v28  ;;  %3248 = vadd.xlane.f32.xlu0 %v8909_v61 }
 0x5f3   : > { %v8915_v6 = vpop.xlane.xlu1 %4246  ;;  %v8917_v51 = vpop.xlane.xlu0 %4244 }
 0x5f6   : > { %3518 = vadd.xlane.f32.xlu1 %v8919_v54  ;;  %3516 = vadd.xlane.f32.xlu0 %v8923_v18 }
 0x5f7   : > { %v8929_v56 = vpop.xlane.xlu1 %4514  ;;  %v8931_v40 = vpop.xlane.xlu0 %4512 }
 0x5fa   : > { %3262 = vadd.xlane.f32.xlu1 %v8933_v12  ;;  %3260 = vadd.xlane.f32.xlu0 %v8937_v59  ;;  %v8965_v59 = vpop.eup %6516  ;;  %v3730_v12 = vsub.f32 %v10257_v57, %v10256_v5  ;;  %v10262_v5 = vld [vmem:[#allocation96_spill] sm:$0xff]  ;;  %v10263_v57 = vld [vmem:[#allocation15_spill] sm:$0xff] }
 0x5fb   : > { %v8943_v36 = vpop.xlane.xlu1 %4242  ;;  %v8945_v58 = vpop.xlane.xlu0 %4240  ;;  %10252 = vst [vmem:[#allocation7_spill] sm:$0xff] %v8965_v59  ;;  %v3998_v54 = vsub.f32 %v10263_v57, %v10262_v5  ;;  %v10268_v5 = vld [vmem:[#allocation100_spill] sm:$0xff]  ;;  %v10269_v57 = vld [vmem:[#allocation17_spill] sm:$0xff] }
 0x5fc   : > { %v8975_v9 = vpop.eup %6518  ;;  %v3748_v2 = vmul.f32 1.442695, %v3730_v12  ;;  %v3728_v28 = vsub.f32 %v10269_v57, %v10268_v5  ;;  %v10274_v5 = vld [vmem:[#allocation104_spill] sm:$0xff]  ;;  %v10275_v57 = vld [vmem:[#allocation19_spill] sm:$0xff] }
 0x5fd   : > { %10255 = vst [vmem:[#allocation83_spill] sm:$0xff] %v8975_v9  ;;  %v8979_v18 = vpop.eup %6520  ;;  %v4016_v12 = vmul.f32 1.442695, %v3998_v54  ;;  %v3996_v22 = vsub.f32 %v10275_v57, %v10274_v5  ;;  %v10280_v5 = vld [vmem:[#allocation108_spill] sm:$0xff]  ;;  %v10281_v57 = vld [vmem:[#allocation21_spill] sm:$0xff] }
 0x5fe   : > { %3530 = vadd.xlane.f32.xlu1 %v8947_v24  ;;  %3528 = vadd.xlane.f32.xlu0 %v8951_v21  ;;  %10258 = vst [vmem:[#allocation10_spill] sm:$0xff] %v8979_v18  ;;  %v8989_v10 = vpop.eup %6522  ;;  %6540 = vpow2.f32 %v3748_v2  ;;  %v3744_v54 = vmul.f32 1.442695, %v3728_v28  ;;  %v3734_v53 = vsub.f32 %v10281_v57, %v10280_v5  ;;  %v10286_v5 = vld [vmem:[#allocation112_spill] sm:$0xff]  ;;  %v10287_v57 = vld [vmem:[#allocation23_spill] sm:$0xff] }
 0x5ff   : > { %v8957_v49 = vpop.xlane.xlu1 %4510  ;;  %v8959_v47 = vpop.xlane.xlu0 %4508  ;;  %10261 = vst [vmem:[#allocation84_spill] sm:$0xff] %v8989_v10  ;;  %6542 = vpow2.f32 %v4018_v19  ;;  %v4014_v19 = vmul.f32 1.442695, %v3997_v15  ;;  %v4012_v28 = vmul.f32 1.442695, %v3996_v22  ;;  %v10283_v15 = vld [vmem:[#allocation111_spill] sm:$0xff]  ;;  %v4002_v55 = vsub.f32 %v10287_v57, %v10286_v5 }
 0x600   : > { %v8993_v61 = vpop.eup %6524  ;;  %6544 = vpow2.f32 %v4016_v12  ;;  %v4003_v46 = vsub.f32 %v10284_v38, %v10283_v15  ;;  %v3756_v22 = vmul.f32 1.442695, %v3734_v53  ;;  %v10290_v15 = vld [vmem:[#allocation26_spill] sm:$0xff]  ;;  %v10294_v5 = vld [vmem:[#allocation116_spill] sm:$0xff]  ;;  %v10295_v57 = vld [vmem:[#allocation25_spill] sm:$0xff] }
 0x601   : > { %10264 = vst [vmem:[#allocation9_spill] sm:$0xff] %v8993_v61  ;;  %v9003_v37 = vpop.eup %6526  ;;  %6546 = vpow2.f32 %v3746_v0  ;;  %v3758_v0 = vmul.f32 1.442695, %v3735_v7  ;;  %v10289_v7 = vld [vmem:[#allocation115_spill] sm:$0xff]  ;;  %v4024_v53 = vmul.f32 1.442695, %v4002_v55  ;;  %v3732_v42 = vsub.f32 %v10295_v57, %v10294_v5 }
 0x602   : > { %3258 = vadd.xlane.f32.xlu1 %v8961_v25  ;;  %3256 = vadd.xlane.f32.xlu0 %v8965_v59  ;;  %10267 = vst [vmem:[#allocation87_spill] sm:$0xff] %v9003_v37  ;;  %v9007_v1 = vpop.eup %6528  ;;  %6548 = vpow2.f32 %v3744_v54  ;;  %v3733_v38 = vsub.f32 %v10290_v15, %v10289_v7  ;;  %v10298_v7 = vld [vmem:[#allocation28_spill] sm:$0xff]  ;;  %v10302_v57 = vld [vmem:[#allocation27_spill] sm:$0xff] }
 0x603   : > { %v8971_v21 = vpop.xlane.xlu1 %4254  ;;  %v8973_v24 = vpop.xlane.xlu0 %4252  ;;  %10270 = vst [vmem:[#allocation12_spill] sm:$0xff] %v9007_v1  ;;  %6550 = vpow2.f32 %v4014_v19  ;;  %v4026_v19 = vmul.f32 1.442695, %v4003_v46  ;;  %v10297_v46 = vld [vmem:[#allocation119_spill] sm:$0xff]  ;;  %v3752_v55 = vmul.f32 1.442695, %v3732_v42 }
 0x604   : > { %v9017_v2 = vpop.eup %6530  ;;  %6552 = vpow2.f32 %v4012_v28  ;;  %v4001_v15 = vsub.f32 %v10298_v7, %v10297_v46  ;;  %v10301_v5 = vld [vmem:[#allocation120_spill] sm:$0xff] }
 0x605   : > { %10273 = vst [vmem:[#allocation88_spill] sm:$0xff] %v9017_v2  ;;  %v9021_v35 = vpop.eup %6532  ;;  %6554 = vpow2.f32 %v3758_v0  ;;  %v3754_v0 = vmul.f32 1.442695, %v3733_v38  ;;  %v10304_v38 = vld [vmem:[#allocation30_spill] sm:$0xff] }
 0x606   : > { %3526 = vadd.xlane.f32.xlu1 %v8975_v9  ;;  %3524 = vadd.xlane.f32.xlu0 %v8979_v18  ;;  %10276 = vst [vmem:[#allocation11_spill] sm:$0xff] %v9021_v35  ;;  %v9031_v12 = vpop.eup %6534  ;;  %6556 = vpow2.f32 %v3756_v22  ;;  %v3739_v46 = vsub.f32 %v10304_v38, %v8737_v60  ;;  %v10309_v60 = vld [vmem:[#allocation32_spill] sm:$0xff] }
 0x607   : > { %v8985_v59 = vpop.xlane.xlu1 %4522  ;;  %v8987_v25 = vpop.xlane.xlu0 %4520  ;;  %10279 = vst [vmem:[#allocation91_spill] sm:$0xff] %v9031_v12  ;;  %6558 = vpow2.f32 %v4026_v19  ;;  %v4022_v19 = vmul.f32 1.442695, %v4001_v15  ;;  %v4007_v15 = vsub.f32 %v10309_v60, %v8753_v62  ;;  %v10313_v62 = vld [vmem:[#allocation34_spill] sm:$0xff] }
 0x608   : > { %v9035_v30 = vpop.eup %6536  ;;  %6560 = vpow2.f32 %v4024_v53 }
 0x609   : > { %10282 = vst [vmem:[#allocation14_spill] sm:$0xff] %v9035_v30  ;;  %v9045_v54 = vpop.eup %6538  ;;  %6562 = vpow2.f32 %v3754_v0  ;;  %v3766_v0 = vmul.f32 1.442695, %v3739_v46  ;;  %v3737_v46 = vsub.f32 %v10313_v62, %v8772_v3  ;;  %v10317_v3 = vld [vmem:[#allocation36_spill] sm:$0xff] }
 0x60a   : > { %3270 = vadd.xlane.f32.xlu1 %v8989_v10  ;;  %3268 = vadd.xlane.f32.xlu0 %v8993_v61  ;;  %10285 = vst [vmem:[#allocation92_spill] sm:$0xff] %v9045_v54  ;;  %6564 = vpow2.f32 %v3752_v55 }
 0x60b   : > { %v8999_v18 = vpop.xlane.xlu1 %4250  ;;  %v9001_v9 = vpop.xlane.xlu0 %4248  ;;  %6566 = vpow2.f32 %v4022_v19  ;;  %v4034_v19 = vmul.f32 1.442695, %v4007_v15  ;;  %v4005_v15 = vsub.f32 %v10317_v3, %v8788_v44  ;;  %v10321_v44 = vld [vmem:[#allocation38_spill] sm:$0xff] }
 0x60c   : > { %v9049_v27 = vpop.eup %6540 }
 0x60d   : > { %10288 = vst [vmem:[#allocation13_spill] sm:$0xff] %v9049_v27  ;;  %v9059_v28 = vpop.eup %6542 }
 0x60e   : > { %3538 = vadd.xlane.f32.xlu1 %v9003_v37  ;;  %3536 = vadd.xlane.f32.xlu0 %v9007_v1  ;;  %10293 = vst [vmem:[#allocation96_spill] sm:$0xff] %v9059_v28  ;;  %v9063_v23 = vpop.eup %6544 }
 0x60f   : > { %v9013_v61 = vpop.xlane.xlu1 %4518  ;;  %v9015_v10 = vpop.xlane.xlu0 %4516  ;;  %10296 = vst [vmem:[#allocation15_spill] sm:$0xff] %v9063_v23 }
 0x610   : > { %v9073_v22 = vpop.eup %6546 }
 0x611   : > { %10300 = vst [vmem:[#allocation18_spill] sm:$0xff] %v9073_v22 }
 0x612   : > { %3266 = vadd.xlane.f32.xlu1 %v9017_v2  ;;  %3264 = vadd.xlane.f32.xlu0 %v9021_v35 }
 0x613   : > { %v9027_v1 = vpop.xlane.xlu1 %4262  ;;  %v9029_v37 = vpop.xlane.xlu0 %4260 }
 0x616   : > { %3534 = vadd.xlane.f32.xlu1 %v9031_v12  ;;  %3532 = vadd.xlane.f32.xlu0 %v9035_v30 }
 0x617   : > { %v9041_v35 = vpop.xlane.xlu1 %4530  ;;  %v9043_v2 = vpop.xlane.xlu0 %4528 }
 0x61a   : > { %3782 = vadd.xlane.f32.xlu1 %v9045_v54  ;;  %3780 = vadd.xlane.f32.xlu0 %v9049_v27 }
 0x61b   : > { %v9055_v30 = vpop.xlane.xlu1 %4258  ;;  %v9057_v12 = vpop.xlane.xlu0 %4256 }
 0x61c   : > { %10291 = vst [vmem:[#allocation95_spill] sm:$0xff] %v9055_v30  ;;  %10292 = vst [vmem:[#allocation16_spill] sm:$0xff] %v9057_v12  ;;  %v4000_v12 = vsub.f32 %v10302_v57, %v10301_v5  ;;  %v9077_v30 = vpop.eup %6548  ;;  %v10306_v5 = vld [vmem:[#allocation123_spill] sm:$0xff]  ;;  %v10307_v57 = vld [vmem:[#allocation29_spill] sm:$0xff] }
 0x61d   : > { %10303 = vst [vmem:[#allocation100_spill] sm:$0xff] %v9077_v30  ;;  %v9087_v53 = vpop.eup %6550 }
 0x61e   : > { %4050 = vadd.xlane.f32.xlu1 %v9059_v28  ;;  %4048 = vadd.xlane.f32.xlu0 %v9063_v23  ;;  %10305 = vst [vmem:[#allocation17_spill] sm:$0xff] %v9087_v53  ;;  %v4020_v42 = vmul.f32 1.442695, %v4000_v12  ;;  %v3738_v28 = vsub.f32 %v10307_v57, %v10306_v5  ;;  %v10311_v5 = vld [vmem:[#allocation31_spill] sm:$0xff] }
 0x61f   : > { %v9069_v27 = vpop.xlane.xlu1 %4526  ;;  %v9071_v54 = vpop.xlane.xlu0 %4524  ;;  %v4006_v57 = vsub.f32 %v10311_v5, %v8755_v33  ;;  %v10315_v33 = vld [vmem:[#allocation33_spill] sm:$0xff] }
 0x620   : > { %10299 = vst [vmem:[#allocation99_spill] sm:$0xff] %v9071_v54  ;;  %v9091_v54 = vpop.eup %6552  ;;  %6568 = vpow2.f32 %v4020_v42  ;;  %v3764_v12 = vmul.f32 1.442695, %v3738_v28  ;;  %v3736_v5 = vsub.f32 %v10315_v33, %v8774_v16  ;;  %v10319_v16 = vld [vmem:[#allocation35_spill] sm:$0xff] }
 0x621   : > { %10308 = vst [vmem:[#allocation103_spill] sm:$0xff] %v9091_v54  ;;  %v9101_v55 = vpop.eup %6554  ;;  %6570 = vpow2.f32 %v3766_v0  ;;  %v4032_v28 = vmul.f32 1.442695, %v4006_v57  ;;  %v3762_v0 = vmul.f32 1.442695, %v3737_v46  ;;  %v4004_v33 = vsub.f32 %v10319_v16, %v8790_v52  ;;  %v10323_v52 = vld [vmem:[#allocation37_spill] sm:$0xff] }
 0x622   : > { %3778 = vadd.xlane.f32.xlu1 %v9073_v22  ;;  %3776 = vadd.xlane.f32.xlu0 %v9077_v30  ;;  %10310 = vst [vmem:[#allocation20_spill] sm:$0xff] %v9101_v55  ;;  %v9105_v22 = vpop.eup %6556  ;;  %6572 = vpow2.f32 %v3764_v12  ;;  %v3760_v57 = vmul.f32 1.442695, %v3736_v5  ;;  %v3743_v46 = vsub.f32 %v10321_v44, %v8804_v11  ;;  %v3742_v16 = vsub.f32 %v10323_v52, %v8806_v34  ;;  %v10325_v11 = vld [vmem:[#allocation40_spill] sm:$0xff]  ;;  %v10327_v34 = vld [vmem:[#allocation39_spill] sm:$0xff] }
 0x623   : > { %v9083_v7 = vpop.xlane.xlu1 %4774  ;;  %v9085_v23 = vpop.xlane.xlu0 %4772  ;;  %10312 = vst [vmem:[#allocation104_spill] sm:$0xff] %v9105_v22  ;;  %6574 = vpow2.f32 %v4034_v19  ;;  %v4030_v19 = vmul.f32 1.442695, %v4005_v15  ;;  %v4028_v5 = vmul.f32 1.442695, %v4004_v33  ;;  %v4011_v15 = vsub.f32 %v10325_v11, %v8817_v50  ;;  %v10329_v50 = vld [vmem:[#allocation42_spill] sm:$0xff] }
 0x624   : > { %v9115_v42 = vpop.eup %6558  ;;  %6576 = vpow2.f32 %v4032_v28  ;;  %v3772_v33 = vmul.f32 1.442695, %v3742_v16  ;;  %v4010_v52 = vsub.f32 %v10327_v34, %v8819_v26  ;;  %v10331_v26 = vld [vmem:[#allocation41_spill] sm:$0xff] }
 0x625   : > { %10314 = vst [vmem:[#allocation19_spill] sm:$0xff] %v9115_v42  ;;  %6578 = vpow2.f32 %v3762_v0  ;;  %v3774_v0 = vmul.f32 1.442695, %v3743_v46  ;;  %v3741_v46 = vsub.f32 %v10329_v50, %v8831_v45  ;;  %v3740_v34 = vsub.f32 %v10331_v26, %v8833_v4  ;;  %v10333_v45 = vld [vmem:[#allocation44_spill] sm:$0xff]  ;;  %v10335_v4 = vld [vmem:[#allocation43_spill] sm:$0xff] }
 0x626   : > { %4046 = vadd.xlane.f32.xlu1 %v9087_v53  ;;  %4044 = vadd.xlane.f32.xlu0 %v9091_v54  ;;  %v9119_v53 = vpop.eup %6560  ;;  %6580 = vpow2.f32 %v3760_v57  ;;  %v4040_v16 = vmul.f32 1.442695, %v4010_v52  ;;  %v4008_v26 = vsub.f32 %v10335_v4, %v8847_v29  ;;  %v10339_v29 = vld [vmem:[#allocation45_spill] sm:$0xff] }
 0x627   : > { %v9097_v38 = vpop.xlane.xlu1 %5042  ;;  %v9099_v30 = vpop.xlane.xlu0 %5040  ;;  %10316 = vst [vmem:[#allocation107_spill] sm:$0xff] %v9119_v53  ;;  %6582 = vpow2.f32 %v4030_v19  ;;  %v4042_v19 = vmul.f32 1.442695, %v4011_v15  ;;  %v4009_v15 = vsub.f32 %v10333_v45, %v8845_v8  ;;  %v3768_v52 = vmul.f32 1.442695, %v3740_v34  ;;  %v10337_v8 = vld [vmem:[#allocation46_spill] sm:$0xff] }
 0x628   : > { %v9129_v12 = vpop.eup %6562  ;;  %6584 = vpow2.f32 %v4028_v5  ;;  %v4036_v34 = vmul.f32 1.442695, %v4008_v26  ;;  %v4266_v4 = vsub.f32 %v10339_v29, %v8861_v13  ;;  %v10343_v13 = vld [vmem:[#allocation47_spill] sm:$0xff] }
 0x629   : > { %10318 = vst [vmem:[#allocation22_spill] sm:$0xff] %v9129_v12  ;;  %6586 = vpow2.f32 %v3774_v0  ;;  %v3770_v0 = vmul.f32 1.442695, %v3741_v46  ;;  %v4267_v46 = vsub.f32 %v10337_v8, %v8859_v43  ;;  %v10341_v43 = vld [vmem:[#allocation48_spill] sm:$0xff]  ;;  %v4534_v29 = vsub.f32 %v10343_v13, %v8875_v63  ;;  %v10347_v63 = vld [vmem:[#allocation49_spill] sm:$0xff] }
 0x62a   : > { %3790 = vadd.xlane.f32.xlu1 %v9101_v55  ;;  %3788 = vadd.xlane.f32.xlu0 %v9105_v22  ;;  %v9133_v55 = vpop.eup %6564  ;;  %6588 = vpow2.f32 %v3772_v33  ;;  %v4284_v26 = vmul.f32 1.442695, %v4266_v4  ;;  %v4264_v13 = vsub.f32 %v10347_v63, %v8889_v39  ;;  %v10351_v39 = vld [vmem:[#allocation51_spill] sm:$0xff] }
 0x62b   : > { %v9111_v60 = vpop.xlane.xlu1 %4770  ;;  %v9113_v54 = vpop.xlane.xlu0 %4768  ;;  %10320 = vst [vmem:[#allocation108_spill] sm:$0xff] %v9133_v55  ;;  %6590 = vpow2.f32 %v4042_v19  ;;  %v4038_v19 = vmul.f32 1.442695, %v4009_v15  ;;  %v4535_v15 = vsub.f32 %v10341_v43, %v8873_v48  ;;  %v10345_v48 = vld [vmem:[#allocation50_spill] sm:$0xff]  ;;  %v4552_v4 = vmul.f32 1.442695, %v4534_v29 }
 0x62c   : > { %v9143_v28 = vpop.eup %6566  ;;  %6592 = vpow2.f32 %v4040_v16  ;;  %v4280_v29 = vmul.f32 1.442695, %v4264_v13  ;;  %v4532_v63 = vsub.f32 %v10351_v39, %v8903_v32  ;;  %v10355_v32 = vld [vmem:[#allocation53_spill] sm:$0xff] }
 0x62d   : > { %10322 = vst [vmem:[#allocation21_spill] sm:$0xff] %v9143_v28  ;;  %6594 = vpow2.f32 %v3770_v0  ;;  %v4286_v0 = vmul.f32 1.442695, %v4267_v46  ;;  %v4265_v46 = vsub.f32 %v10345_v48, %v8887_v20  ;;  %v10349_v20 = vld [vmem:[#allocation52_spill] sm:$0xff]  ;;  %v4270_v39 = vsub.f32 %v10355_v32, %v8917_v51  ;;  %v10359_v51 = vld [vmem:[#allocation55_spill] sm:$0xff] }
 0x62e   : > { %4058 = vadd.xlane.f32.xlu1 %v9115_v42  ;;  %4056 = vadd.xlane.f32.xlu0 %v9119_v53  ;;  %v9147_v42 = vpop.eup %6568  ;;  %6596 = vpow2.f32 %v3768_v52  ;;  %v4548_v13 = vmul.f32 1.442695, %v4532_v63  ;;  %v4538_v32 = vsub.f32 %v10359_v51, %v8931_v40  ;;  %v10364_v51 = vld [vmem:[#allocation60_spill] sm:$0xff] }
 0x62f   : > { %v9125_v62 = vpop.xlane.xlu1 %5038  ;;  %v9127_v22 = vpop.xlane.xlu0 %5036  ;;  %10324 = vst [vmem:[#allocation111_spill] sm:$0xff] %v9147_v42  ;;  %6598 = vpow2.f32 %v4038_v19  ;;  %v4554_v19 = vmul.f32 1.442695, %v4535_v15  ;;  %v4533_v15 = vsub.f32 %v10349_v20, %v8901_v31  ;;  %v10353_v31 = vld [vmem:[#allocation54_spill] sm:$0xff]  ;;  %v4292_v63 = vmul.f32 1.442695, %v4270_v39 }
 0x630   : > { %v9157_v57 = vpop.eup %6570  ;;  %6600 = vpow2.f32 %v4036_v34  ;;  %v4560_v40 = vmul.f32 1.442695, %v4538_v32 }
 0x631   : > { %10326 = vst [vmem:[#allocation24_spill] sm:$0xff] %v9157_v57  ;;  %6602 = vpow2.f32 %v4286_v0  ;;  %v4282_v0 = vmul.f32 1.442695, %v4265_v46  ;;  %v4271_v46 = vsub.f32 %v10353_v31, %v8915_v6  ;;  %v10357_v6 = vld [vmem:[#allocation56_spill] sm:$0xff] }
 0x632   : > { %3786 = vadd.xlane.f32.xlu1 %v9129_v12  ;;  %3784 = vadd.xlane.f32.xlu0 %v9133_v55  ;;  %v9161_v12 = vpop.eup %6572  ;;  %6604 = vpow2.f32 %v4284_v26 }
 0x633   : > { %v9139_v3 = vpop.xlane.xlu1 %4782  ;;  %v9141_v53 = vpop.xlane.xlu0 %4780  ;;  %10328 = vst [vmem:[#allocation112_spill] sm:$0xff] %v9161_v12 }
 0x634   : > { %v9171_v5 = vpop.eup %6574  ;;  %6606 = vpow2.f32 %v4554_v19  ;;  %v4550_v19 = vmul.f32 1.442695, %v4533_v15  ;;  %v4539_v15 = vsub.f32 %v10357_v6, %v8929_v56 }
 0x635   : > { %10330 = vst [vmem:[#allocation23_spill] sm:$0xff] %v9171_v5 }
 0x636   : > { %4054 = vadd.xlane.f32.xlu1 %v9143_v28  ;;  %4052 = vadd.xlane.f32.xlu0 %v9147_v42  ;;  %v9175_v28 = vpop.eup %6576  ;;  %6608 = vpow2.f32 %v4552_v4  ;;  %v4562_v56 = vmul.f32 1.442695, %v4539_v15 }
 0x637   : > { %v9153_v44 = vpop.xlane.xlu1 %5050  ;;  %v9155_v55 = vpop.xlane.xlu0 %5048  ;;  %10332 = vst [vmem:[#allocation115_spill] sm:$0xff] %v9175_v28 }
 0x638   : > { %v9185_v33 = vpop.eup %6578  ;;  %6610 = vpow2.f32 %v4282_v0  ;;  %v4294_v0 = vmul.f32 1.442695, %v4271_v46  ;;  %v10362_v46 = vld [vmem:[#allocation57_spill] sm:$0xff] }
 0x639   : > { %10334 = vst [vmem:[#allocation26_spill] sm:$0xff] %v9185_v33  ;;  %v4268_v6 = vsub.f32 %v10362_v46, %v8945_v58 }
 0x63a   : > { %3798 = vadd.xlane.f32.xlu1 %v9157_v57  ;;  %3796 = vadd.xlane.f32.xlu0 %v9161_v12  ;;  %v9189_v57 = vpop.eup %6580  ;;  %6612 = vpow2.f32 %v4280_v29 }
 0x63b   : > { %v9167_v11 = vpop.xlane.xlu1 %4778  ;;  %v9169_v42 = vpop.xlane.xlu0 %4776  ;;  %10336 = vst [vmem:[#allocation116_spill] sm:$0xff] %v9189_v57  ;;  %v4288_v58 = vmul.f32 1.442695, %v4268_v6 }
 0x63c   : > { %v9199_v16 = vpop.eup %6582  ;;  %6614 = vpow2.f32 %v4550_v19 }
 0x63d   : > { %10338 = vst [vmem:[#allocation25_spill] sm:$0xff] %v9199_v16 }
 0x63e   : > { %4066 = vadd.xlane.f32.xlu1 %v9171_v5  ;;  %4064 = vadd.xlane.f32.xlu0 %v9175_v28  ;;  %v9203_v5 = vpop.eup %6584  ;;  %6616 = vpow2.f32 %v4548_v13 }
 0x63f   : > { %v9181_v50 = vpop.xlane.xlu1 %5046  ;;  %v9183_v12 = vpop.xlane.xlu0 %5044  ;;  %10340 = vst [vmem:[#allocation119_spill] sm:$0xff] %v9203_v5 }
 0x640   : > { %v9213_v52 = vpop.eup %6586  ;;  %6618 = vpow2.f32 %v4294_v0 }
 0x641   : > { %10342 = vst [vmem:[#allocation28_spill] sm:$0xff] %v9213_v52 }
 0x642   : > { %3794 = vadd.xlane.f32.xlu1 %v9185_v33  ;;  %3792 = vadd.xlane.f32.xlu0 %v9189_v57  ;;  %v9217_v33 = vpop.eup %6588  ;;  %6620 = vpow2.f32 %v4292_v63 }
 0x643   : > { %v9195_v45 = vpop.xlane.xlu1 %4790  ;;  %v9197_v28 = vpop.xlane.xlu0 %4788  ;;  %10344 = vst [vmem:[#allocation120_spill] sm:$0xff] %v9217_v33 }
 0x644   : > { %v9227_v34 = vpop.eup %6590  ;;  %6622 = vpow2.f32 %v4562_v56 }
 0x645   : > { %10346 = vst [vmem:[#allocation27_spill] sm:$0xff] %v9227_v34 }
 0x646   : > { %4062 = vadd.xlane.f32.xlu1 %v9199_v16  ;;  %4060 = vadd.xlane.f32.xlu0 %v9203_v5  ;;  %v9231_v16 = vpop.eup %6592  ;;  %6624 = vpow2.f32 %v4560_v40 }
 0x647   : > { %v9209_v8 = vpop.xlane.xlu1 %5058  ;;  %v9211_v57 = vpop.xlane.xlu0 %5056  ;;  %10348 = vst [vmem:[#allocation30_spill] sm:$0xff] %v9231_v16 }
 0x648   : > { %v9241_v26 = vpop.eup %6594 }
 0x649   : > { %10350 = vst [vmem:[#allocation123_spill] sm:$0xff] %v9241_v26 }
 0x64a   : > { %3806 = vadd.xlane.f32.xlu1 %v9213_v52  ;;  %3804 = vadd.xlane.f32.xlu0 %v9217_v33  ;;  %v9245_v52 = vpop.eup %6596 }
 0x64b   : > { %v9223_v43 = vpop.xlane.xlu1 %4786  ;;  %v9225_v5 = vpop.xlane.xlu0 %4784  ;;  %10352 = vst [vmem:[#allocation29_spill] sm:$0xff] %v9245_v52 }
 0x64c   : > { %v9255_v4 = vpop.eup %6598 }
 0x64d   : > { %10354 = vst [vmem:[#allocation32_spill] sm:$0xff] %v9255_v4 }
 0x64e   : > { %4074 = vadd.xlane.f32.xlu1 %v9227_v34  ;;  %4072 = vadd.xlane.f32.xlu0 %v9231_v16  ;;  %v9259_v34 = vpop.eup %6600 }
 0x64f   : > { %v9237_v48 = vpop.xlane.xlu1 %5054  ;;  %v9239_v33 = vpop.xlane.xlu0 %5052  ;;  %10356 = vst [vmem:[#allocation31_spill] sm:$0xff] %v9259_v34 }
 0x650   : > { %v9269_v29 = vpop.eup %6602 }
 0x651   : > { %10358 = vst [vmem:[#allocation34_spill] sm:$0xff] %v9269_v29 }
 0x652   : > { %3802 = vadd.xlane.f32.xlu1 %v9241_v26  ;;  %3800 = vadd.xlane.f32.xlu0 %v9245_v52  ;;  %v9273_v26 = vpop.eup %6604 }
 0x653   : > { %v9251_v20 = vpop.xlane.xlu1 %4798  ;;  %v9253_v16 = vpop.xlane.xlu0 %4796  ;;  %10360 = vst [vmem:[#allocation33_spill] sm:$0xff] %v9273_v26 }
 0x654   : > { %v9285_v39 = vpop.eup %6606 }
 0x655   : > { %10363 = vst [vmem:[#allocation36_spill] sm:$0xff] %v9285_v39 }
 0x656   : > { %4070 = vadd.xlane.f32.xlu1 %v9255_v4  ;;  %4068 = vadd.xlane.f32.xlu0 %v9259_v34  ;;  %v10361_v34 = vld [vmem:[#allocation58_spill] sm:$0xff] }
 0x657   : > { %v9265_v31 = vpop.xlane.xlu1 %5066  ;;  %v9267_v52 = vpop.xlane.xlu0 %5064  ;;  %v4269_v19 = vsub.f32 %v10361_v34, %v8943_v36  ;;  %v4537_v36 = vsub.f32 %v10364_v51, %v8957_v49 }
 0x658   : > { %v9289_v34 = vpop.eup %6608 }
 0x659   : > { %10365 = vst [vmem:[#allocation35_spill] sm:$0xff] %v9289_v34  ;;  %v4290_v15 = vmul.f32 1.442695, %v4269_v19  ;;  %v9299_v63 = vpop.eup %6610  ;;  %v4558_v49 = vmul.f32 1.442695, %v4537_v36  ;;  %v10368_v19 = vld [vmem:[#allocation61_spill] sm:$0xff] }
 0x65a   : > { %4318 = vadd.xlane.f32.xlu1 %v9269_v29  ;;  %4316 = vadd.xlane.f32.xlu0 %v9273_v26  ;;  %v10366_v26 = vld [vmem:[#allocation59_spill] sm:$0xff]  ;;  %v9301_v32 = vpop.eup %6612  ;;  %v4274_v56 = vsub.f32 %v10368_v19, %v8973_v24 }
 0x65b   : > { %v9281_v4 = vpop.xlane.xlu1 %4794  ;;  %v9283_v13 = vpop.xlane.xlu0 %4792  ;;  %v4536_v0 = vsub.f32 %v10366_v26, %v8959_v47  ;;  %6626 = vpow2.f32 %v4290_v15  ;;  %v10367_v47 = vld [vmem:[#allocation62_spill] sm:$0xff]  ;;  %v10370_v24 = vld [vmem:[#allocation63_spill] sm:$0xff] }
 0x65c   : > { %v4275_v26 = vsub.f32 %v10367_v47, %v8971_v21  ;;  %6628 = vpow2.f32 %v4288_v58  ;;  %v4300_v15 = vmul.f32 1.442695, %v4274_v56  ;;  %v4542_v58 = vsub.f32 %v10370_v24, %v8987_v25 }
 0x65d   : > { %v4556_v51 = vmul.f32 1.442695, %v4536_v0  ;;  %6630 = vpow2.f32 %v4558_v49  ;;  %v10369_v0 = vld [vmem:[#allocation64_spill] sm:$0xff] }
 0x65e   : > { %4586 = vadd.xlane.f32.xlu1 %v9285_v39  ;;  %4584 = vadd.xlane.f32.xlu0 %v9289_v34  ;;  %v9309_v39 = vpop.eup %6614  ;;  %v4302_v36 = vmul.f32 1.442695, %v4275_v26  ;;  %v4543_v21 = vsub.f32 %v10369_v0, %v8985_v59  ;;  %v10372_v26 = vld [vmem:[#allocation66_spill] sm:$0xff]  ;;  %v4568_v25 = vmul.f32 1.442695, %v4542_v58  ;;  %v10377_v58 = vld [vmem:[#allocation67_spill] sm:$0xff] }
 0x65f   : > { %v9295_v46 = vpop.xlane.xlu1 %5062  ;;  %v9297_v29 = vpop.xlane.xlu0 %5060  ;;  %6632 = vpow2.f32 %v4556_v51 }
 0x660   : > { %v9311_v40 = vpop.eup %6616  ;;  %v4570_v59 = vmul.f32 1.442695, %v4543_v21  ;;  %v10376_v21 = vld [vmem:[#allocation68_spill] sm:$0xff] }
 0x661   : > { %v9319_v49 = vpop.eup %6618 }
 0x662   : > { %4314 = vadd.xlane.f32.xlu1 %v9299_v63  ;;  %4312 = vadd.xlane.f32.xlu0 %v9301_v32  ;;  %v9321_v51 = vpop.eup %6620 }
 0x663   : > { %v3247_v6 = vpop.xlane.xlu1 %3246  ;;  %v3245_v34 = vpop.xlane.xlu0 %3244  ;;  %10371 = vst [vmem:[#allocation38_spill] sm:$0xff] %v9321_v51 }
 0x664   : > { %6634 = vrcp.f32 %v3247_v6  ;;  %v4273_v6 = vsub.f32 %v10372_v26, %v8999_v18  ;;  %v4540_v26 = vsub.f32 %v10377_v58, %v9015_v10 }
 0x665   : > { %6636 = vrcp.f32 %v3245_v34  ;;  %v10373_v34 = vld [vmem:[#allocation65_spill] sm:$0xff] }
 0x666   : > { %4582 = vadd.xlane.f32.xlu1 %v9309_v39  ;;  %4580 = vadd.xlane.f32.xlu0 %v9311_v40  ;;  %v4272_v56 = vsub.f32 %v10373_v34, %v9001_v9  ;;  %v4298_v18 = vmul.f32 1.442695, %v4273_v6 }
 0x667   : > { %v3515_v47 = vpop.xlane.xlu1 %3514  ;;  %v3513_v19 = vpop.xlane.xlu0 %3512 }
 0x668   : > { %6638 = vrcp.f32 %v3515_v47  ;;  %v9329_v47 = vpop.eup %6622 }
 0x669   : > { %6640 = vrcp.f32 %v3513_v19  ;;  %10374 = vst [vmem:[#allocation37_spill] sm:$0xff] %v9329_v47  ;;  %v4541_v19 = vsub.f32 %v10376_v21, %v9013_v61  ;;  %v10380_v21 = vld [vmem:[#allocation69_spill] sm:$0xff] }
 0x66a   : > { %6642 = vpow2.f32 %v4302_v36  ;;  %4326 = vadd.xlane.f32.xlu1 %v9319_v49  ;;  %4324 = vadd.xlane.f32.xlu0 %v9321_v51  ;;  %v9331_v36 = vpop.eup %6624  ;;  %v4278_v58 = vsub.f32 %v10380_v21, %v9029_v37  ;;  %v10384_v21 = vld [vmem:[#allocation95_spill] sm:$0xff] }
 0x66b   : > { %6644 = vpow2.f32 %v4300_v15  ;;  %v3243_v0 = vpop.xlane.xlu1 %3242  ;;  %v3241_v24 = vpop.xlane.xlu0 %3240  ;;  %10375 = vst [vmem:[#allocation40_spill] sm:$0xff] %v9331_v36  ;;  %v4296_v15 = vmul.f32 1.442695, %v4272_v56  ;;  %v4566_v6 = vmul.f32 1.442695, %v4541_v19 }
 0x66c   : > { %6646 = vrcp.f32 %v3243_v0  ;;  %v9338_v9 = vpop.eup %6626  ;;  %v4308_v37 = vmul.f32 1.442695, %v4278_v58  ;;  %v10385_v58 = vld [vmem:[#allocation74_spill] sm:$0xff] }
 0x66d   : > { %6648 = vrcp.f32 %v3241_v24  ;;  %v9342_v51 = vpop.eup %6628  ;;  %v4564_v24 = vmul.f32 1.442695, %v4540_v26 }
 0x66e   : > { %6650 = vpow2.f32 %v4570_v59  ;;  %4594 = vadd.xlane.f32.xlu1 %v9329_v47  ;;  %4592 = vadd.xlane.f32.xlu0 %v9331_v36  ;;  %10378 = vst [vmem:[#allocation39_spill] sm:$0xff] %v9342_v51  ;;  %v9346_v59 = vpop.eup %6630 }
 0x66f   : > { %6652 = vpow2.f32 %v4568_v25  ;;  %v3511_v34 = vpop.xlane.xlu1 %3510  ;;  %v3509_v0 = vpop.xlane.xlu0 %3508  ;;  %v10379_v25 = vld [vmem:[#allocation70_spill] sm:$0xff] }
 0x670   : > { %6654 = vrcp.f32 %v3511_v34  ;;  %v9348_v61 = vpop.eup %6632  ;;  %v4279_v56 = vsub.f32 %v10379_v25, %v9027_v1 }
 0x671   : > { %6656 = vrcp.f32 %v3509_v0  ;;  %v6635_v10 = vpop.eup %6634 }
 0x672   : > { %6658 = vpow2.f32 %v4298_v18  ;;  %4322 = vadd.xlane.f32.xlu1 %v9338_v9  ;;  %4320 = vadd.xlane.f32.xlu0 %v9342_v51  ;;  %v6637_v0 = vpop.eup %6636  ;;  %v3279_v47 = vmul.f32 %v6635_v10, %v8825_v17  ;;  %v4310_v25 = vmul.f32 1.442695, %v4279_v56  ;;  %v10381_v51 = vld [vmem:[#allocation72_spill] sm:$0xff] }
 0x673   : > { %6660 = vpow2.f32 %v4296_v15  ;;  %v3255_v34 = vpop.xlane.xlu1 %3254  ;;  %v3253_v36 = vpop.xlane.xlu0 %3252  ;;  %v3277_v19 = vmul.f32 %v6637_v0, %v8821_v14  ;;  %v4547_v15 = vsub.f32 %v10381_v51, %v9041_v35  ;;  %v10383_v51 = vld [vmem:[#allocation134_spill] sm:$0xff] }
 0x674   : > { %6662 = vrcp.f32 %v3255_v34  ;;  %3307 = vst [vmem:[%s9360_s23 + $0xc0] sm:$0xff] %v3279_v47  ;;  %v10386_v34 = vld [vmem:[#allocation136_spill] sm:$0xff] }
 0x675   : > { %v6639_v18 = vpop.eup %6638  ;;  %6664 = vrcp.f32 %v3253_v36  ;;  %v10382_v36 = vld [vmem:[#allocation71_spill] sm:$0xff]  ;;  %3306 = vst [vmem:[%s9360_s23 + $0x80] sm:$0xff] %v3277_v19 }
 0x676   : > { %v6641_v1 = vpop.eup %6640  ;;  %6666 = vpow2.f32 %v4566_v6  ;;  %v3547_v17 = vmul.f32 %v6639_v18, %v8839_v41  ;;  %4590 = vadd.xlane.f32.xlu1 %v9346_v59  ;;  %4588 = vadd.xlane.f32.xlu0 %v9348_v61  ;;  %v4546_v35 = vsub.f32 %v10382_v36, %v9043_v2  ;;  %v4277_v2 = vsub.f32 %v10385_v58, %v10384_v21  ;;  %v10391_v58 = vld [vmem:[#allocation138_spill] sm:$0xff] }
 0x677   : > { %v9366_v14 = vpop.eup %6642  ;;  %6668 = vpow2.f32 %v4564_v24  ;;  %v3545_v26 = vmul.f32 %v6641_v1, %v10383_v51  ;;  %v3523_v6 = vpop.xlane.xlu1 %3522  ;;  %v4578_v24 = vmul.f32 1.442695, %v4547_v15  ;;  %v10387_v1 = vld [vmem:[#allocation16_spill] sm:$0xff]  ;;  %v10389_v51 = vld [vmem:[#allocation135_spill] sm:$0xff] }
 0x678   : > { %v3521_v56 = vpop.xlane.xlu0 %3520  ;;  %v9372_v47 = vpop.eup %6644  ;;  %3575 = vst [vmem:[%s9360_s23 + $0xc8] sm:$0xff] %v3547_v17  ;;  %6670 = vrcp.f32 %v3523_v6  ;;  %v4576_v19 = vmul.f32 1.442695, %v4546_v35  ;;  %v10388_v17 = vld [vmem:[#allocation73_spill] sm:$0xff]  ;;  %v4306_v21 = vmul.f32 1.442695, %v4277_v2 }
 0x679   : > { %v6647_v41 = vpop.eup %6646  ;;  %3574 = vst [vmem:[%s9360_s23 + $0x88] sm:$0xff] %v3545_v26  ;;  %6672 = vrcp.f32 %v3521_v56  ;;  %v4276_v36 = vsub.f32 %v10388_v17, %v10387_v1  ;;  %v10392_v1 = vld [vmem:[#allocation99_spill] sm:$0xff]  ;;  %v10393_v17 = vld [vmem:[#allocation77_spill] sm:$0xff] }
 0x67a   : > { %v6649_v10 = vpop.eup %6648  ;;  %6674 = vpow2.f32 %v4310_v25  ;;  %v3275_v0 = vmul.f32 %v6647_v41, %v10386_v34  ;;  %4334 = vadd.xlane.f32.xlu1 %v9366_v14  ;;  %4332 = vadd.xlane.f32.xlu0 %v9372_v47 }
 0x67b   : > { %v9381_v18 = vpop.eup %6650  ;;  %6676 = vpow2.f32 %v4308_v37  ;;  %v3273_v25 = vmul.f32 %v6649_v10, %v10389_v51  ;;  %v3251_v15 = vpop.xlane.xlu1 %3250  ;;  %v10390_v37 = vld [vmem:[#allocation78_spill] sm:$0xff]  ;;  %v4544_v51 = vsub.f32 %v10393_v17, %v10392_v1  ;;  %v10397_v17 = vld [vmem:[#allocation81_spill] sm:$0xff] }
 0x67c   : > { %v3249_v26 = vpop.xlane.xlu0 %3248  ;;  %v9386_v6 = vpop.eup %6652  ;;  %3305 = vst [vmem:[%s9360_s23 + $0x40] sm:$0xff] %v3275_v0  ;;  %6678 = vrcp.f32 %v3251_v15  ;;  %v4545_v35 = vsub.f32 %v10390_v37, %v9069_v27  ;;  %v4304_v0 = vmul.f32 1.442695, %v4276_v36 }
 0x67d   : > { %v6655_v56 = vpop.eup %6654  ;;  %3304 = vst [vmem:[%s9360_s23] sm:$0xff] %v3273_v25  ;;  %6680 = vrcp.f32 %v3249_v26  ;;  %v10394_v25 = vld [vmem:[#allocation137_spill] sm:$0xff] }
 0x67e   : > { %v6657_v41 = vpop.eup %6656  ;;  %6682 = vpow2.f32 %v4578_v24  ;;  %v3543_v34 = vmul.f32 %v6655_v56, %v10391_v58  ;;  %4602 = vadd.xlane.f32.xlu1 %v9381_v18  ;;  %4600 = vadd.xlane.f32.xlu0 %v9386_v6  ;;  %v4574_v37 = vmul.f32 1.442695, %v4545_v35  ;;  %v10396_v58 = vld [vmem:[#allocation139_spill] sm:$0xff] }
 0x67f   : > { %v9395_v10 = vpop.eup %6658  ;;  %6684 = vpow2.f32 %v4576_v19  ;;  %v3541_v24 = vmul.f32 %v6657_v41, %v10394_v25  ;;  %v3519_v2 = vpop.xlane.xlu1 %3518  ;;  %v10395_v19 = vld [vmem:[#allocation82_spill] sm:$0xff]  ;;  %v4802_v25 = vsub.f32 %v10397_v17, %v9085_v23  ;;  %v10400_v23 = vld [vmem:[#allocation141_spill] sm:$0xff] }
 0x680   : > { %v3517_v15 = vpop.xlane.xlu0 %3516  ;;  %v9400_v26 = vpop.eup %6660  ;;  %3573 = vst [vmem:[%s9360_s23 + $0x48] sm:$0xff] %v3543_v34  ;;  %6686 = vrcp.f32 %v3519_v2  ;;  %v4803_v36 = vsub.f32 %v10395_v19, %v9083_v7  ;;  %v4572_v34 = vmul.f32 1.442695, %v4544_v51  ;;  %v10401_v17 = vld [vmem:[#allocation85_spill] sm:$0xff] }
 0x681   : > { %v6663_v27 = vpop.eup %6662  ;;  %3572 = vst [vmem:[%s9360_s23 + $0x8] sm:$0xff] %v3541_v24  ;;  %6688 = vrcp.f32 %v3517_v15  ;;  %v10398_v24 = vld [vmem:[#allocation140_spill] sm:$0xff] }
 0x682   : > { %v6665_v56 = vpop.eup %6664  ;;  %6690 = vpow2.f32 %v4306_v21  ;;  %v3287_v1 = vmul.f32 %v6663_v27, %v10396_v58  ;;  %4330 = vadd.xlane.f32.xlu1 %v9395_v10  ;;  %4328 = vadd.xlane.f32.xlu0 %v9400_v26  ;;  %v4822_v19 = vmul.f32 1.442695, %v4803_v36 }
 0x683   : > { %v9409_v41 = vpop.eup %6666  ;;  %6692 = vpow2.f32 %v4304_v0  ;;  %v3285_v21 = vmul.f32 %v6665_v56, %v10398_v24  ;;  %v3263_v35 = vpop.xlane.xlu1 %3262  ;;  %v10399_v0 = vld [vmem:[#allocation86_spill] sm:$0xff]  ;;  %v5070_v24 = vsub.f32 %v10401_v17, %v9099_v30  ;;  %v10404_v30 = vld [vmem:[#allocation143_spill] sm:$0xff]  ;;  %v10405_v17 = vld [vmem:[#allocation89_spill] sm:$0xff] }
 0x684   : > { %v3261_v2 = vpop.xlane.xlu0 %3260  ;;  %v9414_v15 = vpop.eup %6668  ;;  %3311 = vst [vmem:[%s9360_s23 + $0x1c0] sm:$0xff] %v3287_v1  ;;  %6694 = vrcp.f32 %v3263_v35  ;;  %v5071_v51 = vsub.f32 %v10399_v0, %v9097_v38  ;;  %v4820_v1 = vmul.f32 1.442695, %v4802_v25 }
 0x685   : > { %v6671_v7 = vpop.eup %6670  ;;  %3310 = vst [vmem:[%s9360_s23 + $0x180] sm:$0xff] %v3285_v21  ;;  %6696 = vrcp.f32 %v3261_v2  ;;  %v10402_v21 = vld [vmem:[#allocation142_spill] sm:$0xff] }
 0x686   : > { %v6673_v27 = vpop.eup %6672  ;;  %6698 = vpow2.f32 %v4574_v37  ;;  %v3555_v58 = vmul.f32 %v6671_v7, %v10400_v23  ;;  %4598 = vadd.xlane.f32.xlu1 %v9409_v41  ;;  %4596 = vadd.xlane.f32.xlu0 %v9414_v15  ;;  %v5090_v0 = vmul.f32 1.442695, %v5071_v51 }
 0x687   : > { %v9423_v56 = vpop.eup %6674  ;;  %6700 = vpow2.f32 %v4572_v34  ;;  %v3553_v37 = vmul.f32 %v6673_v27, %v10402_v21  ;;  %v3531_v36 = vpop.xlane.xlu1 %3530  ;;  %v10403_v34 = vld [vmem:[#allocation90_spill] sm:$0xff]  ;;  %v4800_v21 = vsub.f32 %v10405_v17, %v9113_v54  ;;  %v10408_v54 = vld [vmem:[#allocation75_spill] sm:$0xff]  ;;  %v10409_v17 = vld [vmem:[#allocation93_spill] sm:$0xff] }
 0x688   : > { %v3529_v35 = vpop.xlane.xlu0 %3528  ;;  %v9428_v2 = vpop.eup %6676  ;;  %3579 = vst [vmem:[%s9360_s23 + $0x1c8] sm:$0xff] %v3555_v58  ;;  %6702 = vrcp.f32 %v3531_v36  ;;  %v4801_v25 = vsub.f32 %v10403_v34, %v9111_v60  ;;  %v5088_v58 = vmul.f32 1.442695, %v5070_v24 }
 0x689   : > { %v6679_v38 = vpop.eup %6678  ;;  %3578 = vst [vmem:[%s9360_s23 + $0x188] sm:$0xff] %v3553_v37  ;;  %6704 = vrcp.f32 %v3529_v35  ;;  %v10406_v37 = vld [vmem:[#allocation144_spill] sm:$0xff] }
 0x68a   : > { %v6681_v7 = vpop.eup %6680  ;;  %6706 = vpow2.f32 %v4822_v19  ;;  %v3283_v23 = vmul.f32 %v6679_v38, %v10404_v30  ;;  %4342 = vadd.xlane.f32.xlu1 %v9423_v56  ;;  %4340 = vadd.xlane.f32.xlu0 %v9428_v2  ;;  %v4818_v34 = vmul.f32 1.442695, %v4801_v25 }
 0x68b   : > { %v9437_v27 = vpop.eup %6682  ;;  %6708 = vpow2.f32 %v4820_v1  ;;  %v3281_v19 = vmul.f32 %v6681_v7, %v10406_v37  ;;  %v3259_v51 = vpop.xlane.xlu1 %3258  ;;  %v10407_v1 = vld [vmem:[#allocation94_spill] sm:$0xff]  ;;  %v5068_v37 = vsub.f32 %v10409_v17, %v9127_v22  ;;  %v10412_v22 = vld [vmem:[#allocation76_spill] sm:$0xff]  ;;  %v10413_v17 = vld [vmem:[#allocation97_spill] sm:$0xff] }
 0x68c   : > { %v3257_v36 = vpop.xlane.xlu0 %3256  ;;  %v9442_v35 = vpop.eup %6684  ;;  %3309 = vst [vmem:[%s9360_s23 + $0x140] sm:$0xff] %v3283_v23  ;;  %6710 = vrcp.f32 %v3259_v51  ;;  %v5069_v24 = vsub.f32 %v10407_v1, %v9125_v62  ;;  %v4816_v23 = vmul.f32 1.442695, %v4800_v21 }
 0x68d   : > { %v6687_v60 = vpop.eup %6686  ;;  %3308 = vst [vmem:[%s9360_s23 + $0x100] sm:$0xff] %v3281_v19  ;;  %6712 = vrcp.f32 %v3257_v36  ;;  %v10410_v19 = vld [vmem:[#allocation8_spill] sm:$0xff] }
 0x68e   : > { %v6689_v38 = vpop.eup %6688  ;;  %6714 = vpow2.f32 %v5090_v0  ;;  %v3551_v30 = vmul.f32 %v6687_v60, %v10408_v54  ;;  %4610 = vadd.xlane.f32.xlu1 %v9437_v27  ;;  %4608 = vadd.xlane.f32.xlu0 %v9442_v35  ;;  %v5086_v1 = vmul.f32 1.442695, %v5069_v24 }
 0x68f   : > { %v9451_v7 = vpop.eup %6690  ;;  %6716 = vpow2.f32 %v5088_v58  ;;  %v3549_v0 = vmul.f32 %v6689_v38, %v10410_v19  ;;  %v3527_v25 = vpop.xlane.xlu1 %3526  ;;  %v10411_v58 = vld [vmem:[#allocation98_spill] sm:$0xff]  ;;  %v4806_v19 = vsub.f32 %v10413_v17, %v9141_v53  ;;  %v10416_v53 = vld [vmem:[#allocation79_spill] sm:$0xff]  ;;  %v10417_v17 = vld [vmem:[#allocation101_spill] sm:$0xff] }
 0x690   : > { %v3525_v51 = vpop.xlane.xlu0 %3524  ;;  %v9456_v36 = vpop.eup %6692  ;;  %3577 = vst [vmem:[%s9360_s23 + $0x148] sm:$0xff] %v3551_v30  ;;  %6718 = vrcp.f32 %v3527_v25  ;;  %v4807_v21 = vsub.f32 %v10411_v58, %v9139_v3  ;;  %v5084_v30 = vmul.f32 1.442695, %v5068_v37 }
 0x691   : > { %v6695_v62 = vpop.eup %6694  ;;  %3576 = vst [vmem:[%s9360_s23 + $0x108] sm:$0xff] %v3549_v0  ;;  %6720 = vrcp.f32 %v3525_v51  ;;  %v10414_v0 = vld [vmem:[#allocation6_spill] sm:$0xff] }
 0x692   : > { %v6697_v60 = vpop.eup %6696  ;;  %6722 = vpow2.f32 %v4818_v34  ;;  %v3295_v54 = vmul.f32 %v6695_v62, %v10412_v22  ;;  %4338 = vadd.xlane.f32.xlu1 %v9451_v7  ;;  %4336 = vadd.xlane.f32.xlu0 %v9456_v36  ;;  %v4830_v58 = vmul.f32 1.442695, %v4807_v21 }
 0x693   : > { %v9465_v38 = vpop.eup %6698  ;;  %6724 = vpow2.f32 %v4816_v23  ;;  %v3293_v34 = vmul.f32 %v6697_v60, %v10414_v0  ;;  %v3271_v24 = vpop.xlane.xlu1 %3270  ;;  %v10415_v23 = vld [vmem:[#allocation102_spill] sm:$0xff]  ;;  %v5074_v0 = vsub.f32 %v10417_v17, %v9155_v55  ;;  %v10420_v55 = vld [vmem:[#allocation80_spill] sm:$0xff]  ;;  %v10421_v17 = vld [vmem:[#allocation105_spill] sm:$0xff] }
 0x694   : > { %v3269_v25 = vpop.xlane.xlu0 %3268  ;;  %v9470_v51 = vpop.eup %6700  ;;  %3315 = vst [vmem:[%s9360_s23 + $0x2c0] sm:$0xff] %v3295_v54  ;;  %6726 = vrcp.f32 %v3271_v24  ;;  %v5075_v37 = vsub.f32 %v10415_v23, %v9153_v44  ;;  %v4828_v54 = vmul.f32 1.442695, %v4806_v19 }
 0x695   : > { %v6703_v3 = vpop.eup %6702  ;;  %3314 = vst [vmem:[%s9360_s23 + $0x280] sm:$0xff] %v3293_v34  ;;  %6728 = vrcp.f32 %v3269_v25  ;;  %v10418_v34 = vld [vmem:[#allocation5_spill] sm:$0xff] }
 0x696   : > { %v6705_v62 = vpop.eup %6704  ;;  %6730 = vpow2.f32 %v5086_v1  ;;  %v3563_v22 = vmul.f32 %v6703_v3, %v10416_v53  ;;  %4606 = vadd.xlane.f32.xlu1 %v9465_v38  ;;  %4604 = vadd.xlane.f32.xlu0 %v9470_v51  ;;  %v5098_v23 = vmul.f32 1.442695, %v5075_v37 }
 0x697   : > { %v9479_v60 = vpop.eup %6706  ;;  %6732 = vpow2.f32 %v5084_v30  ;;  %v3561_v1 = vmul.f32 %v6705_v62, %v10418_v34  ;;  %v3539_v21 = vpop.xlane.xlu1 %3538  ;;  %v10419_v30 = vld [vmem:[#allocation106_spill] sm:$0xff]  ;;  %v4804_v34 = vsub.f32 %v10421_v17, %v9169_v42  ;;  %v10424_v42 = vld [vmem:[#allocation83_spill] sm:$0xff]  ;;  %v10425_v17 = vld [vmem:[#allocation109_spill] sm:$0xff] }
 0x698   : > { %v3537_v24 = vpop.xlane.xlu0 %3536  ;;  %v9484_v25 = vpop.eup %6708  ;;  %3583 = vst [vmem:[%s9360_s23 + $0x2c8] sm:$0xff] %v3563_v22  ;;  %6734 = vrcp.f32 %v3539_v21  ;;  %v4805_v19 = vsub.f32 %v10419_v30, %v9167_v11  ;;  %v5096_v22 = vmul.f32 1.442695, %v5074_v0 }
 0x699   : > { %v6711_v44 = vpop.eup %6710  ;;  %3582 = vst [vmem:[%s9360_s23 + $0x288] sm:$0xff] %v3561_v1  ;;  %6736 = vrcp.f32 %v3537_v24  ;;  %v10422_v1 = vld [vmem:[#allocation7_spill] sm:$0xff] }
 0x69a   : > { %v6713_v3 = vpop.eup %6712  ;;  %6738 = vpow2.f32 %v4830_v58  ;;  %v3291_v53 = vmul.f32 %v6711_v44, %v10420_v55  ;;  %4854 = vadd.xlane.f32.xlu1 %v9479_v60  ;;  %4852 = vadd.xlane.f32.xlu0 %v9484_v25  ;;  %v4826_v30 = vmul.f32 1.442695, %v4805_v19 }
 0x69b   : > { %v9493_v62 = vpop.eup %6714  ;;  %6740 = vpow2.f32 %v4828_v54  ;;  %v3289_v58 = vmul.f32 %v6713_v3, %v10422_v1  ;;  %v3267_v37 = vpop.xlane.xlu1 %3266  ;;  %v10423_v54 = vld [vmem:[#allocation110_spill] sm:$0xff]  ;;  %v5072_v1 = vsub.f32 %v10425_v17, %v9183_v12  ;;  %v10428_v12 = vld [vmem:[#allocation84_spill] sm:$0xff]  ;;  %v10429_v17 = vld [vmem:[#allocation113_spill] sm:$0xff] }
 0x69c   : > { %v3265_v21 = vpop.xlane.xlu0 %3264  ;;  %v9498_v24 = vpop.eup %6716  ;;  %3313 = vst [vmem:[%s9360_s23 + $0x240] sm:$0xff] %v3291_v53  ;;  %6742 = vrcp.f32 %v3267_v37  ;;  %v5073_v0 = vsub.f32 %v10423_v54, %v9181_v50  ;;  %v4824_v53 = vmul.f32 1.442695, %v4804_v34 }
 0x69d   : > { %v6719_v11 = vpop.eup %6718  ;;  %3312 = vst [vmem:[%s9360_s23 + $0x200] sm:$0xff] %v3289_v58  ;;  %6744 = vrcp.f32 %v3265_v21  ;;  %v10426_v58 = vld [vmem:[#allocation10_spill] sm:$0xff] }
 0x69e   : > { %v6721_v44 = vpop.eup %6720  ;;  %6746 = vpow2.f32 %v5098_v23  ;;  %v3559_v55 = vmul.f32 %v6719_v11, %v10424_v42  ;;  %5122 = vadd.xlane.f32.xlu1 %v9493_v62  ;;  %5120 = vadd.xlane.f32.xlu0 %v9498_v24  ;;  %v5094_v54 = vmul.f32 1.442695, %v5073_v0 }
 0x69f   : > { %v9507_v3 = vpop.eup %6722  ;;  %6748 = vpow2.f32 %v5096_v22  ;;  %v3557_v23 = vmul.f32 %v6721_v44, %v10426_v58  ;;  %v3535_v19 = vpop.xlane.xlu1 %3534  ;;  %v10427_v22 = vld [vmem:[#allocation114_spill] sm:$0xff]  ;;  %v4810_v58 = vsub.f32 %v10429_v17, %v9197_v28  ;;  %v10432_v28 = vld [vmem:[#allocation87_spill] sm:$0xff]  ;;  %v10433_v17 = vld [vmem:[#allocation117_spill] sm:$0xff] }
 0x6a0   : > { %v3533_v37 = vpop.xlane.xlu0 %3532  ;;  %v9512_v21 = vpop.eup %6724  ;;  %3581 = vst [vmem:[%s9360_s23 + $0x248] sm:$0xff] %v3559_v55  ;;  %6750 = vrcp.f32 %v3535_v19  ;;  %v4811_v34 = vsub.f32 %v10427_v22, %v9195_v45  ;;  %v5092_v55 = vmul.f32 1.442695, %v5072_v1 }
 0x6a1   : > { %v6727_v50 = vpop.eup %6726  ;;  %3580 = vst [vmem:[%s9360_s23 + $0x208] sm:$0xff] %v3557_v23  ;;  %6752 = vrcp.f32 %v3533_v37  ;;  %v10430_v23 = vld [vmem:[#allocation9_spill] sm:$0xff] }
 0x6a2   : > { %v6729_v11 = vpop.eup %6728  ;;  %6754 = vpow2.f32 %v4826_v30  ;;  %v3303_v42 = vmul.f32 %v6727_v50, %v10428_v12  ;;  %4850 = vadd.xlane.f32.xlu1 %v9507_v3  ;;  %4848 = vadd.xlane.f32.xlu0 %v9512_v21  ;;  %v4838_v22 = vmul.f32 1.442695, %v4811_v34 }
 0x6a3   : > { %v9521_v44 = vpop.eup %6730  ;;  %6756 = vpow2.f32 %v4824_v53  ;;  %v3301_v30 = vmul.f32 %v6729_v11, %v10430_v23  ;;  %v3783_v0 = vpop.xlane.xlu1 %3782  ;;  %v10431_v53 = vld [vmem:[#allocation118_spill] sm:$0xff]  ;;  %v5078_v23 = vsub.f32 %v10433_v17, %v9211_v57  ;;  %v10436_v57 = vld [vmem:[#allocation88_spill] sm:$0xff]  ;;  %v10437_v17 = vld [vmem:[#allocation121_spill] sm:$0xff] }
 0x6a4   : > { %v3781_v19 = vpop.xlane.xlu0 %3780  ;;  %v9526_v37 = vpop.eup %6732  ;;  %3319 = vst [vmem:[%s9360_s23 + $0x3c0] sm:$0xff] %v3303_v42  ;;  %6758 = vrcp.f32 %v3783_v0  ;;  %v5079_v1 = vsub.f32 %v10431_v53, %v9209_v8  ;;  %v4836_v42 = vmul.f32 1.442695, %v4810_v58 }
 0x6a5   : > { %v6735_v45 = vpop.eup %6734  ;;  %3318 = vst [vmem:[%s9360_s23 + $0x380] sm:$0xff] %v3301_v30  ;;  %6760 = vrcp.f32 %v3781_v19  ;;  %v10434_v30 = vld [vmem:[#allocation12_spill] sm:$0xff] }
 0x6a6   : > { %v6737_v50 = vpop.eup %6736  ;;  %6762 = vpow2.f32 %v5094_v54  ;;  %v3571_v12 = vmul.f32 %v6735_v45, %v10432_v28  ;;  %5118 = vadd.xlane.f32.xlu1 %v9521_v44  ;;  %5116 = vadd.xlane.f32.xlu0 %v9526_v37  ;;  %v5106_v53 = vmul.f32 1.442695, %v5079_v1 }
 0x6a7   : > { %v9535_v11 = vpop.eup %6738  ;;  %6764 = vpow2.f32 %v5092_v55  ;;  %v3569_v54 = vmul.f32 %v6737_v50, %v10434_v30  ;;  %v4051_v34 = vpop.xlane.xlu1 %4050  ;;  %v10435_v55 = vld [vmem:[#allocation122_spill] sm:$0xff]  ;;  %v4808_v30 = vsub.f32 %v10437_v17, %v9225_v5  ;;  %v10440_v5 = vld [vmem:[#allocation91_spill] sm:$0xff]  ;;  %v10441_v17 = vld [vmem:[#allocation124_spill] sm:$0xff] }
 0x6a8   : > { %v4049_v0 = vpop.xlane.xlu0 %4048  ;;  %v9540_v19 = vpop.eup %6740  ;;  %3587 = vst [vmem:[%s9360_s23 + $0x3c8] sm:$0xff] %v3571_v12  ;;  %6766 = vrcp.f32 %v4051_v34  ;;  %v4809_v58 = vsub.f32 %v10435_v55, %v9223_v43  ;;  %v5104_v12 = vmul.f32 1.442695, %v5078_v23 }
 0x6a9   : > { %v6743_v8 = vpop.eup %6742  ;;  %3586 = vst [vmem:[%s9360_s23 + $0x388] sm:$0xff] %v3569_v54  ;;  %6768 = vrcp.f32 %v4049_v0  ;;  %v10438_v54 = vld [vmem:[#allocation11_spill] sm:$0xff] }
 0x6aa   : > { %v6745_v45 = vpop.eup %6744  ;;  %6770 = vpow2.f32 %v4838_v22  ;;  %v3299_v28 = vmul.f32 %v6743_v8, %v10436_v57  ;;  %4862 = vadd.xlane.f32.xlu1 %v9535_v11  ;;  %4860 = vadd.xlane.f32.xlu0 %v9540_v19  ;;  %v4834_v55 = vmul.f32 1.442695, %v4809_v58 }
 0x6ab   : > { %v9549_v50 = vpop.eup %6746  ;;  %6772 = vpow2.f32 %v4836_v42  ;;  %v3297_v22 = vmul.f32 %v6745_v45, %v10438_v54  ;;  %v3779_v1 = vpop.xlane.xlu1 %3778  ;;  %v10439_v42 = vld [vmem:[#allocation125_spill] sm:$0xff]  ;;  %v5076_v54 = vsub.f32 %v10441_v17, %v9239_v33  ;;  %v10444_v33 = vld [vmem:[#allocation92_spill] sm:$0xff]  ;;  %v10445_v17 = vld [vmem:[#allocation126_spill] sm:$0xff] }
 0x6ac   : > { %v3777_v34 = vpop.xlane.xlu0 %3776  ;;  %v9554_v0 = vpop.eup %6748  ;;  %3317 = vst [vmem:[%s9360_s23 + $0x340] sm:$0xff] %v3299_v28  ;;  %6774 = vrcp.f32 %v3779_v1  ;;  %v5077_v23 = vsub.f32 %v10439_v42, %v9237_v48  ;;  %v4832_v28 = vmul.f32 1.442695, %v4808_v30 }
 0x6ad   : > { %v6751_v43 = vpop.eup %6750  ;;  %3316 = vst [vmem:[%s9360_s23 + $0x300] sm:$0xff] %v3297_v22  ;;  %6776 = vrcp.f32 %v3777_v34  ;;  %v10442_v22 = vld [vmem:[#allocation14_spill] sm:$0xff] }
 0x6ae   : > { %v6753_v8 = vpop.eup %6752  ;;  %6778 = vpow2.f32 %v5106_v53  ;;  %v3567_v57 = vmul.f32 %v6751_v43, %v10440_v5  ;;  %5130 = vadd.xlane.f32.xlu1 %v9549_v50  ;;  %5128 = vadd.xlane.f32.xlu0 %v9554_v0  ;;  %v5102_v42 = vmul.f32 1.442695, %v5077_v23 }
 0x6af   : > { %v9563_v45 = vpop.eup %6754  ;;  %6780 = vpow2.f32 %v5104_v12  ;;  %v3565_v53 = vmul.f32 %v6753_v8, %v10442_v22  ;;  %v4047_v58 = vpop.xlane.xlu1 %4046  ;;  %v10443_v12 = vld [vmem:[#allocation127_spill] sm:$0xff]  ;;  %v4814_v22 = vsub.f32 %v10445_v17, %v9253_v16  ;;  %v10448_v16 = vld [vmem:[#allocation96_spill] sm:$0xff]  ;;  %v10449_v17 = vld [vmem:[#allocation130_spill] sm:$0xff] }
 0x6b0   : > { %v4045_v1 = vpop.xlane.xlu0 %4044  ;;  %v9568_v34 = vpop.eup %6756  ;;  %3585 = vst [vmem:[%s9360_s23 + $0x348] sm:$0xff] %v3567_v57  ;;  %6782 = vrcp.f32 %v4047_v58  ;;  %v4815_v30 = vsub.f32 %v10443_v12, %v9251_v20  ;;  %v5100_v57 = vmul.f32 1.442695, %v5076_v54 }
 0x6b1   : > { %v6759_v48 = vpop.eup %6758  ;;  %3584 = vst [vmem:[%s9360_s23 + $0x308] sm:$0xff] %v3565_v53  ;;  %6784 = vrcp.f32 %v4045_v1  ;;  %v10446_v53 = vld [vmem:[#allocation13_spill] sm:$0xff] }
 0x6b2   : > { %v6761_v43 = vpop.eup %6760  ;;  %6786 = vpow2.f32 %v4834_v55  ;;  %v3815_v5 = vmul.f32 %v6759_v48, %v10444_v33  ;;  %4858 = vadd.xlane.f32.xlu1 %v9563_v45  ;;  %4856 = vadd.xlane.f32.xlu0 %v9568_v34  ;;  %v4846_v12 = vmul.f32 1.442695, %v4815_v30 }
 0x6b3   : > { %v9577_v8 = vpop.eup %6762  ;;  %6788 = vpow2.f32 %v4832_v28  ;;  %v3813_v55 = vmul.f32 %v6761_v43, %v10446_v53  ;;  %v3791_v23 = vpop.xlane.xlu1 %3790  ;;  %v10447_v28 = vld [vmem:[#allocation131_spill] sm:$0xff]  ;;  %v4812_v53 = vsub.f32 %v10449_v17, %v9283_v13  ;;  %v10452_v13 = vld [vmem:[#allocation18_spill] sm:$0xff]  ;;  %v10453_v17 = vld [vmem:[#allocation132_spill] sm:$0xff] }
 0x6b4   : > { %v3789_v58 = vpop.xlane.xlu0 %3788  ;;  %v9582_v1 = vpop.eup %6764  ;;  %3843 = vst [vmem:[%s9360_s23 + $0xd0] sm:$0xff] %v3815_v5  ;;  %6790 = vrcp.f32 %v3791_v23  ;;  %v4813_v54 = vsub.f32 %v10447_v28, %v9281_v4  ;;  %v4844_v5 = vmul.f32 1.442695, %v4814_v22 }
 0x6b5   : > { %v6767_v20 = vpop.eup %6766  ;;  %3842 = vst [vmem:[%s9360_s23 + $0x90] sm:$0xff] %v3813_v55  ;;  %6792 = vrcp.f32 %v3789_v58  ;;  %v10450_v55 = vld [vmem:[#allocation15_spill] sm:$0xff] }
 0x6b6   : > { %v6769_v48 = vpop.eup %6768  ;;  %6794 = vpow2.f32 %v5102_v42  ;;  %v4083_v33 = vmul.f32 %v6767_v20, %v10448_v16  ;;  %5126 = vadd.xlane.f32.xlu1 %v9577_v8  ;;  %5124 = vadd.xlane.f32.xlu0 %v9582_v1  ;;  %v4842_v28 = vmul.f32 1.442695, %v4813_v54 }
 0x6b7   : > { %v9591_v43 = vpop.eup %6770  ;;  %6796 = vpow2.f32 %v5100_v57  ;;  %v4081_v42 = vmul.f32 %v6769_v48, %v10450_v55  ;;  %v4059_v30 = vpop.xlane.xlu1 %4058  ;;  %v10451_v57 = vld [vmem:[#allocation133_spill] sm:$0xff]  ;;  %v5080_v55 = vsub.f32 %v10453_v17, %v9297_v29 }
 0x6b8   : > { %v4057_v23 = vpop.xlane.xlu0 %4056  ;;  %v9596_v58 = vpop.eup %6772  ;;  %4111 = vst [vmem:[%s9360_s23 + $0xd8] sm:$0xff] %v4083_v33  ;;  %6798 = vrcp.f32 %v4059_v30  ;;  %v5081_v22 = vsub.f32 %v10451_v57, %v9295_v46  ;;  %v4840_v33 = vmul.f32 1.442695, %v4812_v53  ;;  %v10455_v57 = vld [vmem:[#allocation129_spill] sm:$0xff] }
 0x6b9   : > { %v6775_v4 = vpop.eup %6774  ;;  %4110 = vst [vmem:[%s9360_s23 + $0x98] sm:$0xff] %v4081_v42  ;;  %6800 = vrcp.f32 %v4057_v23  ;;  %v10454_v42 = vld [vmem:[#allocation100_spill] sm:$0xff]  ;;  %v10456_v29 = vld [vmem:[#allocation17_spill] sm:$0xff] }
 0x6ba   : > { %v6777_v20 = vpop.eup %6776  ;;  %6802 = vpow2.f32 %v4846_v12  ;;  %v3811_v16 = vmul.f32 %v6775_v4, %v10452_v13  ;;  %4870 = vadd.xlane.f32.xlu1 %v9591_v43  ;;  %4868 = vadd.xlane.f32.xlu0 %v9596_v58  ;;  %v5110_v53 = vmul.f32 1.442695, %v5081_v22 }
 0x6bb   : > { %v9605_v48 = vpop.eup %6778  ;;  %6804 = vpow2.f32 %v4844_v5  ;;  %v3809_v12 = vmul.f32 %v6777_v20, %v10454_v42  ;;  %v3787_v54 = vpop.xlane.xlu1 %3786  ;;  %v5083_v5 = vsub.f32 %v10455_v57, %v9265_v31  ;;  %v5108_v42 = vmul.f32 1.442695, %v5080_v55 }
 0x6bc   : > { %v3785_v30 = vpop.xlane.xlu0 %3784  ;;  %v9610_v23 = vpop.eup %6780  ;;  %3841 = vst [vmem:[%s9360_s23 + $0x50] sm:$0xff] %v3811_v16  ;;  %6806 = vrcp.f32 %v3787_v54  ;;  %v10457_v16 = vld [vmem:[#allocation128_spill] sm:$0xff] }
 0x6bd   : > { %v6783_v46 = vpop.eup %6782  ;;  %3840 = vst [vmem:[%s9360_s23 + $0x10] sm:$0xff] %v3809_v12  ;;  %6808 = vrcp.f32 %v3785_v30  ;;  %v5082_v17 = vsub.f32 %v10457_v16, %v9267_v52  ;;  %v10458_v12 = vld [vmem:[#allocation103_spill] sm:$0xff]  ;;  %v5114_v57 = vmul.f32 1.442695, %v5083_v5 }
 0x6be   : > { %v6785_v4 = vpop.eup %6784  ;;  %6810 = vpow2.f32 %v4842_v28  ;;  %v4079_v13 = vmul.f32 %v6783_v46, %v10456_v29  ;;  %5138 = vadd.xlane.f32.xlu1 %v9605_v48  ;;  %5136 = vadd.xlane.f32.xlu0 %v9610_v23  ;;  %v10459_v29 = vld [vmem:[#allocation20_spill] sm:$0xff] }
 0x6bf   : > { %v9619_v20 = vpop.eup %6786  ;;  %6812 = vpow2.f32 %v4840_v33  ;;  %v4077_v54 = vmul.f32 %v6785_v4, %v10458_v12  ;;  %v4055_v30 = vpop.xlane.xlu1 %4054  ;;  %v5112_v55 = vmul.f32 1.442695, %v5082_v17  ;;  %v10460_v4 = vld [vmem:[#allocation104_spill] sm:$0xff] }
 0x6c0   : > { %v4053_v31 = vpop.xlane.xlu0 %4052  ;;  %v9624_v28 = vpop.eup %6788  ;;  %4109 = vst [vmem:[%s9360_s23 + $0x58] sm:$0xff] %v4079_v13  ;;  %6814 = vrcp.f32 %v4055_v30  ;;  %v10461_v30 = vld [vmem:[#allocation19_spill] sm:$0xff] }
 0x6c1   : > { %v6791_v22 = vpop.eup %6790  ;;  %4108 = vst [vmem:[%s9360_s23 + $0x18] sm:$0xff] %v4077_v54  ;;  %6816 = vrcp.f32 %v4053_v31 }
 0x6c2   : > { %v6793_v46 = vpop.eup %6792  ;;  %6818 = vpow2.f32 %v5110_v53  ;;  %v3823_v52 = vmul.f32 %v6791_v22, %v10459_v29  ;;  %4866 = vadd.xlane.f32.xlu1 %v9619_v20  ;;  %4864 = vadd.xlane.f32.xlu0 %v9624_v28 }
 0x6c3   : > { %v9631_v33 = vpop.eup %6794  ;;  %6820 = vpow2.f32 %v5108_v42  ;;  %v3821_v13 = vmul.f32 %v6793_v46, %v10460_v4  ;;  %v3799_v16 = vpop.xlane.xlu1 %3798  ;;  %v10463_v42 = vld [vmem:[#allocation107_spill] sm:$0xff] }
 0x6c4   : > { %v3797_v12 = vpop.xlane.xlu0 %3796  ;;  %v9634_v54 = vpop.eup %6796  ;;  %3847 = vst [vmem:[%s9360_s23 + $0x1d0] sm:$0xff] %v3823_v52  ;;  %6822 = vrcp.f32 %v3799_v16 }
 0x6c5   : > { %v6799_v5 = vpop.eup %6798  ;;  %3846 = vst [vmem:[%s9360_s23 + $0x190] sm:$0xff] %v3821_v13  ;;  %6824 = vrcp.f32 %v3797_v12  ;;  %v10465_v13 = vld [vmem:[#allocation22_spill] sm:$0xff]  ;;  %v10467_v12 = vld [vmem:[#allocation108_spill] sm:$0xff] }
 0x6c6   : > { %v6801_v53 = vpop.eup %6800  ;;  %6826 = vpow2.f32 %v5114_v57  ;;  %v4091_v31 = vmul.f32 %v6799_v5, %v10461_v30  ;;  %5134 = vadd.xlane.f32.xlu1 %v9631_v33  ;;  %5132 = vadd.xlane.f32.xlu0 %v9634_v54 }
 0x6c7   : > { %v9641_v17 = vpop.eup %6802  ;;  %6828 = vpow2.f32 %v5112_v55  ;;  %v4089_v22 = vmul.f32 %v6801_v53, %v10463_v42  ;;  %v4067_v46 = vpop.xlane.xlu1 %4066 }
 0x6c8   : > { %10462 = vst [vmem:[#allocation42_spill] sm:$0xff] %v9641_v17  ;;  %v4065_v29 = vpop.xlane.xlu0 %4064  ;;  %v9644_v52 = vpop.eup %6804  ;;  %4115 = vst [vmem:[%s9360_s23 + $0x1d8] sm:$0xff] %v4091_v31  ;;  %6830 = vrcp.f32 %v4067_v46  ;;  %v10469_v46 = vld [vmem:[#allocation21_spill] sm:$0xff] }
 0x6c9   : > { %10464 = vst [vmem:[#allocation41_spill] sm:$0xff] %v9644_v52  ;;  %v6807_v57 = vpop.eup %6806  ;;  %4114 = vst [vmem:[%s9360_s23 + $0x198] sm:$0xff] %v4089_v22  ;;  %6832 = vrcp.f32 %v4065_v29 }
 0x6ca   : > { %v6809_v4 = vpop.eup %6808  ;;  %v3819_v16 = vmul.f32 %v6807_v57, %v10465_v13  ;;  %4878 = vadd.xlane.f32.xlu1 %v9641_v17  ;;  %4876 = vadd.xlane.f32.xlu0 %v9644_v52 }
 0x6cb   : > { %v9651_v55 = vpop.eup %6810  ;;  %v3817_v5 = vmul.f32 %v6809_v4, %v10467_v12  ;;  %v3795_v53 = vpop.xlane.xlu1 %3794  ;;  %v10471_v4 = vld [vmem:[#allocation111_spill] sm:$0xff] }
 0x6cc   : > { %10466 = vst [vmem:[#allocation44_spill] sm:$0xff] %v9651_v55  ;;  %v3793_v30 = vpop.xlane.xlu0 %3792  ;;  %v9654_v31 = vpop.eup %6812  ;;  %3845 = vst [vmem:[%s9360_s23 + $0x150] sm:$0xff] %v3819_v16  ;;  %6834 = vrcp.f32 %v3795_v53 }
 0x6cd   : > { %10468 = vst [vmem:[#allocation43_spill] sm:$0xff] %v9654_v31  ;;  %v6815_v42 = vpop.eup %6814  ;;  %3844 = vst [vmem:[%s9360_s23 + $0x110] sm:$0xff] %v3817_v5  ;;  %6836 = vrcp.f32 %v3793_v30  ;;  %v10473_v30 = vld [vmem:[#allocation24_spill] sm:$0xff] }
 0x6ce   : > { %v6817_v22 = vpop.eup %6816  ;;  %v4087_v29 = vmul.f32 %v6815_v42, %v10469_v46  ;;  %4874 = vadd.xlane.f32.xlu1 %v9651_v55  ;;  %4872 = vadd.xlane.f32.xlu0 %v9654_v31 }
 0x6cf   : > { %v9661_v57 = vpop.eup %6818  ;;  %v4085_v13 = vmul.f32 %v6817_v22, %v10471_v4  ;;  %v4063_v12 = vpop.xlane.xlu1 %4062  ;;  %v10475_v22 = vld [vmem:[#allocation112_spill] sm:$0xff] }
 0x6d0   : > { %10470 = vst [vmem:[#allocation46_spill] sm:$0xff] %v9661_v57  ;;  %v4061_v52 = vpop.xlane.xlu0 %4060  ;;  %v9664_v16 = vpop.eup %6820  ;;  %4113 = vst [vmem:[%s9360_s23 + $0x158] sm:$0xff] %v4087_v29  ;;  %6838 = vrcp.f32 %v4063_v12  ;;  %v10477_v12 = vld [vmem:[#allocation23_spill] sm:$0xff] }
 0x6d1   : > { %10472 = vst [vmem:[#allocation45_spill] sm:$0xff] %v9664_v16  ;;  %v6823_v5 = vpop.eup %6822  ;;  %4112 = vst [vmem:[%s9360_s23 + $0x118] sm:$0xff] %v4085_v13  ;;  %6840 = vrcp.f32 %v4061_v52 }
 0x6d2   : > { %v6825_v53 = vpop.eup %6824  ;;  %v3831_v42 = vmul.f32 %v6823_v5, %v10473_v30  ;;  %5142 = vadd.xlane.f32.xlu1 %v9661_v57  ;;  %5140 = vadd.xlane.f32.xlu0 %v9664_v16 }
 0x6d3   : > { %v9671_v46 = vpop.eup %6826  ;;  %v3829_v4 = vmul.f32 %v6825_v53, %v10475_v22  ;;  %v3807_v31 = vpop.xlane.xlu1 %3806  ;;  %v10478_v53 = vld [vmem:[#allocation115_spill] sm:$0xff] }
 0x6d4   : > { %10474 = vst [vmem:[#allocation48_spill] sm:$0xff] %v9671_v46  ;;  %v3805_v55 = vpop.xlane.xlu0 %3804  ;;  %v9674_v29 = vpop.eup %6828  ;;  %3851 = vst [vmem:[%s9360_s23 + $0x2d0] sm:$0xff] %v3831_v42  ;;  %6842 = vrcp.f32 %v3807_v31  ;;  %v10479_v31 = vld [vmem:[#allocation26_spill] sm:$0xff] }
 0x6d5   : > { %10476 = vst [vmem:[#allocation47_spill] sm:$0xff] %v9674_v29  ;;  %v6831_v52 = vpop.eup %6830  ;;  %3850 = vst [vmem:[%s9360_s23 + $0x290] sm:$0xff] %v3829_v4  ;;  %6844 = vrcp.f32 %v3805_v55 }
 0x6d6   : > { %v6833_v13 = vpop.eup %6832  ;;  %v4099_v5 = vmul.f32 %v6831_v52, %v10477_v12  ;;  %5146 = vadd.xlane.f32.xlu1 %v9671_v46  ;;  %5144 = vadd.xlane.f32.xlu0 %v9674_v29  ;;  %v10480_v52 = vld [vmem:[#allocation116_spill] sm:$0xff] }
 0x6d7   : > { %v4097_v30 = vmul.f32 %v6833_v13, %v10478_v53  ;;  %v4075_v22 = vpop.xlane.xlu1 %4074  ;;  %v10481_v53 = vld [vmem:[#allocation25_spill] sm:$0xff] }
 0x6d8   : > { %v4073_v16 = vpop.xlane.xlu0 %4072  ;;  %4119 = vst [vmem:[%s9360_s23 + $0x2d8] sm:$0xff] %v4099_v5  ;;  %6846 = vrcp.f32 %v4075_v22 }
 0x6d9   : > { %v6835_v42 = vpop.eup %6834  ;;  %4118 = vst [vmem:[%s9360_s23 + $0x298] sm:$0xff] %v4097_v30  ;;  %6848 = vrcp.f32 %v4073_v16  ;;  %v10482_v30 = vld [vmem:[#allocation119_spill] sm:$0xff] }
 0x6da   : > { %v6837_v55 = vpop.eup %6836  ;;  %v3827_v4 = vmul.f32 %v6835_v42, %v10479_v31 }
 0x6db   : > { %v3825_v12 = vmul.f32 %v6837_v55, %v10480_v52  ;;  %v3803_v46 = vpop.xlane.xlu1 %3802 }
 0x6dc   : > { %v3801_v57 = vpop.xlane.xlu0 %3800  ;;  %3849 = vst [vmem:[%s9360_s23 + $0x250] sm:$0xff] %v3827_v4  ;;  %6850 = vrcp.f32 %v3803_v46  ;;  %v10483_v46 = vld [vmem:[#allocation28_spill] sm:$0xff] }
 0x6dd   : > { %v6839_v13 = vpop.eup %6838  ;;  %3848 = vst [vmem:[%s9360_s23 + $0x210] sm:$0xff] %v3825_v12  ;;  %6852 = vrcp.f32 %v3801_v57  ;;  %v10484_v4 = vld [vmem:[#allocation120_spill] sm:$0xff] }
 0x6de   : > { %v6841_v5 = vpop.eup %6840  ;;  %v4095_v22 = vmul.f32 %v6839_v13, %v10481_v53 }
 0x6df   : > { %v4093_v16 = vmul.f32 %v6841_v5, %v10482_v30  ;;  %v4071_v29 = vpop.xlane.xlu1 %4070 }
 0x6e0   : > { %v4069_v17 = vpop.xlane.xlu0 %4068  ;;  %4117 = vst [vmem:[%s9360_s23 + $0x258] sm:$0xff] %v4095_v22  ;;  %6854 = vrcp.f32 %v4071_v29  ;;  %v10485_v29 = vld [vmem:[#allocation27_spill] sm:$0xff]  ;;  %v10486_v22 = vld [vmem:[#allocation30_spill] sm:$0xff] }
 0x6e1   : > { %v6843_v42 = vpop.eup %6842  ;;  %4116 = vst [vmem:[%s9360_s23 + $0x218] sm:$0xff] %v4093_v16  ;;  %6856 = vrcp.f32 %v4069_v17 }
 0x6e2   : > { %v6845_v55 = vpop.eup %6844  ;;  %v3839_v31 = vmul.f32 %v6843_v42, %v10483_v46  ;;  %v10487_v46 = vld [vmem:[#allocation123_spill] sm:$0xff] }
 0x6e3   : > { %v3837_v57 = vmul.f32 %v6845_v55, %v10484_v4  ;;  %v4319_v52 = vpop.xlane.xlu1 %4318  ;;  %v10488_v4 = vld [vmem:[#allocation29_spill] sm:$0xff] }
 0x6e4   : > { %v4317_v12 = vpop.xlane.xlu0 %4316  ;;  %3855 = vst [vmem:[%s9360_s23 + $0x3d0] sm:$0xff] %v3839_v31  ;;  %6858 = vrcp.f32 %v4319_v52 }
 0x6e5   : > { %v6847_v13 = vpop.eup %6846  ;;  %3854 = vst [vmem:[%s9360_s23 + $0x390] sm:$0xff] %v3837_v57  ;;  %6860 = vrcp.f32 %v4317_v12 }
 0x6e6   : > { %v6849_v5 = vpop.eup %6848  ;;  %v4107_v53 = vmul.f32 %v6847_v13, %v10485_v29  ;;  %v10489_v29 = vld [vmem:[#allocation32_spill] sm:$0xff] }
 0x6e7   : > { %v4105_v17 = vmul.f32 %v6849_v5, %v10486_v22  ;;  %v4587_v30 = vpop.xlane.xlu1 %4586  ;;  %v10490_v22 = vld [vmem:[#allocation31_spill] sm:$0xff] }
 0x6e8   : > { %v4585_v16 = vpop.xlane.xlu0 %4584  ;;  %4123 = vst [vmem:[%s9360_s23 + $0x3d8] sm:$0xff] %v4107_v53  ;;  %6862 = vrcp.f32 %v4587_v30 }
 0x6e9   : > { %v6851_v42 = vpop.eup %6850  ;;  %4122 = vst [vmem:[%s9360_s23 + $0x398] sm:$0xff] %v4105_v17  ;;  %6864 = vrcp.f32 %v4585_v16 }
 0x6ea   : > { %v6853_v55 = vpop.eup %6852  ;;  %v3835_v31 = vmul.f32 %v6851_v42, %v10487_v46  ;;  %v10491_v46 = vld [vmem:[#allocation34_spill] sm:$0xff] }
 0x6eb   : > { %v3833_v57 = vmul.f32 %v6853_v55, %v10488_v4  ;;  %v4315_v52 = vpop.xlane.xlu1 %4314  ;;  %v10492_v4 = vld [vmem:[#allocation33_spill] sm:$0xff] }
 0x6ec   : > { %v4313_v12 = vpop.xlane.xlu0 %4312  ;;  %3853 = vst [vmem:[%s9360_s23 + $0x350] sm:$0xff] %v3835_v31  ;;  %6866 = vrcp.f32 %v4315_v52 }
 0x6ed   : > { %v6855_v13 = vpop.eup %6854  ;;  %3852 = vst [vmem:[%s9360_s23 + $0x310] sm:$0xff] %v3833_v57  ;;  %6868 = vrcp.f32 %v4313_v12 }
 0x6ee   : > { %v6857_v5 = vpop.eup %6856  ;;  %v4103_v53 = vmul.f32 %v6855_v13, %v10489_v29  ;;  %v10493_v29 = vld [vmem:[#allocation36_spill] sm:$0xff] }
 0x6ef   : > { %v4101_v17 = vmul.f32 %v6857_v5, %v10490_v22  ;;  %v4583_v30 = vpop.xlane.xlu1 %4582  ;;  %v10494_v22 = vld [vmem:[#allocation35_spill] sm:$0xff] }
 0x6f0   : > { %v4581_v16 = vpop.xlane.xlu0 %4580  ;;  %4121 = vst [vmem:[%s9360_s23 + $0x358] sm:$0xff] %v4103_v53  ;;  %6870 = vrcp.f32 %v4583_v30 }
 0x6f1   : > { %v6859_v42 = vpop.eup %6858  ;;  %4120 = vst [vmem:[%s9360_s23 + $0x318] sm:$0xff] %v4101_v17  ;;  %6872 = vrcp.f32 %v4581_v16 }
 0x6f2   : > { %v6861_v55 = vpop.eup %6860  ;;  %v4351_v31 = vmul.f32 %v6859_v42, %v10491_v46 }
 0x6f3   : > { %v4349_v57 = vmul.f32 %v6861_v55, %v10492_v4  ;;  %v4327_v52 = vpop.xlane.xlu1 %4326 }
 0x6f4   : > { %v4325_v12 = vpop.xlane.xlu0 %4324  ;;  %4379 = vst [vmem:[%s9360_s23 + $0xe0] sm:$0xff] %v4351_v31  ;;  %6874 = vrcp.f32 %v4327_v52 }
 0x6f5   : > { %v6863_v13 = vpop.eup %6862  ;;  %4378 = vst [vmem:[%s9360_s23 + $0xa0] sm:$0xff] %v4349_v57  ;;  %6876 = vrcp.f32 %v4325_v12 }
 0x6f6   : > { %v6865_v5 = vpop.eup %6864  ;;  %v4619_v53 = vmul.f32 %v6863_v13, %v10493_v29 }
 0x6f7   : > { %v4617_v17 = vmul.f32 %v6865_v5, %v10494_v22  ;;  %v4595_v30 = vpop.xlane.xlu1 %4594 }
 0x6f8   : > { %v4593_v16 = vpop.xlane.xlu0 %4592  ;;  %4647 = vst [vmem:[%s9360_s23 + $0xe8] sm:$0xff] %v4619_v53  ;;  %6878 = vrcp.f32 %v4595_v30 }
 0x6f9   : > { %v6867_v42 = vpop.eup %6866  ;;  %4646 = vst [vmem:[%s9360_s23 + $0xa8] sm:$0xff] %v4617_v17  ;;  %6880 = vrcp.f32 %v4593_v16  ;;  %v10495_v17 = vld [vmem:[#allocation38_spill] sm:$0xff] }
 0x6fa   : > { %v6869_v55 = vpop.eup %6868  ;;  %v4347_v46 = vmul.f32 %v6867_v42, %v9299_v63 }
 0x6fb   : > { %v4345_v31 = vmul.f32 %v6869_v55, %v9301_v32  ;;  %v4323_v4 = vpop.xlane.xlu1 %4322  ;;  %v10496_v55 = vld [vmem:[#allocation37_spill] sm:$0xff] }
 0x6fc   : > { %v4321_v57 = vpop.xlane.xlu0 %4320  ;;  %4377 = vst [vmem:[%s9360_s23 + $0x60] sm:$0xff] %v4347_v46  ;;  %6882 = vrcp.f32 %v4323_v4 }
 0x6fd   : > { %v6871_v52 = vpop.eup %6870  ;;  %4376 = vst [vmem:[%s9360_s23 + $0x20] sm:$0xff] %v4345_v31  ;;  %6884 = vrcp.f32 %v4321_v57  ;;  %v10497_v31 = vld [vmem:[#allocation40_spill] sm:$0xff] }
 0x6fe   : > { %v6873_v12 = vpop.eup %6872  ;;  %v4615_v13 = vmul.f32 %v6871_v52, %v9309_v39 }
 0x6ff   : > { %v4613_v5 = vmul.f32 %v6873_v12, %v9311_v40  ;;  %v4591_v29 = vpop.xlane.xlu1 %4590 }
 0x700   : > { %v4589_v53 = vpop.xlane.xlu0 %4588  ;;  %4645 = vst [vmem:[%s9360_s23 + $0x68] sm:$0xff] %v4615_v13  ;;  %6886 = vrcp.f32 %v4591_v29 }
 0x701   : > { %v6875_v63 = vpop.eup %6874  ;;  %4644 = vst [vmem:[%s9360_s23 + $0x28] sm:$0xff] %v4613_v5  ;;  %6888 = vrcp.f32 %v4589_v53  ;;  %v10498_v5 = vld [vmem:[#allocation39_spill] sm:$0xff] }
 0x702   : > { %v6877_v32 = vpop.eup %6876  ;;  %v4359_v22 = vmul.f32 %v6875_v63, %v9319_v49 }
 0x703   : > { %v4357_v30 = vmul.f32 %v6877_v32, %v10495_v17  ;;  %v4335_v16 = vpop.xlane.xlu1 %4334 }
 0x704   : > { %v4333_v42 = vpop.xlane.xlu0 %4332  ;;  %4383 = vst [vmem:[%s9360_s23 + $0x1e0] sm:$0xff] %v4359_v22  ;;  %6890 = vrcp.f32 %v4335_v16 }
 0x705   : > { %v6879_v39 = vpop.eup %6878  ;;  %4382 = vst [vmem:[%s9360_s23 + $0x1a0] sm:$0xff] %v4357_v30  ;;  %6892 = vrcp.f32 %v4333_v42 }
 0x706   : > { %v6881_v40 = vpop.eup %6880  ;;  %v4627_v46 = vmul.f32 %v6879_v39, %v10496_v55 }
 0x707   : > { %v4625_v4 = vmul.f32 %v6881_v40, %v10497_v31  ;;  %v4603_v57 = vpop.xlane.xlu1 %4602 }
 0x708   : > { %v4601_v52 = vpop.xlane.xlu0 %4600  ;;  %4651 = vst [vmem:[%s9360_s23 + $0x1e8] sm:$0xff] %v4627_v46  ;;  %6894 = vrcp.f32 %v4603_v57 }
 0x709   : > { %v6883_v49 = vpop.eup %6882  ;;  %4650 = vst [vmem:[%s9360_s23 + $0x1a8] sm:$0xff] %v4625_v4  ;;  %6896 = vrcp.f32 %v4601_v52 }
 0x70a   : > { %v6885_v12 = vpop.eup %6884  ;;  %v4355_v13 = vmul.f32 %v6883_v49, %v9338_v9 }
 0x70b   : > { %v4353_v29 = vmul.f32 %v6885_v12, %v10498_v5  ;;  %v4331_v53 = vpop.xlane.xlu1 %4330 }
 0x70c   : > { %v4329_v63 = vpop.xlane.xlu0 %4328  ;;  %4381 = vst [vmem:[%s9360_s23 + $0x160] sm:$0xff] %v4355_v13  ;;  %6898 = vrcp.f32 %v4331_v53 }
 0x70d   : > { %v6887_v32 = vpop.eup %6886  ;;  %4380 = vst [vmem:[%s9360_s23 + $0x120] sm:$0xff] %v4353_v29  ;;  %6900 = vrcp.f32 %v4329_v63 }
 0x70e   : > { %v6889_v22 = vpop.eup %6888  ;;  %v4623_v17 = vmul.f32 %v6887_v32, %v9346_v59 }
 0x70f   : > { %v4621_v30 = vmul.f32 %v6889_v22, %v9348_v61  ;;  %v4599_v16 = vpop.xlane.xlu1 %4598 }
 0x710   : > { %v4597_v42 = vpop.xlane.xlu0 %4596  ;;  %4649 = vst [vmem:[%s9360_s23 + $0x168] sm:$0xff] %v4623_v17  ;;  %6902 = vrcp.f32 %v4599_v16 }
 0x711   : > { %v6891_v9 = vpop.eup %6890  ;;  %4648 = vst [vmem:[%s9360_s23 + $0x128] sm:$0xff] %v4621_v30  ;;  %6904 = vrcp.f32 %v4597_v42 }
 0x712   : > { %v6893_v39 = vpop.eup %6892  ;;  %v4367_v40 = vmul.f32 %v6891_v9, %v9366_v14 }
 0x713   : > { %v4365_v55 = vmul.f32 %v6893_v39, %v9372_v47  ;;  %v4343_v46 = vpop.xlane.xlu1 %4342 }
 0x714   : > { %v4341_v31 = vpop.xlane.xlu0 %4340  ;;  %4387 = vst [vmem:[%s9360_s23 + $0x2e0] sm:$0xff] %v4367_v40  ;;  %6906 = vrcp.f32 %v4343_v46 }
 0x715   : > { %v6895_v59 = vpop.eup %6894  ;;  %4386 = vst [vmem:[%s9360_s23 + $0x2a0] sm:$0xff] %v4365_v55  ;;  %6908 = vrcp.f32 %v4341_v31 }
 0x716   : > { %v6897_v61 = vpop.eup %6896  ;;  %v4635_v4 = vmul.f32 %v6895_v59, %v9381_v18 }
 0x717   : > { %v4633_v57 = vmul.f32 %v6897_v61, %v9386_v6  ;;  %v4611_v52 = vpop.xlane.xlu1 %4610 }
 0x718   : > { %v4609_v49 = vpop.xlane.xlu0 %4608  ;;  %4655 = vst [vmem:[%s9360_s23 + $0x2e8] sm:$0xff] %v4635_v4  ;;  %6910 = vrcp.f32 %v4611_v52 }
 0x719   : > { %v6899_v14 = vpop.eup %6898  ;;  %4654 = vst [vmem:[%s9360_s23 + $0x2a8] sm:$0xff] %v4633_v57  ;;  %6912 = vrcp.f32 %v4609_v49 }
 0x71a   : > { %v6901_v47 = vpop.eup %6900  ;;  %v4363_v12 = vmul.f32 %v6899_v14, %v9395_v10 }
 0x71b   : > { %v4361_v13 = vmul.f32 %v6901_v47, %v9400_v26  ;;  %v4339_v5 = vpop.xlane.xlu1 %4338 }
 0x71c   : > { %v4337_v29 = vpop.xlane.xlu0 %4336  ;;  %4385 = vst [vmem:[%s9360_s23 + $0x260] sm:$0xff] %v4363_v12  ;;  %6914 = vrcp.f32 %v4339_v5 }
 0x71d   : > { %v6903_v18 = vpop.eup %6902  ;;  %4384 = vst [vmem:[%s9360_s23 + $0x220] sm:$0xff] %v4361_v13  ;;  %6916 = vrcp.f32 %v4337_v29 }
 0x71e   : > { %v6905_v6 = vpop.eup %6904  ;;  %v4631_v53 = vmul.f32 %v6903_v18, %v9409_v41 }
 0x71f   : > { %v4629_v63 = vmul.f32 %v6905_v6, %v9414_v15  ;;  %v4607_v32 = vpop.xlane.xlu1 %4606 }
 0x720   : > { %v4605_v22 = vpop.xlane.xlu0 %4604  ;;  %4653 = vst [vmem:[%s9360_s23 + $0x268] sm:$0xff] %v4631_v53  ;;  %6918 = vrcp.f32 %v4607_v32 }
 0x721   : > { %v6907_v10 = vpop.eup %6906  ;;  %4652 = vst [vmem:[%s9360_s23 + $0x228] sm:$0xff] %v4629_v63  ;;  %6920 = vrcp.f32 %v4605_v22 }
 0x722   : > { %v6909_v26 = vpop.eup %6908  ;;  %v4375_v17 = vmul.f32 %v6907_v10, %v9423_v56 }
 0x723   : > { %v4373_v30 = vmul.f32 %v6909_v26, %v9428_v2  ;;  %v4855_v16 = vpop.xlane.xlu1 %4854 }
 0x724   : > { %v4853_v42 = vpop.xlane.xlu0 %4852  ;;  %4391 = vst [vmem:[%s9360_s23 + $0x3e0] sm:$0xff] %v4375_v17  ;;  %6922 = vrcp.f32 %v4855_v16 }
 0x725   : > { %v6911_v41 = vpop.eup %6910  ;;  %4390 = vst [vmem:[%s9360_s23 + $0x3a0] sm:$0xff] %v4373_v30  ;;  %6924 = vrcp.f32 %v4853_v42 }
 0x726   : > { %v6913_v15 = vpop.eup %6912  ;;  %v4643_v9 = vmul.f32 %v6911_v41, %v9437_v27 }
 0x727   : > { %v4641_v39 = vmul.f32 %v6913_v15, %v9442_v35  ;;  %v5123_v40 = vpop.xlane.xlu1 %5122 }
 0x728   : > { %v5121_v55 = vpop.xlane.xlu0 %5120  ;;  %4659 = vst [vmem:[%s9360_s23 + $0x3e8] sm:$0xff] %v4643_v9  ;;  %6926 = vrcp.f32 %v5123_v40 }
 0x729   : > { %v6915_v56 = vpop.eup %6914  ;;  %4658 = vst [vmem:[%s9360_s23 + $0x3a8] sm:$0xff] %v4641_v39  ;;  %6928 = vrcp.f32 %v5121_v55 }
 0x72a   : > { %v6917_v2 = vpop.eup %6916  ;;  %v4371_v46 = vmul.f32 %v6915_v56, %v9451_v7 }
 0x72b   : > { %v4369_v31 = vmul.f32 %v6917_v2, %v9456_v36  ;;  %v4851_v59 = vpop.xlane.xlu1 %4850 }
 0x72c   : > { %v4849_v61 = vpop.xlane.xlu0 %4848  ;;  %4389 = vst [vmem:[%s9360_s23 + $0x360] sm:$0xff] %v4371_v46  ;;  %6930 = vrcp.f32 %v4851_v59 }
 0x72d   : > { %v6919_v27 = vpop.eup %6918  ;;  %4388 = vst [vmem:[%s9360_s23 + $0x320] sm:$0xff] %v4369_v31  ;;  %6932 = vrcp.f32 %v4849_v61 }
 0x72e   : > { %v6921_v35 = vpop.eup %6920  ;;  %v4639_v4 = vmul.f32 %v6919_v27, %v9465_v38 }
 0x72f   : > { %v4637_v57 = vmul.f32 %v6921_v35, %v9470_v51  ;;  %v5119_v52 = vpop.xlane.xlu1 %5118 }
 0x730   : > { %v5117_v49 = vpop.xlane.xlu0 %5116  ;;  %4657 = vst [vmem:[%s9360_s23 + $0x368] sm:$0xff] %v4639_v4  ;;  %6934 = vrcp.f32 %v5119_v52 }
 0x731   : > { %v6923_v7 = vpop.eup %6922  ;;  %4656 = vst [vmem:[%s9360_s23 + $0x328] sm:$0xff] %v4637_v57  ;;  %6936 = vrcp.f32 %v5117_v49 }
 0x732   : > { %v6925_v36 = vpop.eup %6924  ;;  %v4887_v14 = vmul.f32 %v6923_v7, %v9479_v60 }
 0x733   : > { %v4885_v47 = vmul.f32 %v6925_v36, %v9484_v25  ;;  %v4863_v12 = vpop.xlane.xlu1 %4862 }
 0x734   : > { %v4861_v13 = vpop.xlane.xlu0 %4860  ;;  %4915 = vst [vmem:[%s9360_s23 + $0xf0] sm:$0xff] %v4887_v14  ;;  %6938 = vrcp.f32 %v4863_v12 }
 0x735   : > { %v6927_v38 = vpop.eup %6926  ;;  %4914 = vst [vmem:[%s9360_s23 + $0xb0] sm:$0xff] %v4885_v47  ;;  %6940 = vrcp.f32 %v4861_v13 }
 0x736   : > { %v6929_v51 = vpop.eup %6928  ;;  %v5155_v5 = vmul.f32 %v6927_v38, %v9493_v62 }
 0x737   : > { %v5153_v29 = vmul.f32 %v6929_v51, %v9498_v24  ;;  %v5131_v18 = vpop.xlane.xlu1 %5130 }
 0x738   : > { %v5129_v6 = vpop.xlane.xlu0 %5128  ;;  %5183 = vst [vmem:[%s9360_s23 + $0xf8] sm:$0xff] %v5155_v5  ;;  %6942 = vrcp.f32 %v5131_v18 }
 0x739   : > { %v6931_v60 = vpop.eup %6930  ;;  %5182 = vst [vmem:[%s9360_s23 + $0xb8] sm:$0xff] %v5153_v29  ;;  %6944 = vrcp.f32 %v5129_v6 }
 0x73a   : > { %v6933_v25 = vpop.eup %6932  ;;  %v4883_v53 = vmul.f32 %v6931_v60, %v9507_v3  ;;  %v10499_v60 = vld [vmem:[#allocation42_spill] sm:$0xff] }
 0x73b   : > { %v4881_v63 = vmul.f32 %v6933_v25, %v9512_v21  ;;  %v4859_v32 = vpop.xlane.xlu1 %4858 }
 0x73c   : > { %v4857_v22 = vpop.xlane.xlu0 %4856  ;;  %4913 = vst [vmem:[%s9360_s23 + $0x70] sm:$0xff] %v4883_v53  ;;  %6946 = vrcp.f32 %v4859_v32  ;;  %v10500_v53 = vld [vmem:[#allocation41_spill] sm:$0xff]  ;;  %v10501_v32 = vld [vmem:[#allocation44_spill] sm:$0xff] }
 0x73d   : > { %v6935_v62 = vpop.eup %6934  ;;  %4912 = vst [vmem:[%s9360_s23 + $0x30] sm:$0xff] %v4881_v63  ;;  %6948 = vrcp.f32 %v4857_v22 }
 0x73e   : > { %v6937_v24 = vpop.eup %6936  ;;  %v5151_v10 = vmul.f32 %v6935_v62, %v9521_v44  ;;  %v10502_v62 = vld [vmem:[#allocation43_spill] sm:$0xff] }
 0x73f   : > { %v5149_v26 = vmul.f32 %v6937_v24, %v9526_v37  ;;  %v5127_v17 = vpop.xlane.xlu1 %5126 }
 0x740   : > { %v5125_v30 = vpop.xlane.xlu0 %5124  ;;  %5181 = vst [vmem:[%s9360_s23 + $0x78] sm:$0xff] %v5151_v10  ;;  %6950 = vrcp.f32 %v5127_v17  ;;  %v10503_v17 = vld [vmem:[#allocation46_spill] sm:$0xff] }
 0x741   : > { %v6939_v3 = vpop.eup %6938  ;;  %5180 = vst [vmem:[%s9360_s23 + $0x38] sm:$0xff] %v5149_v26  ;;  %6952 = vrcp.f32 %v5125_v30 }
 0x742   : > { %v6941_v21 = vpop.eup %6940  ;;  %v4895_v16 = vmul.f32 %v6939_v3, %v9535_v11  ;;  %v10504_v3 = vld [vmem:[#allocation45_spill] sm:$0xff] }
 0x743   : > { %v4893_v42 = vmul.f32 %v6941_v21, %v9540_v19  ;;  %v4871_v41 = vpop.xlane.xlu1 %4870 }
 0x744   : > { %v4869_v15 = vpop.xlane.xlu0 %4868  ;;  %4919 = vst [vmem:[%s9360_s23 + $0x1f0] sm:$0xff] %v4895_v16  ;;  %6954 = vrcp.f32 %v4871_v41  ;;  %v10505_v41 = vld [vmem:[#allocation48_spill] sm:$0xff] }
 0x745   : > { %v6943_v44 = vpop.eup %6942  ;;  %4918 = vst [vmem:[%s9360_s23 + $0x1b0] sm:$0xff] %v4893_v42  ;;  %6956 = vrcp.f32 %v4869_v15 }
 0x746   : > { %v6945_v37 = vpop.eup %6944  ;;  %v5163_v9 = vmul.f32 %v6943_v44, %v9549_v50  ;;  %v10506_v44 = vld [vmem:[#allocation47_spill] sm:$0xff] }
 0x747   : > { %v5161_v39 = vmul.f32 %v6945_v37, %v9554_v0  ;;  %v5139_v40 = vpop.xlane.xlu1 %5138 }
 0x748   : > { %v5137_v55 = vpop.xlane.xlu0 %5136  ;;  %5187 = vst [vmem:[%s9360_s23 + $0x1f8] sm:$0xff] %v5163_v9  ;;  %6958 = vrcp.f32 %v5139_v40 }
 0x749   : > { %v6947_v11 = vpop.eup %6946  ;;  %5186 = vst [vmem:[%s9360_s23 + $0x1b8] sm:$0xff] %v5161_v39  ;;  %6960 = vrcp.f32 %v5137_v55 }
 0x74a   : > { %v6949_v19 = vpop.eup %6948  ;;  %v4891_v56 = vmul.f32 %v6947_v11, %v9563_v45 }
 0x74b   : > { %v4889_v2 = vmul.f32 %v6949_v19, %v9568_v34  ;;  %v4867_v46 = vpop.xlane.xlu1 %4866 }
 0x74c   : > { %v4865_v31 = vpop.xlane.xlu0 %4864  ;;  %4917 = vst [vmem:[%s9360_s23 + $0x170] sm:$0xff] %v4891_v56  ;;  %6962 = vrcp.f32 %v4867_v46 }
 0x74d   : > { %v6951_v50 = vpop.eup %6950  ;;  %4916 = vst [vmem:[%s9360_s23 + $0x130] sm:$0xff] %v4889_v2  ;;  %6964 = vrcp.f32 %v4865_v31 }
 0x74e   : > { %v6953_v0 = vpop.eup %6952  ;;  %v5159_v59 = vmul.f32 %v6951_v50, %v9577_v8 }
 0x74f   : > { %v5157_v61 = vmul.f32 %v6953_v0, %v9582_v1  ;;  %v5135_v27 = vpop.xlane.xlu1 %5134 }
 0x750   : > { %v5133_v35 = vpop.xlane.xlu0 %5132  ;;  %5185 = vst [vmem:[%s9360_s23 + $0x178] sm:$0xff] %v5159_v59  ;;  %6966 = vrcp.f32 %v5135_v27 }
 0x751   : > { %v6955_v45 = vpop.eup %6954  ;;  %5184 = vst [vmem:[%s9360_s23 + $0x138] sm:$0xff] %v5157_v61  ;;  %6968 = vrcp.f32 %v5133_v35 }
 0x752   : > { %v6957_v34 = vpop.eup %6956  ;;  %v4903_v4 = vmul.f32 %v6955_v45, %v9591_v43 }
 0x753   : > { %v4901_v57 = vmul.f32 %v6957_v34, %v9596_v58  ;;  %v4879_v52 = vpop.xlane.xlu1 %4878 }
 0x754   : > { %v4877_v49 = vpop.xlane.xlu0 %4876  ;;  %4923 = vst [vmem:[%s9360_s23 + $0x2f0] sm:$0xff] %v4903_v4  ;;  %6970 = vrcp.f32 %v4879_v52 }
 0x755   : > { %v6959_v8 = vpop.eup %6958  ;;  %4922 = vst [vmem:[%s9360_s23 + $0x2b0] sm:$0xff] %v4901_v57  ;;  %6972 = vrcp.f32 %v4877_v49 }
 0x756   : > { %v6961_v1 = vpop.eup %6960  ;;  %v5171_v7 = vmul.f32 %v6959_v8, %v9605_v48 }
 0x757   : > { %v5169_v36 = vmul.f32 %v6961_v1, %v9610_v23  ;;  %v4875_v14 = vpop.xlane.xlu1 %4874 }
 0x758   : > { %v4873_v47 = vpop.xlane.xlu0 %4872  ;;  %5191 = vst [vmem:[%s9360_s23 + $0x2f8] sm:$0xff] %v5171_v7  ;;  %6974 = vrcp.f32 %v4875_v14 }
 0x759   : > { %v6963_v43 = vpop.eup %6962  ;;  %5190 = vst [vmem:[%s9360_s23 + $0x2b8] sm:$0xff] %v5169_v36  ;;  %6976 = vrcp.f32 %v4873_v47 }
 0x75a   : > { %v6965_v58 = vpop.eup %6964  ;;  %v4899_v12 = vmul.f32 %v6963_v43, %v9619_v20 }
 0x75b   : > { %v4897_v13 = vmul.f32 %v6965_v58, %v9624_v28  ;;  %v5143_v38 = vpop.xlane.xlu1 %5142 }
 0x75c   : > { %v5141_v51 = vpop.xlane.xlu0 %5140  ;;  %4921 = vst [vmem:[%s9360_s23 + $0x270] sm:$0xff] %v4899_v12  ;;  %6978 = vrcp.f32 %v5143_v38 }
 0x75d   : > { %v6967_v48 = vpop.eup %6966  ;;  %4920 = vst [vmem:[%s9360_s23 + $0x230] sm:$0xff] %v4897_v13  ;;  %6980 = vrcp.f32 %v5141_v51 }
 0x75e   : > { %v6969_v23 = vpop.eup %6968  ;;  %v5167_v5 = vmul.f32 %v6967_v48, %v9631_v33 }
 0x75f   : > { %v5165_v29 = vmul.f32 %v6969_v23, %v9634_v54  ;;  %v5147_v18 = vpop.xlane.xlu1 %5146 }
 0x760   : > { %v5145_v20 = vpop.xlane.xlu0 %5144  ;;  %5189 = vst [vmem:[%s9360_s23 + $0x278] sm:$0xff] %v5167_v5  ;;  %6982 = vrcp.f32 %v5147_v18 }
 0x761   : > { %v6971_v28 = vpop.eup %6970  ;;  %5188 = vst [vmem:[%s9360_s23 + $0x238] sm:$0xff] %v5165_v29  ;;  %6984 = vrcp.f32 %v5145_v20 }
 0x762   : > { %v6973_v6 = vpop.eup %6972  ;;  %v4911_v25 = vmul.f32 %v6971_v28, %v10499_v60 }
 0x763   : > { %v4909_v63 = vmul.f32 %v6973_v6, %v10500_v53 }
 0x764   : > { %4927 = vst [vmem:[%s9360_s23 + $0x3f0] sm:$0xff] %v4911_v25 }
 0x765   : > { %v6975_v33 = vpop.eup %6974  ;;  %4926 = vst [vmem:[%s9360_s23 + $0x3b0] sm:$0xff] %v4909_v63 }
 0x766   : > { %v6977_v54 = vpop.eup %6976  ;;  %v4907_v22 = vmul.f32 %v6975_v33, %v10501_v32 }
 0x767   : > { %v4905_v24 = vmul.f32 %v6977_v54, %v10502_v62 }
 0x768   : > { %4925 = vst [vmem:[%s9360_s23 + $0x370] sm:$0xff] %v4907_v22 }
 0x769   : > { %v6979_v10 = vpop.eup %6978  ;;  %4924 = vst [vmem:[%s9360_s23 + $0x330] sm:$0xff] %v4905_v24 }
 0x76a   : > { %v6981_v26 = vpop.eup %6980  ;;  %v5175_v30 = vmul.f32 %v6979_v10, %v10503_v17 }
 0x76b   : > { %v5173_v21 = vmul.f32 %v6981_v26, %v10504_v3 }
 0x76c   : > { %5193 = vst [vmem:[%s9360_s23 + $0x378] sm:$0xff] %v5175_v30 }
 0x76d   : > { %v6983_v16 = vpop.eup %6982  ;;  %5192 = vst [vmem:[%s9360_s23 + $0x338] sm:$0xff] %v5173_v21 }
 0x76e   : > { %v6985_v42 = vpop.eup %6984  ;;  %v5179_v15 = vmul.f32 %v6983_v16, %v10505_v41 }
 0x76f   : > { %v5177_v37 = vmul.f32 %v6985_v42, %v10506_v44 }
 0x770   : > { %5195 = vst [vmem:[%s9360_s23 + $0x3f8] sm:$0xff] %v5179_v15 }
 0x771   : > { %5194 = vst [vmem:[%s9360_s23 + $0x3b8] sm:$0xff] %v5177_v37 }
 0x772   : > { %6999 = shalt.err (!%p6996_p3)
}
 0x773   : > { %s7000_s17 = scalar_lea.hbm %s9838_s27, 16384  ;;  %s7004_s24 = scalar_lea.hbm %s9896_s9, 32768 }
 0x774   : > { %p7001_p4 = scmp.ne.s32.totalorder %s9838_s27, %s7000_s17  ;;  %p7005_p9 = scmp.lt.s32.totalorder %s9838_s27, %s9896_s9 }
 0x775   : > { %p7006_p10 = scmp.lt.s32.totalorder %s7004_s24, %s7000_s17 }
 0x776   : > { %p7002_p7 = pnand %p7001_p4, %p7139_p5 }
 0x777   : > { %p7007_p11 = por %p7006_p10, %p7005_p9 }
 0x778   : > { %p7003_p8 = pneg %p7002_p7 }
 0x77a   : > { %p7008_p12 = pnand %p7007_p11, %p7003_p8 }
 0x77c   : > { %7011 = shalt.err (!%p7008_p12)
}
 0x77d   : > { %s7049_s28 = smov 1024   ;;  %s7050_s29 = smov 64  }
 0x77e   : > { %6369 = dma.vmem_to_hbm [thread:$0]  (%p7139_p5), %s9840_s25, 16384, %s9838_s27, %s9847_s13, %s7049_s28, %s7049_s28, %s7050_s29  }
 0x77f PF: > { %p6375_p13 = scmp.ge.s32.totalorder %s7046_s12, 2  ;;  %s5226_s14 = sand.u32 1, %s7034_s30  }
 0x780   : > { %s5227_s16 = scalar_lea.sflag [#allocation3], %s5226_s14 }
 0x781   : > { %p6372_p0 = pnand %p6375_p13, %p7143_p6 }
 0x783   : > { %p6373_p1 = pneg %p6372_p0 }
 0x785   : > { %7029 = dma.done.wait (%p6373_p1), %s5227_s16, 16384  }
 0x786   : > { %7031 = vsyncadd (%p6373_p1), %s5227_s16, 4294950912  ;;  %p19_p2 = scmp.ge.s32.totalorder %s7126_s15, 4   ;;  %s10507_s30 = smov %s7038_s10 }
 0x787   : > { %s10508_s10 = smov %s7042_s11  ;;  %s10509_s11 = smov %s7137_s18 }
 0x788   : > { %s10510_s12 = smov %s7126_s15  ;;  %21 = sbr.rel (!%p19_p2) target bundleno = 3 (0x3), region = 91 }
 0x78d   :  { %5232 = vsyncpa [#allocation3], 1 }
 0x78e   :  { %5234 = vsyncpa [#allocation3 + $0x1], 1 }

</bundles_post_ra>
